<compile_context>
chip_gen: v7x
topology: tpu7x:2x2x1
jax: 0.10.0
libtpu: 0.0.40
codegen_flags: <defaults>
</compile_context>

<pallas_src>
import functools
import math

import jax
import jax.numpy as jnp
from jax.experimental import pallas as pl
from jax.experimental.pallas import tpu as pltpu

KERNEL_SIZE = 4     # Diff_1.kernel_size
DILATION_BASE = 3   # Diff_1.dilation_base


# ------------------------------ fused kernel ---------------------------------

def _diff1_fused_kernel(*refs, cfg):
    (B, W, C, K, pad_full, H, num_lstm, sp_meta, L_c1d, L_full) = cfg
    T = W
    f32 = jnp.float32

    # ---- parse refs (inputs in wrapper order, output last), load values ----
    it = iter(refs)
    xf = next(it)[...]                                   # (B, W, C + 2*pad_full)
    sp_w = []
    for _ in range(len(sp_meta)):
        wk = next(it)[...]
        bb = next(it)[...]
        sp_w.append((wk, bb))
    w_c1, b_c1 = next(it)[...], next(it)[...]
    w_fl, b_fl = next(it)[...], next(it)[...]
    w1a, w1b, w1c, b1 = (next(it)[...], next(it)[...], next(it)[...], next(it)[...])
    lstm_w = []
    for _ in range(num_lstm):
        wih = next(it)[...]
        whh = next(it)[...]
        bia = next(it)[...]
        lstm_w.append((wih, whh, bia))
    head_w = [next(it)[...] for _ in range(num_lstm)]
    b_head = next(it)[...]
    o_ref = next(it)

    # ---- tiny constant 0/1 matrices (2-D iota + compare, VPU-only) ----------
    def shift_mat(rows, pad):
        cols = rows + 2 * pad                            # S[l, l+pad] = 1
        r = jax.lax.broadcasted_iota(jnp.int32, (rows, cols), 0)
        c = jax.lax.broadcasted_iota(jnp.int32, (rows, cols), 1)
        return jnp.where(c == r + pad, 1.0, 0.0).astype(f32)

    def pool_mats(L):
        Lp = L // 2                                      # MaxPool1d(2), floor mode
        r = jax.lax.broadcasted_iota(jnp.int32, (L, Lp), 0)
        c = jax.lax.broadcasted_iota(jnp.int32, (L, Lp), 1)
        ev = jnp.where(r == 2 * c, 1.0, 0.0).astype(f32)
        od = jnp.where(r == 2 * c + 1, 1.0, 0.0).astype(f32)
        return ev, od

    sp_shift = []
    Lprev = None
    for i, (d, p, Lout) in enumerate(sp_meta):
        sp_shift.append(None if i == 0 else shift_mat(Lprev, p))
        Lprev = Lout
    ev1, od1 = pool_mats(sp_meta[-1][2])
    ev2, od2 = pool_mats(L_c1d)
    ev3, od3 = pool_mats(L_full)

    # time/batch interleave: row t*B+b of P[b] selects row t of the per-batch seq
    rI = jax.lax.broadcasted_iota(jnp.int32, (T * B, T), 0)
    cI = jax.lax.broadcasted_iota(jnp.int32, (T * B, T), 1)
    P = [jnp.where(rI == cI * B + b, 1.0, 0.0).astype(f32) for b in range(B)]

    def conv(xp, wk, bb, K_, d, Lout):
        # stack K taps along sublanes -> single depth-(K*Cin) MXU contraction
        taps = [xp[:, k * d:k * d + Lout] for k in range(K_)]
        xs = jnp.concatenate(taps, axis=0)               # (K*Cin, Lout)
        return jnp.dot(wk, xs, preferred_element_type=f32) + bb

    def maxpool(x, ev, od):
        return jnp.maximum(jnp.dot(x, ev, preferred_element_type=f32),
                           jnp.dot(x, od, preferred_element_type=f32))

    # --------------------- autoencoder (all 3 branches) ----------------------
    p0 = sp_meta[0][1]
    ae_tb = jnp.zeros((T * B, 2), f32)                   # rows ordered t*B + b
    for b in range(B):                                   # static batch loop
        xfb = xf[b]                                      # (W, C + 2*pad_full)

        # spatial dilated chain (pad d*(K-1), dilation 3**i per layer)
        x1 = xfb[:, pad_full - p0: pad_full + C + p0]
        for i, (d, p, Lout) in enumerate(sp_meta):
            if i > 0:                                    # re-pad via shift matmul
                x1 = jnp.dot(x1, sp_shift[i], preferred_element_type=f32)
            wk, bb = sp_w[i]
            x1 = conv(x1, wk, bb, K, d, Lout)
        x1p = maxpool(x1, ev1, od1)                      # (W, L_sp//2)

        # causal 1d branch (k=3, pad=0)
        x2 = conv(xfb[:, pad_full: pad_full + C], w_c1, b_c1, 3, 1, L_c1d)
        x2p = maxpool(x2, ev2, od2)                      # (W, L_c1d//2)

        # causal full branch (k=C, pad=C-1)
        x3 = conv(xfb, w_fl, b_fl, C, 1, L_full)
        x3p = maxpool(x3, ev3, od3)                      # (W, L_full//2)

        # linear_1 + relu; branch concat folded into split weight slabs
        ae_b = jnp.dot(x1p, w1a, preferred_element_type=f32)
        ae_b = ae_b + jnp.dot(x2p, w1b, preferred_element_type=f32)
        ae_b = ae_b + jnp.dot(x3p, w1c, preferred_element_type=f32)
        ae_b = jnp.maximum(ae_b + b1, 0.0)               # (W, 2)

        ae_tb = ae_tb + jnp.dot(P[b], ae_b, preferred_element_type=f32)

    # ------------------------------- LSTM -------------------------------------
    # hoisted layer-0 input projection (+bias) for all T steps in one matmul
    wih0, _, bia0 = lstm_w[0]
    gx = jnp.dot(ae_tb, wih0, preferred_element_type=f32) + bia0      # (T*B, 4H)
    gates_in = [gx[t * B:(t + 1) * B, :] for t in range(T)]

    h_finals = []
    for l in range(num_lstm):
        whh = lstm_w[l][1]
        h = jnp.zeros((B, H), f32)
        c = jnp.zeros((B, H), f32)
        next_gates = []
        for t in range(T):                               # static unrolled T=W loop
            g = gates_in[t] + jnp.dot(h, whh, preferred_element_type=f32)
            sg = jax.nn.sigmoid(g)                       # one full 4H-wide sigmoid
            th = jnp.tanh(g)                             # one full 4H-wide tanh
            i_g = sg[:, 0 * H:1 * H]
            f_g = sg[:, 1 * H:2 * H]
            g_g = th[:, 2 * H:3 * H]
            o_g = sg[:, 3 * H:4 * H]
            c = f_g * c + i_g * g_g
            h = o_g * jnp.tanh(c)
            if l + 1 < num_lstm:                         # next layer's input proj,
                wih_n, _, bia_n = lstm_w[l + 1]          # off the serial h->h path
                next_gates.append(jnp.dot(h, wih_n, preferred_element_type=f32)
                                  + bia_n)
        h_finals.append(h)
        gates_in = next_gates

    # -------------------------------- head ------------------------------------
    # Linear(num_lstm*H, 3) with h_n concat folded into split weight slabs,
    # then relu(out[:, 2:]) -> (B, 1)
    acc = b_head                                         # (1, 3) broadcasts
    for l in range(num_lstm):
        acc = acc + jnp.dot(h_finals[l], head_w[l], preferred_element_type=f32)
    o_ref[...] = jnp.maximum(acc[:, 2:], 0.0).astype(o_ref.dtype)


# -------------------------------- wrapper -------------------------------------

def diff1_forward(params, x):
    # x: (B, window_size, input_size) == PyTorch NCL for the Conv1d branches
    B, W, C = x.shape
    K = KERNEL_SIZE
    pad_full = C - 1
    f32 = jnp.float32

    num_spatial = len(params['spatial'])
    sp_meta = []
    L = C
    for i in range(num_spatial):
        d = DILATION_BASE ** i
        p = d * (K - 1)
        L = L + p                                        # Lout = Lin + 2p - d(K-1)
        sp_meta.append((d, p, L))
    sp_meta = tuple(sp_meta)
    L_sp = L
    L_c1d = C - 3 + 1
    L_full = C + pad_full
    rf1, rf2, rf3 = L_sp // 2, L_c1d // 2, L_full // 2

    num_lstm = len(params['lstm'])
    H = params['lstm'][0][1].shape[0]                    # whh is (H, 4H)

    def conv_w(w):                                       # (Cout,Cin,K)->(Cout,K*Cin)
        Cout, Cin, K_ = w.shape
        return jnp.transpose(w, (0, 2, 1)).reshape(Cout, K_ * Cin).astype(f32)

    # single padded copy of x (max padding); branch-specific pads are in-kernel slices
    inputs = [jnp.pad(x.astype(f32), ((0, 0), (0, 0), (pad_full, pad_full)))]
    for (w, b) in params['spatial']:
        inputs += [conv_w(w), b.reshape(-1, 1).astype(f32)]
    w, b = params['c1d']
    inputs += [conv_w(w), b.reshape(-1, 1).astype(f32)]
    w, b = params['full']
    inputs += [conv_w(w), b.reshape(-1, 1).astype(f32)]
    w1 = params['lin1_w'].astype(f32)                    # (rfs, 2) split per branch
    inputs += [w1[:rf1], w1[rf1:rf1 + rf2], w1[rf1 + rf2:rf1 + rf2 + rf3],
               params['lin1_b'].reshape(1, -1).astype(f32)]
    for (wih, whh, bias) in params['lstm']:
        inputs += [wih.astype(f32), whh.astype(f32), bias.astype(f32)]
    hw = params['head_w'].astype(f32)                    # (num_lstm*H, 3) split
    for l in range(num_lstm):
        inputs.append(hw[l * H:(l + 1) * H])
    inputs.append(params['head_b'].reshape(1, -1).astype(f32))

    def full_spec(a):
        n = a.ndim
        return pl.BlockSpec(a.shape, lambda i, _n=n: (0,) * _n)

    cfg = (B, W, C, K, pad_full, H, num_lstm, sp_meta, L_c1d, L_full)
    kernel = functools.partial(_diff1_fused_kernel, cfg=cfg)

    return pl.pallas_call(
        kernel,
        out_shape=jax.ShapeDtypeStruct((B, 1), f32),
        grid=(1,),
        in_specs=[full_spec(a) for a in inputs],
        out_specs=pl.BlockSpec((B, 1), lambda i: (0, 0)),
        compiler_params=pltpu.CompilerParams(dimension_semantics=("arbitrary",)),
    )(*inputs)


# ------------------------- parameter initialization --------------------------

def init_params(key, *, input_size, window_size, hidden, num_lstm_layers):
    ks, base = KERNEL_SIZE, DILATION_BASE
    num_layers = int(math.log((window_size - 1) * (base - 1) / (ks - 1) + 1)
                     / math.log(base)) + 1
    # receptive-field bookkeeping, mirroring CausalDilatedConvNet.__init__
    s = sum(base ** i for i in range(num_layers))
    scd = int((input_size + (ks - 1) * s) / 2)
    c1d = int((input_size - 3 + 1) / 2)
    f1d = int((input_size + (input_size - 1)) / 2)
    rfs = scd + c1d + f1d

    keys = iter(jax.random.split(key, 64))

    def uconv(cout, cin, k):
        bound = 1.0 / math.sqrt(cin * k)
        w = jax.random.uniform(next(keys), (cout, cin, k), jnp.float32, -bound, bound)
        b = jax.random.uniform(next(keys), (cout,), jnp.float32, -bound, bound)
        return w, b

    def ulin(fin, fout):
        bound = 1.0 / math.sqrt(fin)
        w = jax.random.uniform(next(keys), (fin, fout), jnp.float32, -bound, bound)
        b = jax.random.uniform(next(keys), (fout,), jnp.float32, -bound, bound)
        return w, b

    params = {}
    # TODO(synk): the reference iterates `range(self.sub_small_num_layer)`, an
    # attribute that is never defined; we assume num_layers spatial layers with
    # dilation 3**i — the only choice consistent with scd_receptive_field_size
    # and Linear(receptive_field_size, 2).
    params['spatial'] = [uconv(window_size, window_size, ks) for _ in range(num_layers)]
    params['c1d'] = uconv(window_size, window_size, 3)              # CausalConv1d k=3, pad=0
    params['full'] = uconv(window_size, window_size, input_size)    # CausalConv1d k=C, pad=C-1
    params['lin1_w'], params['lin1_b'] = ulin(rfs, 2)

    # LSTM weights per Diff_1.init_weights: bias=0, weight_ih kaiming-normal,
    # weight_hh orthogonal.
    # TODO(synk): torch declares nn.LSTM(input_size=20) but actually receives
    # 2-feature sequences (would raise at runtime in PyTorch); we use the true
    # feature size 2 so the forward pass is well-defined.
    lstm = []
    din = 2
    H = hidden
    for _ in range(num_lstm_layers):
        std = math.sqrt(2.0 / din)
        wih = jax.random.normal(next(keys), (4 * H, din), jnp.float32) * std
        q, _ = jnp.linalg.qr(jax.random.normal(next(keys), (4 * H, H), jnp.float32))
        whh = q.astype(jnp.float32)                    # (4H, H) orthonormal columns
        bias = jnp.zeros((1, 4 * H), jnp.float32)      # b_ih + b_hh (both zero)
        lstm.append((wih.T, whh.T, bias))              # stored transposed for x @ W
        din = H
    params['lstm'] = lstm
    params['head_w'], params['head_b'] = ulin(hidden * num_lstm_layers, 3)
    return params


# --------------------- pure-JAX reference (sanity check) ----------------------

def _reference_forward(params, x):
    f32 = jnp.float32
    B, W, C = x.shape
    K = KERNEL_SIZE

    def conv1d_ref(x_, w, b, dilation, padding):
        B_, Cin, Lin = x_.shape
        Cout, _, K_ = w.shape
        Lout = Lin + 2 * padding - dilation * (K_ - 1)
        xp = jnp.pad(x_, ((0, 0), (0, 0), (padding, padding)))
        out = jnp.zeros((B_, Cout, Lout), f32)
        for k in range(K_):
            out = out + jnp.einsum('oc,bcl->bol', w[:, :, k],
                                   xp[:, :, k * dilation:k * dilation + Lout])
        return out + b[None, :, None]

    def maxpool_ref(x_):
        B_, C_, L_ = x_.shape
        Lp = L_ // 2
        return jnp.max(x_[:, :, :Lp * 2].reshape(B_, C_, Lp, 2), axis=-1)

    x1 = x
    for i, (w, b) in enumerate(params['spatial']):
        d = DILATION_BASE ** i
        x1 = conv1d_ref(x1, w, b, d, d * (K - 1))
    x1 = maxpool_ref(x1)
    w, b = params['c1d']
    x2 = maxpool_ref(conv1d_ref(x, w, b, 1, 0))
    w, b = params['full']
    x3 = maxpool_ref(conv1d_ref(x, w, b, 1, C - 1))
    concat = jnp.concatenate([x1, x2, x3], axis=2)
    ae = jnp.maximum(jnp.einsum('bwf,fo->bwo', concat, params['lin1_w'])
                     + params['lin1_b'], 0.0)            # (B, W, 2)

    H = params['lstm'][0][1].shape[0]
    xs = ae
    h_last = []
    for (wih, whh, bias) in params['lstm']:
        T = xs.shape[1]
        h = jnp.zeros((B, H), f32)
        c = jnp.zeros((B, H), f32)
        ys = []
        for t in range(T):
            g = xs[:, t, :] @ wih + h @ whh + bias
            i_g = jax.nn.sigmoid(g[:, :H])
            f_g = jax.nn.sigmoid(g[:, H:2 * H])
            g_g = jnp.tanh(g[:, 2 * H:3 * H])
            o_g = jax.nn.sigmoid(g[:, 3 * H:])
            c = f_g * c + i_g * g_g
            h = o_g * jnp.tanh(c)
            ys.append(h)
        xs = jnp.stack(ys, axis=1)
        h_last.append(h)
    hcat = jnp.concatenate(h_last, axis=-1)
    out = hcat @ params['head_w'] + params['head_b']
    return jnp.maximum(out[:, 2:], 0.0)


# --------------------------------- main ---------------------------------------

if __name__ == "__main__":
    INPUT_SIZE = 16        # feature dim (Conv1d length axis)
    WINDOW_SIZE = 8        # window (Conv1d channel axis / LSTM sequence length)
    LSTM_HIDDEN = 32
    LSTM_NUM_LAYERS = 2
    BATCH = 2

    key = jax.random.PRNGKey(0)
    pkey, xkey = jax.random.split(key)
    params = init_params(pkey, input_size=INPUT_SIZE, window_size=WINDOW_SIZE,
                         hidden=LSTM_HIDDEN, num_lstm_layers=LSTM_NUM_LAYERS)
    x = jax.random.normal(xkey, (BATCH, WINDOW_SIZE, INPUT_SIZE), jnp.float32)

    out = jax.jit(diff1_forward)(params, x)
    out = jax.block_until_ready(out)
    assert out.shape == (BATCH, 1), out.shape
    assert bool(jnp.all(out >= 0.0))                     # relu output

    # sanity check against the pure-JAX reference; loose tolerance because TPU
    # f32 matmuls round operands to bf16 passes and the two paths sum in
    # different orders.
    ref = jax.jit(_reference_forward)(params, x)
    ref = jax.block_until_ready(ref)
    assert bool(jnp.allclose(out, ref, atol=5e-2, rtol=5e-2))

    print("KERNEL_OK")
</pallas_src>

<mosaic_0001>
module attributes {stable_mosaic.version = 11 : i64} {
  func.func @_diff1_fused_kernel(%arg0: i32, %arg1: memref<2x8x46xf32, #tpu.memory_space<vmem>>, %arg2: memref<8x32xf32, #tpu.memory_space<vmem>>, %arg3: memref<8x1xf32, #tpu.memory_space<vmem>>, %arg4: memref<8x32xf32, #tpu.memory_space<vmem>>, %arg5: memref<8x1xf32, #tpu.memory_space<vmem>>, %arg6: memref<8x24xf32, #tpu.memory_space<vmem>>, %arg7: memref<8x1xf32, #tpu.memory_space<vmem>>, %arg8: memref<8x128xf32, #tpu.memory_space<vmem>>, %arg9: memref<8x1xf32, #tpu.memory_space<vmem>>, %arg10: memref<14x2xf32, #tpu.memory_space<vmem>>, %arg11: memref<7x2xf32, #tpu.memory_space<vmem>>, %arg12: memref<15x2xf32, #tpu.memory_space<vmem>>, %arg13: memref<1x2xf32, #tpu.memory_space<vmem>>, %arg14: memref<2x128xf32, #tpu.memory_space<vmem>>, %arg15: memref<32x128xf32, #tpu.memory_space<vmem>>, %arg16: memref<1x128xf32, #tpu.memory_space<vmem>>, %arg17: memref<32x128xf32, #tpu.memory_space<vmem>>, %arg18: memref<32x128xf32, #tpu.memory_space<vmem>>, %arg19: memref<1x128xf32, #tpu.memory_space<vmem>>, %arg20: memref<32x3xf32, #tpu.memory_space<vmem>>, %arg21: memref<32x3xf32, #tpu.memory_space<vmem>>, %arg22: memref<1x3xf32, #tpu.memory_space<vmem>>, %arg23: memref<2x1xf32, #tpu.memory_space<vmem>>) attributes {dimension_semantics = [#tpu.dimension_semantics<arbitrary>], iteration_bounds = array<i64: 1>, scalar_prefetch = 0 : i64, scratch_operands = 0 : i64, tpu.core_type = #tpu.core_type<tc>, window_params = [{pipeline_mode = #tpu.pipeline_mode<synchronous>, transform_indices = @transform_0, window_bounds = array<i64: 2, 8, 46>}, {pipeline_mode = #tpu.pipeline_mode<synchronous>, transform_indices = @transform_1, window_bounds = array<i64: 8, 32>}, {pipeline_mode = #tpu.pipeline_mode<synchronous>, transform_indices = @transform_2, window_bounds = array<i64: 8, 1>}, {pipeline_mode = #tpu.pipeline_mode<synchronous>, transform_indices = @transform_3, window_bounds = array<i64: 8, 32>}, {pipeline_mode = #tpu.pipeline_mode<synchronous>, transform_indices = @transform_4, window_bounds = array<i64: 8, 1>}, {pipeline_mode = #tpu.pipeline_mode<synchronous>, transform_indices = @transform_5, window_bounds = array<i64: 8, 24>}, {pipeline_mode = #tpu.pipeline_mode<synchronous>, transform_indices = @transform_6, window_bounds = array<i64: 8, 1>}, {pipeline_mode = #tpu.pipeline_mode<synchronous>, transform_indices = @transform_7, window_bounds = array<i64: 8, 128>}, {pipeline_mode = #tpu.pipeline_mode<synchronous>, transform_indices = @transform_8, window_bounds = array<i64: 8, 1>}, {pipeline_mode = #tpu.pipeline_mode<synchronous>, transform_indices = @transform_9, window_bounds = array<i64: 14, 2>}, {pipeline_mode = #tpu.pipeline_mode<synchronous>, transform_indices = @transform_10, window_bounds = array<i64: 7, 2>}, {pipeline_mode = #tpu.pipeline_mode<synchronous>, transform_indices = @transform_11, window_bounds = array<i64: 15, 2>}, {pipeline_mode = #tpu.pipeline_mode<synchronous>, transform_indices = @transform_12, window_bounds = array<i64: 1, 2>}, {pipeline_mode = #tpu.pipeline_mode<synchronous>, transform_indices = @transform_13, window_bounds = array<i64: 2, 128>}, {pipeline_mode = #tpu.pipeline_mode<synchronous>, transform_indices = @transform_14, window_bounds = array<i64: 32, 128>}, {pipeline_mode = #tpu.pipeline_mode<synchronous>, transform_indices = @transform_15, window_bounds = array<i64: 1, 128>}, {pipeline_mode = #tpu.pipeline_mode<synchronous>, transform_indices = @transform_16, window_bounds = array<i64: 32, 128>}, {pipeline_mode = #tpu.pipeline_mode<synchronous>, transform_indices = @transform_17, window_bounds = array<i64: 32, 128>}, {pipeline_mode = #tpu.pipeline_mode<synchronous>, transform_indices = @transform_18, window_bounds = array<i64: 1, 128>}, {pipeline_mode = #tpu.pipeline_mode<synchronous>, transform_indices = @transform_19, window_bounds = array<i64: 32, 3>}, {pipeline_mode = #tpu.pipeline_mode<synchronous>, transform_indices = @transform_20, window_bounds = array<i64: 32, 3>}, {pipeline_mode = #tpu.pipeline_mode<synchronous>, transform_indices = @transform_21, window_bounds = array<i64: 1, 3>}, {pipeline_mode = #tpu.pipeline_mode<synchronous>, transform_indices = @transform_22, window_bounds = array<i64: 2, 1>}]} {
    %c0 = arith.constant 0 : index
    %c0_0 = arith.constant 0 : index
    %c0_1 = arith.constant 0 : index
    %0 = vector.load %arg1[%c0, %c0_0, %c0_1] : memref<2x8x46xf32, #tpu.memory_space<vmem>>, vector<2x8x46xf32>
    %c0_2 = arith.constant 0 : index
    %c0_3 = arith.constant 0 : index
    %1 = vector.load %arg2[%c0_2, %c0_3] : memref<8x32xf32, #tpu.memory_space<vmem>>, vector<8x32xf32>
    %c0_4 = arith.constant 0 : index
    %c0_5 = arith.constant 0 : index
    %2 = vector.load %arg3[%c0_4, %c0_5] : memref<8x1xf32, #tpu.memory_space<vmem>>, vector<8x1xf32>
    %c0_6 = arith.constant 0 : index
    %c0_7 = arith.constant 0 : index
    %3 = vector.load %arg4[%c0_6, %c0_7] : memref<8x32xf32, #tpu.memory_space<vmem>>, vector<8x32xf32>
    %c0_8 = arith.constant 0 : index
    %c0_9 = arith.constant 0 : index
    %4 = vector.load %arg5[%c0_8, %c0_9] : memref<8x1xf32, #tpu.memory_space<vmem>>, vector<8x1xf32>
    %c0_10 = arith.constant 0 : index
    %c0_11 = arith.constant 0 : index
    %5 = vector.load %arg6[%c0_10, %c0_11] : memref<8x24xf32, #tpu.memory_space<vmem>>, vector<8x24xf32>
    %c0_12 = arith.constant 0 : index
    %c0_13 = arith.constant 0 : index
    %6 = vector.load %arg7[%c0_12, %c0_13] : memref<8x1xf32, #tpu.memory_space<vmem>>, vector<8x1xf32>
    %c0_14 = arith.constant 0 : index
    %c0_15 = arith.constant 0 : index
    %7 = vector.load %arg8[%c0_14, %c0_15] : memref<8x128xf32, #tpu.memory_space<vmem>>, vector<8x128xf32>
    %c0_16 = arith.constant 0 : index
    %c0_17 = arith.constant 0 : index
    %8 = vector.load %arg9[%c0_16, %c0_17] : memref<8x1xf32, #tpu.memory_space<vmem>>, vector<8x1xf32>
    %c0_18 = arith.constant 0 : index
    %c0_19 = arith.constant 0 : index
    %9 = vector.load %arg10[%c0_18, %c0_19] : memref<14x2xf32, #tpu.memory_space<vmem>>, vector<14x2xf32>
    %c0_20 = arith.constant 0 : index
    %c0_21 = arith.constant 0 : index
    %10 = vector.load %arg11[%c0_20, %c0_21] : memref<7x2xf32, #tpu.memory_space<vmem>>, vector<7x2xf32>
    %c0_22 = arith.constant 0 : index
    %c0_23 = arith.constant 0 : index
    %11 = vector.load %arg12[%c0_22, %c0_23] : memref<15x2xf32, #tpu.memory_space<vmem>>, vector<15x2xf32>
    %c0_24 = arith.constant 0 : index
    %c0_25 = arith.constant 0 : index
    %12 = vector.load %arg13[%c0_24, %c0_25] : memref<1x2xf32, #tpu.memory_space<vmem>>, vector<1x2xf32>
    %c0_26 = arith.constant 0 : index
    %c0_27 = arith.constant 0 : index
    %13 = vector.load %arg14[%c0_26, %c0_27] : memref<2x128xf32, #tpu.memory_space<vmem>>, vector<2x128xf32>
    %c0_28 = arith.constant 0 : index
    %c0_29 = arith.constant 0 : index
    %14 = vector.load %arg15[%c0_28, %c0_29] : memref<32x128xf32, #tpu.memory_space<vmem>>, vector<32x128xf32>
    %c0_30 = arith.constant 0 : index
    %c0_31 = arith.constant 0 : index
    %15 = vector.load %arg16[%c0_30, %c0_31] : memref<1x128xf32, #tpu.memory_space<vmem>>, vector<1x128xf32>
    %c0_32 = arith.constant 0 : index
    %c0_33 = arith.constant 0 : index
    %16 = vector.load %arg17[%c0_32, %c0_33] : memref<32x128xf32, #tpu.memory_space<vmem>>, vector<32x128xf32>
    %c0_34 = arith.constant 0 : index
    %c0_35 = arith.constant 0 : index
    %17 = vector.load %arg18[%c0_34, %c0_35] : memref<32x128xf32, #tpu.memory_space<vmem>>, vector<32x128xf32>
    %c0_36 = arith.constant 0 : index
    %c0_37 = arith.constant 0 : index
    %18 = vector.load %arg19[%c0_36, %c0_37] : memref<1x128xf32, #tpu.memory_space<vmem>>, vector<1x128xf32>
    %c0_38 = arith.constant 0 : index
    %c0_39 = arith.constant 0 : index
    %19 = vector.load %arg20[%c0_38, %c0_39] : memref<32x3xf32, #tpu.memory_space<vmem>>, vector<32x3xf32>
    %c0_40 = arith.constant 0 : index
    %c0_41 = arith.constant 0 : index
    %20 = vector.load %arg21[%c0_40, %c0_41] : memref<32x3xf32, #tpu.memory_space<vmem>>, vector<32x3xf32>
    %c0_42 = arith.constant 0 : index
    %c0_43 = arith.constant 0 : index
    %21 = vector.load %arg22[%c0_42, %c0_43] : memref<1x3xf32, #tpu.memory_space<vmem>>, vector<1x3xf32>
    %22 = tpu.iota {dimensions = array<i32: 0>} : vector<19x37xi32>
    %23 = tpu.iota {dimensions = array<i32: 1>} : vector<19x37xi32>
    %c9_i32 = arith.constant 9 : i32
    %24 = vector.broadcast %c9_i32 : i32 to vector<19x37xi32>
    %25 = arith.addi %22, %24 : vector<19x37xi32>
    %26 = arith.cmpi eq, %23, %25 : vector<19x37xi32>
    %cst = arith.constant 1.000000e+00 : f32
    %cst_44 = arith.constant 0.000000e+00 : f32
    %27 = vector.broadcast %cst : f32 to vector<19x37xf32>
    %28 = vector.broadcast %cst_44 : f32 to vector<19x37xf32>
    %29 = arith.select %26, %27, %28 : vector<19x37xi1>, vector<19x37xf32>
    %30 = tpu.iota {dimensions = array<i32: 0>} : vector<28x14xi32>
    %31 = tpu.iota {dimensions = array<i32: 1>} : vector<28x14xi32>
    %c2_i32 = arith.constant 2 : i32
    %32 = vector.broadcast %c2_i32 : i32 to vector<28x14xi32>
    %33 = arith.muli %32, %31 : vector<28x14xi32>
    %34 = arith.cmpi eq, %30, %33 : vector<28x14xi32>
    %cst_45 = arith.constant 1.000000e+00 : f32
    %cst_46 = arith.constant 0.000000e+00 : f32
    %35 = vector.broadcast %cst_45 : f32 to vector<28x14xf32>
    %36 = vector.broadcast %cst_46 : f32 to vector<28x14xf32>
    %37 = arith.select %34, %35, %36 : vector<28x14xi1>, vector<28x14xf32>
    %c2_i32_47 = arith.constant 2 : i32
    %38 = vector.broadcast %c2_i32_47 : i32 to vector<28x14xi32>
    %39 = arith.muli %38, %31 : vector<28x14xi32>
    %c1_i32 = arith.constant 1 : i32
    %40 = vector.broadcast %c1_i32 : i32 to vector<28x14xi32>
    %41 = arith.addi %39, %40 : vector<28x14xi32>
    %42 = arith.cmpi eq, %30, %41 : vector<28x14xi32>
    %cst_48 = arith.constant 1.000000e+00 : f32
    %cst_49 = arith.constant 0.000000e+00 : f32
    %43 = vector.broadcast %cst_48 : f32 to vector<28x14xf32>
    %44 = vector.broadcast %cst_49 : f32 to vector<28x14xf32>
    %45 = arith.select %42, %43, %44 : vector<28x14xi1>, vector<28x14xf32>
    %46 = tpu.iota {dimensions = array<i32: 0>} : vector<14x7xi32>
    %47 = tpu.iota {dimensions = array<i32: 1>} : vector<14x7xi32>
    %c2_i32_50 = arith.constant 2 : i32
    %48 = vector.broadcast %c2_i32_50 : i32 to vector<14x7xi32>
    %49 = arith.muli %48, %47 : vector<14x7xi32>
    %50 = arith.cmpi eq, %46, %49 : vector<14x7xi32>
    %cst_51 = arith.constant 1.000000e+00 : f32
    %cst_52 = arith.constant 0.000000e+00 : f32
    %51 = vector.broadcast %cst_51 : f32 to vector<14x7xf32>
    %52 = vector.broadcast %cst_52 : f32 to vector<14x7xf32>
    %53 = arith.select %50, %51, %52 : vector<14x7xi1>, vector<14x7xf32>
    %c2_i32_53 = arith.constant 2 : i32
    %54 = vector.broadcast %c2_i32_53 : i32 to vector<14x7xi32>
    %55 = arith.muli %54, %47 : vector<14x7xi32>
    %c1_i32_54 = arith.constant 1 : i32
    %56 = vector.broadcast %c1_i32_54 : i32 to vector<14x7xi32>
    %57 = arith.addi %55, %56 : vector<14x7xi32>
    %58 = arith.cmpi eq, %46, %57 : vector<14x7xi32>
    %cst_55 = arith.constant 1.000000e+00 : f32
    %cst_56 = arith.constant 0.000000e+00 : f32
    %59 = vector.broadcast %cst_55 : f32 to vector<14x7xf32>
    %60 = vector.broadcast %cst_56 : f32 to vector<14x7xf32>
    %61 = arith.select %58, %59, %60 : vector<14x7xi1>, vector<14x7xf32>
    %62 = tpu.iota {dimensions = array<i32: 0>} : vector<31x15xi32>
    %63 = tpu.iota {dimensions = array<i32: 1>} : vector<31x15xi32>
    %c2_i32_57 = arith.constant 2 : i32
    %64 = vector.broadcast %c2_i32_57 : i32 to vector<31x15xi32>
    %65 = arith.muli %64, %63 : vector<31x15xi32>
    %66 = arith.cmpi eq, %62, %65 : vector<31x15xi32>
    %cst_58 = arith.constant 1.000000e+00 : f32
    %cst_59 = arith.constant 0.000000e+00 : f32
    %67 = vector.broadcast %cst_58 : f32 to vector<31x15xf32>
    %68 = vector.broadcast %cst_59 : f32 to vector<31x15xf32>
    %69 = arith.select %66, %67, %68 : vector<31x15xi1>, vector<31x15xf32>
    %c2_i32_60 = arith.constant 2 : i32
    %70 = vector.broadcast %c2_i32_60 : i32 to vector<31x15xi32>
    %71 = arith.muli %70, %63 : vector<31x15xi32>
    %c1_i32_61 = arith.constant 1 : i32
    %72 = vector.broadcast %c1_i32_61 : i32 to vector<31x15xi32>
    %73 = arith.addi %71, %72 : vector<31x15xi32>
    %74 = arith.cmpi eq, %62, %73 : vector<31x15xi32>
    %cst_62 = arith.constant 1.000000e+00 : f32
    %cst_63 = arith.constant 0.000000e+00 : f32
    %75 = vector.broadcast %cst_62 : f32 to vector<31x15xf32>
    %76 = vector.broadcast %cst_63 : f32 to vector<31x15xf32>
    %77 = arith.select %74, %75, %76 : vector<31x15xi1>, vector<31x15xf32>
    %78 = tpu.iota {dimensions = array<i32: 0>} : vector<16x8xi32>
    %79 = tpu.iota {dimensions = array<i32: 1>} : vector<16x8xi32>
    %c2_i32_64 = arith.constant 2 : i32
    %80 = vector.broadcast %c2_i32_64 : i32 to vector<16x8xi32>
    %81 = arith.muli %79, %80 : vector<16x8xi32>
    %c0_i32 = arith.constant 0 : i32
    %82 = vector.broadcast %c0_i32 : i32 to vector<16x8xi32>
    %83 = arith.addi %81, %82 : vector<16x8xi32>
    %84 = arith.cmpi eq, %78, %83 : vector<16x8xi32>
    %cst_65 = arith.constant 1.000000e+00 : f32
    %cst_66 = arith.constant 0.000000e+00 : f32
    %85 = vector.broadcast %cst_65 : f32 to vector<16x8xf32>
    %86 = vector.broadcast %cst_66 : f32 to vector<16x8xf32>
    %87 = arith.select %84, %85, %86 : vector<16x8xi1>, vector<16x8xf32>
    %c2_i32_67 = arith.constant 2 : i32
    %88 = vector.broadcast %c2_i32_67 : i32 to vector<16x8xi32>
    %89 = arith.muli %79, %88 : vector<16x8xi32>
    %c1_i32_68 = arith.constant 1 : i32
    %90 = vector.broadcast %c1_i32_68 : i32 to vector<16x8xi32>
    %91 = arith.addi %89, %90 : vector<16x8xi32>
    %92 = arith.cmpi eq, %78, %91 : vector<16x8xi32>
    %cst_69 = arith.constant 1.000000e+00 : f32
    %cst_70 = arith.constant 0.000000e+00 : f32
    %93 = vector.broadcast %cst_69 : f32 to vector<16x8xf32>
    %94 = vector.broadcast %cst_70 : f32 to vector<16x8xf32>
    %95 = arith.select %92, %93, %94 : vector<16x8xi1>, vector<16x8xf32>
    %cst_71 = arith.constant 0.000000e+00 : f32
    %96 = vector.broadcast %cst_71 : f32 to vector<16x2xf32>
    %97 = vector.extract_strided_slice %0 {offsets = [0, 0, 0], sizes = [1, 8, 46], strides = [1, 1, 1]} : vector<2x8x46xf32> to vector<1x8x46xf32>
    %98 = vector.shape_cast %97 : vector<1x8x46xf32> to vector<8x46xf32>
    %99 = vector.extract_strided_slice %98 {offsets = [0, 12], sizes = [8, 22], strides = [1, 1]} : vector<8x46xf32> to vector<8x22xf32>
    %100 = vector.extract_strided_slice %99 {offsets = [0, 0], sizes = [8, 19], strides = [1, 1]} : vector<8x22xf32> to vector<8x19xf32>
    %101 = vector.extract_strided_slice %99 {offsets = [0, 1], sizes = [8, 19], strides = [1, 1]} : vector<8x22xf32> to vector<8x19xf32>
    %102 = vector.extract_strided_slice %99 {offsets = [0, 2], sizes = [8, 19], strides = [1, 1]} : vector<8x22xf32> to vector<8x19xf32>
    %103 = vector.extract_strided_slice %99 {offsets = [0, 3], sizes = [8, 19], strides = [1, 1]} : vector<8x22xf32> to vector<8x19xf32>
    %104 = tpu.concatenate %100, %101, %102, %103 in 0 : vector<8x19xf32>, vector<8x19xf32>, vector<8x19xf32>, vector<8x19xf32> -> vector<32x19xf32>
    %cst_72 = arith.constant dense<0.000000e+00> : vector<8x19xf32>
    %105 = tpu.matmul %1, %104, %cst_72 {dimension_numbers = #tpu.dot_dimension_numbers<[1], [0], [0], [1], [0, 0, 1, 1], [], []>} : vector<8x32xf32>, vector<32x19xf32>, vector<8x19xf32> -> vector<8x19xf32>
    %106 = vector.broadcast %2 : vector<8x1xf32> to vector<8x19xf32>
    %107 = arith.addf %105, %106 : vector<8x19xf32>
    %cst_73 = arith.constant dense<0.000000e+00> : vector<8x37xf32>
    %108 = tpu.matmul %107, %29, %cst_73 {dimension_numbers = #tpu.dot_dimension_numbers<[1], [0], [0], [1], [0, 0, 1, 1], [], []>} : vector<8x19xf32>, vector<19x37xf32>, vector<8x37xf32> -> vector<8x37xf32>
    %109 = vector.extract_strided_slice %108 {offsets = [0, 0], sizes = [8, 28], strides = [1, 1]} : vector<8x37xf32> to vector<8x28xf32>
    %110 = vector.extract_strided_slice %108 {offsets = [0, 3], sizes = [8, 28], strides = [1, 1]} : vector<8x37xf32> to vector<8x28xf32>
    %111 = vector.extract_strided_slice %108 {offsets = [0, 6], sizes = [8, 28], strides = [1, 1]} : vector<8x37xf32> to vector<8x28xf32>
    %112 = vector.extract_strided_slice %108 {offsets = [0, 9], sizes = [8, 28], strides = [1, 1]} : vector<8x37xf32> to vector<8x28xf32>
    %113 = tpu.concatenate %109, %110, %111, %112 in 0 : vector<8x28xf32>, vector<8x28xf32>, vector<8x28xf32>, vector<8x28xf32> -> vector<32x28xf32>
    %cst_74 = arith.constant dense<0.000000e+00> : vector<8x28xf32>
    %114 = tpu.matmul %3, %113, %cst_74 {dimension_numbers = #tpu.dot_dimension_numbers<[1], [0], [0], [1], [0, 0, 1, 1], [], []>} : vector<8x32xf32>, vector<32x28xf32>, vector<8x28xf32> -> vector<8x28xf32>
    %115 = vector.broadcast %4 : vector<8x1xf32> to vector<8x28xf32>
    %116 = arith.addf %114, %115 : vector<8x28xf32>
    %cst_75 = arith.constant dense<0.000000e+00> : vector<8x14xf32>
    %117 = tpu.matmul %116, %37, %cst_75 {dimension_numbers = #tpu.dot_dimension_numbers<[1], [0], [0], [1], [0, 0, 1, 1], [], []>} : vector<8x28xf32>, vector<28x14xf32>, vector<8x14xf32> -> vector<8x14xf32>
    %cst_76 = arith.constant dense<0.000000e+00> : vector<8x14xf32>
    %118 = tpu.matmul %116, %45, %cst_76 {dimension_numbers = #tpu.dot_dimension_numbers<[1], [0], [0], [1], [0, 0, 1, 1], [], []>} : vector<8x28xf32>, vector<28x14xf32>, vector<8x14xf32> -> vector<8x14xf32>
    %119 = arith.maximumf %117, %118 : vector<8x14xf32>
    %120 = vector.extract_strided_slice %98 {offsets = [0, 15], sizes = [8, 16], strides = [1, 1]} : vector<8x46xf32> to vector<8x16xf32>
    %121 = vector.extract_strided_slice %120 {offsets = [0, 0], sizes = [8, 14], strides = [1, 1]} : vector<8x16xf32> to vector<8x14xf32>
    %122 = vector.extract_strided_slice %120 {offsets = [0, 1], sizes = [8, 14], strides = [1, 1]} : vector<8x16xf32> to vector<8x14xf32>
    %123 = vector.extract_strided_slice %120 {offsets = [0, 2], sizes = [8, 14], strides = [1, 1]} : vector<8x16xf32> to vector<8x14xf32>
    %124 = tpu.concatenate %121, %122, %123 in 0 : vector<8x14xf32>, vector<8x14xf32>, vector<8x14xf32> -> vector<24x14xf32>
    %cst_77 = arith.constant dense<0.000000e+00> : vector<8x14xf32>
    %125 = tpu.matmul %5, %124, %cst_77 {dimension_numbers = #tpu.dot_dimension_numbers<[1], [0], [0], [1], [0, 0, 1, 1], [], []>} : vector<8x24xf32>, vector<24x14xf32>, vector<8x14xf32> -> vector<8x14xf32>
    %126 = vector.broadcast %6 : vector<8x1xf32> to vector<8x14xf32>
    %127 = arith.addf %125, %126 : vector<8x14xf32>
    %cst_78 = arith.constant dense<0.000000e+00> : vector<8x7xf32>
    %128 = tpu.matmul %127, %53, %cst_78 {dimension_numbers = #tpu.dot_dimension_numbers<[1], [0], [0], [1], [0, 0, 1, 1], [], []>} : vector<8x14xf32>, vector<14x7xf32>, vector<8x7xf32> -> vector<8x7xf32>
    %cst_79 = arith.constant dense<0.000000e+00> : vector<8x7xf32>
    %129 = tpu.matmul %127, %61, %cst_79 {dimension_numbers = #tpu.dot_dimension_numbers<[1], [0], [0], [1], [0, 0, 1, 1], [], []>} : vector<8x14xf32>, vector<14x7xf32>, vector<8x7xf32> -> vector<8x7xf32>
    %130 = arith.maximumf %128, %129 : vector<8x7xf32>
    %131 = vector.extract_strided_slice %98 {offsets = [0, 0], sizes = [8, 31], strides = [1, 1]} : vector<8x46xf32> to vector<8x31xf32>
    %132 = vector.extract_strided_slice %98 {offsets = [0, 1], sizes = [8, 31], strides = [1, 1]} : vector<8x46xf32> to vector<8x31xf32>
    %133 = vector.extract_strided_slice %98 {offsets = [0, 2], sizes = [8, 31], strides = [1, 1]} : vector<8x46xf32> to vector<8x31xf32>
    %134 = vector.extract_strided_slice %98 {offsets = [0, 3], sizes = [8, 31], strides = [1, 1]} : vector<8x46xf32> to vector<8x31xf32>
    %135 = vector.extract_strided_slice %98 {offsets = [0, 4], sizes = [8, 31], strides = [1, 1]} : vector<8x46xf32> to vector<8x31xf32>
    %136 = vector.extract_strided_slice %98 {offsets = [0, 5], sizes = [8, 31], strides = [1, 1]} : vector<8x46xf32> to vector<8x31xf32>
    %137 = vector.extract_strided_slice %98 {offsets = [0, 6], sizes = [8, 31], strides = [1, 1]} : vector<8x46xf32> to vector<8x31xf32>
    %138 = vector.extract_strided_slice %98 {offsets = [0, 7], sizes = [8, 31], strides = [1, 1]} : vector<8x46xf32> to vector<8x31xf32>
    %139 = vector.extract_strided_slice %98 {offsets = [0, 8], sizes = [8, 31], strides = [1, 1]} : vector<8x46xf32> to vector<8x31xf32>
    %140 = vector.extract_strided_slice %98 {offsets = [0, 9], sizes = [8, 31], strides = [1, 1]} : vector<8x46xf32> to vector<8x31xf32>
    %141 = vector.extract_strided_slice %98 {offsets = [0, 10], sizes = [8, 31], strides = [1, 1]} : vector<8x46xf32> to vector<8x31xf32>
    %142 = vector.extract_strided_slice %98 {offsets = [0, 11], sizes = [8, 31], strides = [1, 1]} : vector<8x46xf32> to vector<8x31xf32>
    %143 = vector.extract_strided_slice %98 {offsets = [0, 12], sizes = [8, 31], strides = [1, 1]} : vector<8x46xf32> to vector<8x31xf32>
    %144 = vector.extract_strided_slice %98 {offsets = [0, 13], sizes = [8, 31], strides = [1, 1]} : vector<8x46xf32> to vector<8x31xf32>
    %145 = vector.extract_strided_slice %98 {offsets = [0, 14], sizes = [8, 31], strides = [1, 1]} : vector<8x46xf32> to vector<8x31xf32>
    %146 = vector.extract_strided_slice %98 {offsets = [0, 15], sizes = [8, 31], strides = [1, 1]} : vector<8x46xf32> to vector<8x31xf32>
    %147 = tpu.concatenate %131, %132, %133, %134, %135, %136, %137, %138, %139, %140, %141, %142, %143, %144, %145, %146 in 0 : vector<8x31xf32>, vector<8x31xf32>, vector<8x31xf32>, vector<8x31xf32>, vector<8x31xf32>, vector<8x31xf32>, vector<8x31xf32>, vector<8x31xf32>, vector<8x31xf32>, vector<8x31xf32>, vector<8x31xf32>, vector<8x31xf32>, vector<8x31xf32>, vector<8x31xf32>, vector<8x31xf32>, vector<8x31xf32> -> vector<128x31xf32>
    %cst_80 = arith.constant dense<0.000000e+00> : vector<8x31xf32>
    %148 = tpu.matmul %7, %147, %cst_80 {dimension_numbers = #tpu.dot_dimension_numbers<[1], [0], [0], [1], [0, 0, 1, 1], [], []>} : vector<8x128xf32>, vector<128x31xf32>, vector<8x31xf32> -> vector<8x31xf32>
    %149 = vector.broadcast %8 : vector<8x1xf32> to vector<8x31xf32>
    %150 = arith.addf %148, %149 : vector<8x31xf32>
    %cst_81 = arith.constant dense<0.000000e+00> : vector<8x15xf32>
    %151 = tpu.matmul %150, %69, %cst_81 {dimension_numbers = #tpu.dot_dimension_numbers<[1], [0], [0], [1], [0, 0, 1, 1], [], []>} : vector<8x31xf32>, vector<31x15xf32>, vector<8x15xf32> -> vector<8x15xf32>
    %cst_82 = arith.constant dense<0.000000e+00> : vector<8x15xf32>
    %152 = tpu.matmul %150, %77, %cst_82 {dimension_numbers = #tpu.dot_dimension_numbers<[1], [0], [0], [1], [0, 0, 1, 1], [], []>} : vector<8x31xf32>, vector<31x15xf32>, vector<8x15xf32> -> vector<8x15xf32>
    %153 = arith.maximumf %151, %152 : vector<8x15xf32>
    %cst_83 = arith.constant dense<0.000000e+00> : vector<8x2xf32>
    %154 = tpu.matmul %119, %9, %cst_83 {dimension_numbers = #tpu.dot_dimension_numbers<[1], [0], [0], [1], [0, 0, 1, 1], [], []>} : vector<8x14xf32>, vector<14x2xf32>, vector<8x2xf32> -> vector<8x2xf32>
    %cst_84 = arith.constant dense<0.000000e+00> : vector<8x2xf32>
    %155 = tpu.matmul %130, %10, %cst_84 {dimension_numbers = #tpu.dot_dimension_numbers<[1], [0], [0], [1], [0, 0, 1, 1], [], []>} : vector<8x7xf32>, vector<7x2xf32>, vector<8x2xf32> -> vector<8x2xf32>
    %156 = arith.addf %154, %155 : vector<8x2xf32>
    %cst_85 = arith.constant dense<0.000000e+00> : vector<8x2xf32>
    %157 = tpu.matmul %153, %11, %cst_85 {dimension_numbers = #tpu.dot_dimension_numbers<[1], [0], [0], [1], [0, 0, 1, 1], [], []>} : vector<8x15xf32>, vector<15x2xf32>, vector<8x2xf32> -> vector<8x2xf32>
    %158 = arith.addf %156, %157 : vector<8x2xf32>
    %159 = vector.broadcast %12 : vector<1x2xf32> to vector<8x2xf32>
    %160 = arith.addf %158, %159 : vector<8x2xf32>
    %cst_86 = arith.constant 0.000000e+00 : f32
    %161 = vector.broadcast %cst_86 : f32 to vector<8x2xf32>
    %162 = arith.maximumf %160, %161 : vector<8x2xf32>
    %cst_87 = arith.constant dense<0.000000e+00> : vector<16x2xf32>
    %163 = tpu.matmul %87, %162, %cst_87 {dimension_numbers = #tpu.dot_dimension_numbers<[1], [0], [0], [1], [0, 0, 1, 1], [], []>} : vector<16x8xf32>, vector<8x2xf32>, vector<16x2xf32> -> vector<16x2xf32>
    %164 = arith.addf %96, %163 : vector<16x2xf32>
    %165 = vector.extract_strided_slice %0 {offsets = [1, 0, 0], sizes = [1, 8, 46], strides = [1, 1, 1]} : vector<2x8x46xf32> to vector<1x8x46xf32>
    %166 = vector.shape_cast %165 : vector<1x8x46xf32> to vector<8x46xf32>
    %167 = vector.extract_strided_slice %166 {offsets = [0, 12], sizes = [8, 22], strides = [1, 1]} : vector<8x46xf32> to vector<8x22xf32>
    %168 = vector.extract_strided_slice %167 {offsets = [0, 0], sizes = [8, 19], strides = [1, 1]} : vector<8x22xf32> to vector<8x19xf32>
    %169 = vector.extract_strided_slice %167 {offsets = [0, 1], sizes = [8, 19], strides = [1, 1]} : vector<8x22xf32> to vector<8x19xf32>
    %170 = vector.extract_strided_slice %167 {offsets = [0, 2], sizes = [8, 19], strides = [1, 1]} : vector<8x22xf32> to vector<8x19xf32>
    %171 = vector.extract_strided_slice %167 {offsets = [0, 3], sizes = [8, 19], strides = [1, 1]} : vector<8x22xf32> to vector<8x19xf32>
    %172 = tpu.concatenate %168, %169, %170, %171 in 0 : vector<8x19xf32>, vector<8x19xf32>, vector<8x19xf32>, vector<8x19xf32> -> vector<32x19xf32>
    %cst_88 = arith.constant dense<0.000000e+00> : vector<8x19xf32>
    %173 = tpu.matmul %1, %172, %cst_88 {dimension_numbers = #tpu.dot_dimension_numbers<[1], [0], [0], [1], [0, 0, 1, 1], [], []>} : vector<8x32xf32>, vector<32x19xf32>, vector<8x19xf32> -> vector<8x19xf32>
    %174 = vector.broadcast %2 : vector<8x1xf32> to vector<8x19xf32>
    %175 = arith.addf %173, %174 : vector<8x19xf32>
    %cst_89 = arith.constant dense<0.000000e+00> : vector<8x37xf32>
    %176 = tpu.matmul %175, %29, %cst_89 {dimension_numbers = #tpu.dot_dimension_numbers<[1], [0], [0], [1], [0, 0, 1, 1], [], []>} : vector<8x19xf32>, vector<19x37xf32>, vector<8x37xf32> -> vector<8x37xf32>
    %177 = vector.extract_strided_slice %176 {offsets = [0, 0], sizes = [8, 28], strides = [1, 1]} : vector<8x37xf32> to vector<8x28xf32>
    %178 = vector.extract_strided_slice %176 {offsets = [0, 3], sizes = [8, 28], strides = [1, 1]} : vector<8x37xf32> to vector<8x28xf32>
    %179 = vector.extract_strided_slice %176 {offsets = [0, 6], sizes = [8, 28], strides = [1, 1]} : vector<8x37xf32> to vector<8x28xf32>
    %180 = vector.extract_strided_slice %176 {offsets = [0, 9], sizes = [8, 28], strides = [1, 1]} : vector<8x37xf32> to vector<8x28xf32>
    %181 = tpu.concatenate %177, %178, %179, %180 in 0 : vector<8x28xf32>, vector<8x28xf32>, vector<8x28xf32>, vector<8x28xf32> -> vector<32x28xf32>
    %cst_90 = arith.constant dense<0.000000e+00> : vector<8x28xf32>
    %182 = tpu.matmul %3, %181, %cst_90 {dimension_numbers = #tpu.dot_dimension_numbers<[1], [0], [0], [1], [0, 0, 1, 1], [], []>} : vector<8x32xf32>, vector<32x28xf32>, vector<8x28xf32> -> vector<8x28xf32>
    %183 = vector.broadcast %4 : vector<8x1xf32> to vector<8x28xf32>
    %184 = arith.addf %182, %183 : vector<8x28xf32>
    %cst_91 = arith.constant dense<0.000000e+00> : vector<8x14xf32>
    %185 = tpu.matmul %184, %37, %cst_91 {dimension_numbers = #tpu.dot_dimension_numbers<[1], [0], [0], [1], [0, 0, 1, 1], [], []>} : vector<8x28xf32>, vector<28x14xf32>, vector<8x14xf32> -> vector<8x14xf32>
    %cst_92 = arith.constant dense<0.000000e+00> : vector<8x14xf32>
    %186 = tpu.matmul %184, %45, %cst_92 {dimension_numbers = #tpu.dot_dimension_numbers<[1], [0], [0], [1], [0, 0, 1, 1], [], []>} : vector<8x28xf32>, vector<28x14xf32>, vector<8x14xf32> -> vector<8x14xf32>
    %187 = arith.maximumf %185, %186 : vector<8x14xf32>
    %188 = vector.extract_strided_slice %166 {offsets = [0, 15], sizes = [8, 16], strides = [1, 1]} : vector<8x46xf32> to vector<8x16xf32>
    %189 = vector.extract_strided_slice %188 {offsets = [0, 0], sizes = [8, 14], strides = [1, 1]} : vector<8x16xf32> to vector<8x14xf32>
    %190 = vector.extract_strided_slice %188 {offsets = [0, 1], sizes = [8, 14], strides = [1, 1]} : vector<8x16xf32> to vector<8x14xf32>
    %191 = vector.extract_strided_slice %188 {offsets = [0, 2], sizes = [8, 14], strides = [1, 1]} : vector<8x16xf32> to vector<8x14xf32>
    %192 = tpu.concatenate %189, %190, %191 in 0 : vector<8x14xf32>, vector<8x14xf32>, vector<8x14xf32> -> vector<24x14xf32>
    %cst_93 = arith.constant dense<0.000000e+00> : vector<8x14xf32>
    %193 = tpu.matmul %5, %192, %cst_93 {dimension_numbers = #tpu.dot_dimension_numbers<[1], [0], [0], [1], [0, 0, 1, 1], [], []>} : vector<8x24xf32>, vector<24x14xf32>, vector<8x14xf32> -> vector<8x14xf32>
    %194 = vector.broadcast %6 : vector<8x1xf32> to vector<8x14xf32>
    %195 = arith.addf %193, %194 : vector<8x14xf32>
    %cst_94 = arith.constant dense<0.000000e+00> : vector<8x7xf32>
    %196 = tpu.matmul %195, %53, %cst_94 {dimension_numbers = #tpu.dot_dimension_numbers<[1], [0], [0], [1], [0, 0, 1, 1], [], []>} : vector<8x14xf32>, vector<14x7xf32>, vector<8x7xf32> -> vector<8x7xf32>
    %cst_95 = arith.constant dense<0.000000e+00> : vector<8x7xf32>
    %197 = tpu.matmul %195, %61, %cst_95 {dimension_numbers = #tpu.dot_dimension_numbers<[1], [0], [0], [1], [0, 0, 1, 1], [], []>} : vector<8x14xf32>, vector<14x7xf32>, vector<8x7xf32> -> vector<8x7xf32>
    %198 = arith.maximumf %196, %197 : vector<8x7xf32>
    %199 = vector.extract_strided_slice %166 {offsets = [0, 0], sizes = [8, 31], strides = [1, 1]} : vector<8x46xf32> to vector<8x31xf32>
    %200 = vector.extract_strided_slice %166 {offsets = [0, 1], sizes = [8, 31], strides = [1, 1]} : vector<8x46xf32> to vector<8x31xf32>
    %201 = vector.extract_strided_slice %166 {offsets = [0, 2], sizes = [8, 31], strides = [1, 1]} : vector<8x46xf32> to vector<8x31xf32>
    %202 = vector.extract_strided_slice %166 {offsets = [0, 3], sizes = [8, 31], strides = [1, 1]} : vector<8x46xf32> to vector<8x31xf32>
    %203 = vector.extract_strided_slice %166 {offsets = [0, 4], sizes = [8, 31], strides = [1, 1]} : vector<8x46xf32> to vector<8x31xf32>
    %204 = vector.extract_strided_slice %166 {offsets = [0, 5], sizes = [8, 31], strides = [1, 1]} : vector<8x46xf32> to vector<8x31xf32>
    %205 = vector.extract_strided_slice %166 {offsets = [0, 6], sizes = [8, 31], strides = [1, 1]} : vector<8x46xf32> to vector<8x31xf32>
    %206 = vector.extract_strided_slice %166 {offsets = [0, 7], sizes = [8, 31], strides = [1, 1]} : vector<8x46xf32> to vector<8x31xf32>
    %207 = vector.extract_strided_slice %166 {offsets = [0, 8], sizes = [8, 31], strides = [1, 1]} : vector<8x46xf32> to vector<8x31xf32>
    %208 = vector.extract_strided_slice %166 {offsets = [0, 9], sizes = [8, 31], strides = [1, 1]} : vector<8x46xf32> to vector<8x31xf32>
    %209 = vector.extract_strided_slice %166 {offsets = [0, 10], sizes = [8, 31], strides = [1, 1]} : vector<8x46xf32> to vector<8x31xf32>
    %210 = vector.extract_strided_slice %166 {offsets = [0, 11], sizes = [8, 31], strides = [1, 1]} : vector<8x46xf32> to vector<8x31xf32>
    %211 = vector.extract_strided_slice %166 {offsets = [0, 12], sizes = [8, 31], strides = [1, 1]} : vector<8x46xf32> to vector<8x31xf32>
    %212 = vector.extract_strided_slice %166 {offsets = [0, 13], sizes = [8, 31], strides = [1, 1]} : vector<8x46xf32> to vector<8x31xf32>
    %213 = vector.extract_strided_slice %166 {offsets = [0, 14], sizes = [8, 31], strides = [1, 1]} : vector<8x46xf32> to vector<8x31xf32>
    %214 = vector.extract_strided_slice %166 {offsets = [0, 15], sizes = [8, 31], strides = [1, 1]} : vector<8x46xf32> to vector<8x31xf32>
    %215 = tpu.concatenate %199, %200, %201, %202, %203, %204, %205, %206, %207, %208, %209, %210, %211, %212, %213, %214 in 0 : vector<8x31xf32>, vector<8x31xf32>, vector<8x31xf32>, vector<8x31xf32>, vector<8x31xf32>, vector<8x31xf32>, vector<8x31xf32>, vector<8x31xf32>, vector<8x31xf32>, vector<8x31xf32>, vector<8x31xf32>, vector<8x31xf32>, vector<8x31xf32>, vector<8x31xf32>, vector<8x31xf32>, vector<8x31xf32> -> vector<128x31xf32>
    %cst_96 = arith.constant dense<0.000000e+00> : vector<8x31xf32>
    %216 = tpu.matmul %7, %215, %cst_96 {dimension_numbers = #tpu.dot_dimension_numbers<[1], [0], [0], [1], [0, 0, 1, 1], [], []>} : vector<8x128xf32>, vector<128x31xf32>, vector<8x31xf32> -> vector<8x31xf32>
    %217 = vector.broadcast %8 : vector<8x1xf32> to vector<8x31xf32>
    %218 = arith.addf %216, %217 : vector<8x31xf32>
    %cst_97 = arith.constant dense<0.000000e+00> : vector<8x15xf32>
    %219 = tpu.matmul %218, %69, %cst_97 {dimension_numbers = #tpu.dot_dimension_numbers<[1], [0], [0], [1], [0, 0, 1, 1], [], []>} : vector<8x31xf32>, vector<31x15xf32>, vector<8x15xf32> -> vector<8x15xf32>
    %cst_98 = arith.constant dense<0.000000e+00> : vector<8x15xf32>
    %220 = tpu.matmul %218, %77, %cst_98 {dimension_numbers = #tpu.dot_dimension_numbers<[1], [0], [0], [1], [0, 0, 1, 1], [], []>} : vector<8x31xf32>, vector<31x15xf32>, vector<8x15xf32> -> vector<8x15xf32>
    %221 = arith.maximumf %219, %220 : vector<8x15xf32>
    %cst_99 = arith.constant dense<0.000000e+00> : vector<8x2xf32>
    %222 = tpu.matmul %187, %9, %cst_99 {dimension_numbers = #tpu.dot_dimension_numbers<[1], [0], [0], [1], [0, 0, 1, 1], [], []>} : vector<8x14xf32>, vector<14x2xf32>, vector<8x2xf32> -> vector<8x2xf32>
    %cst_100 = arith.constant dense<0.000000e+00> : vector<8x2xf32>
    %223 = tpu.matmul %198, %10, %cst_100 {dimension_numbers = #tpu.dot_dimension_numbers<[1], [0], [0], [1], [0, 0, 1, 1], [], []>} : vector<8x7xf32>, vector<7x2xf32>, vector<8x2xf32> -> vector<8x2xf32>
    %224 = arith.addf %222, %223 : vector<8x2xf32>
    %cst_101 = arith.constant dense<0.000000e+00> : vector<8x2xf32>
    %225 = tpu.matmul %221, %11, %cst_101 {dimension_numbers = #tpu.dot_dimension_numbers<[1], [0], [0], [1], [0, 0, 1, 1], [], []>} : vector<8x15xf32>, vector<15x2xf32>, vector<8x2xf32> -> vector<8x2xf32>
    %226 = arith.addf %224, %225 : vector<8x2xf32>
    %227 = vector.broadcast %12 : vector<1x2xf32> to vector<8x2xf32>
    %228 = arith.addf %226, %227 : vector<8x2xf32>
    %cst_102 = arith.constant 0.000000e+00 : f32
    %229 = vector.broadcast %cst_102 : f32 to vector<8x2xf32>
    %230 = arith.maximumf %228, %229 : vector<8x2xf32>
    %cst_103 = arith.constant dense<0.000000e+00> : vector<16x2xf32>
    %231 = tpu.matmul %95, %230, %cst_103 {dimension_numbers = #tpu.dot_dimension_numbers<[1], [0], [0], [1], [0, 0, 1, 1], [], []>} : vector<16x8xf32>, vector<8x2xf32>, vector<16x2xf32> -> vector<16x2xf32>
    %232 = arith.addf %164, %231 : vector<16x2xf32>
    %cst_104 = arith.constant dense<0.000000e+00> : vector<16x128xf32>
    %233 = tpu.matmul %232, %13, %cst_104 {dimension_numbers = #tpu.dot_dimension_numbers<[1], [0], [0], [1], [0, 0, 1, 1], [], []>} : vector<16x2xf32>, vector<2x128xf32>, vector<16x128xf32> -> vector<16x128xf32>
    %234 = vector.broadcast %15 : vector<1x128xf32> to vector<16x128xf32>
    %235 = arith.addf %233, %234 : vector<16x128xf32>
    %236 = vector.extract_strided_slice %235 {offsets = [0, 0], sizes = [2, 128], strides = [1, 1]} : vector<16x128xf32> to vector<2x128xf32>
    %237 = vector.extract_strided_slice %235 {offsets = [2, 0], sizes = [2, 128], strides = [1, 1]} : vector<16x128xf32> to vector<2x128xf32>
    %238 = vector.extract_strided_slice %235 {offsets = [4, 0], sizes = [2, 128], strides = [1, 1]} : vector<16x128xf32> to vector<2x128xf32>
    %239 = vector.extract_strided_slice %235 {offsets = [6, 0], sizes = [2, 128], strides = [1, 1]} : vector<16x128xf32> to vector<2x128xf32>
    %240 = vector.extract_strided_slice %235 {offsets = [8, 0], sizes = [2, 128], strides = [1, 1]} : vector<16x128xf32> to vector<2x128xf32>
    %241 = vector.extract_strided_slice %235 {offsets = [10, 0], sizes = [2, 128], strides = [1, 1]} : vector<16x128xf32> to vector<2x128xf32>
    %242 = vector.extract_strided_slice %235 {offsets = [12, 0], sizes = [2, 128], strides = [1, 1]} : vector<16x128xf32> to vector<2x128xf32>
    %243 = vector.extract_strided_slice %235 {offsets = [14, 0], sizes = [2, 128], strides = [1, 1]} : vector<16x128xf32> to vector<2x128xf32>
    %cst_105 = arith.constant 0.000000e+00 : f32
    %244 = vector.broadcast %cst_105 : f32 to vector<2x32xf32>
    %cst_106 = arith.constant 0.000000e+00 : f32
    %245 = vector.broadcast %cst_106 : f32 to vector<2x32xf32>
    %cst_107 = arith.constant dense<0.000000e+00> : vector<2x128xf32>
    %246 = tpu.matmul %244, %14, %cst_107 {dimension_numbers = #tpu.dot_dimension_numbers<[1], [0], [0], [1], [0, 0, 1, 1], [], []>} : vector<2x32xf32>, vector<32x128xf32>, vector<2x128xf32> -> vector<2x128xf32>
    %247 = arith.addf %236, %246 : vector<2x128xf32>
    %248 = arith.negf %247 : vector<2x128xf32>
    %249 = math.exp %248 : vector<2x128xf32>
    %cst_108 = arith.constant 1.000000e+00 : f32
    %250 = vector.broadcast %cst_108 : f32 to vector<2x128xf32>
    %251 = arith.addf %250, %249 : vector<2x128xf32>
    %252 = arith.divf %250, %251 : vector<2x128xf32>
    %253 = math.tanh %247 : vector<2x128xf32>
    %254 = vector.extract_strided_slice %252 {offsets = [0, 0], sizes = [2, 32], strides = [1, 1]} : vector<2x128xf32> to vector<2x32xf32>
    %255 = vector.extract_strided_slice %252 {offsets = [0, 32], sizes = [2, 32], strides = [1, 1]} : vector<2x128xf32> to vector<2x32xf32>
    %256 = vector.extract_strided_slice %253 {offsets = [0, 64], sizes = [2, 32], strides = [1, 1]} : vector<2x128xf32> to vector<2x32xf32>
    %257 = vector.extract_strided_slice %252 {offsets = [0, 96], sizes = [2, 32], strides = [1, 1]} : vector<2x128xf32> to vector<2x32xf32>
    %258 = arith.mulf %255, %245 : vector<2x32xf32>
    %259 = arith.mulf %254, %256 : vector<2x32xf32>
    %260 = arith.addf %258, %259 : vector<2x32xf32>
    %261 = math.tanh %260 : vector<2x32xf32>
    %262 = arith.mulf %257, %261 : vector<2x32xf32>
    %cst_109 = arith.constant dense<0.000000e+00> : vector<2x128xf32>
    %263 = tpu.matmul %262, %16, %cst_109 {dimension_numbers = #tpu.dot_dimension_numbers<[1], [0], [0], [1], [0, 0, 1, 1], [], []>} : vector<2x32xf32>, vector<32x128xf32>, vector<2x128xf32> -> vector<2x128xf32>
    %264 = vector.broadcast %18 : vector<1x128xf32> to vector<2x128xf32>
    %265 = arith.addf %263, %264 : vector<2x128xf32>
    %cst_110 = arith.constant dense<0.000000e+00> : vector<2x128xf32>
    %266 = tpu.matmul %262, %14, %cst_110 {dimension_numbers = #tpu.dot_dimension_numbers<[1], [0], [0], [1], [0, 0, 1, 1], [], []>} : vector<2x32xf32>, vector<32x128xf32>, vector<2x128xf32> -> vector<2x128xf32>
    %267 = arith.addf %237, %266 : vector<2x128xf32>
    %268 = arith.negf %267 : vector<2x128xf32>
    %269 = math.exp %268 : vector<2x128xf32>
    %cst_111 = arith.constant 1.000000e+00 : f32
    %270 = vector.broadcast %cst_111 : f32 to vector<2x128xf32>
    %271 = arith.addf %270, %269 : vector<2x128xf32>
    %272 = arith.divf %270, %271 : vector<2x128xf32>
    %273 = math.tanh %267 : vector<2x128xf32>
    %274 = vector.extract_strided_slice %272 {offsets = [0, 0], sizes = [2, 32], strides = [1, 1]} : vector<2x128xf32> to vector<2x32xf32>
    %275 = vector.extract_strided_slice %272 {offsets = [0, 32], sizes = [2, 32], strides = [1, 1]} : vector<2x128xf32> to vector<2x32xf32>
    %276 = vector.extract_strided_slice %273 {offsets = [0, 64], sizes = [2, 32], strides = [1, 1]} : vector<2x128xf32> to vector<2x32xf32>
    %277 = vector.extract_strided_slice %272 {offsets = [0, 96], sizes = [2, 32], strides = [1, 1]} : vector<2x128xf32> to vector<2x32xf32>
    %278 = arith.mulf %275, %260 : vector<2x32xf32>
    %279 = arith.mulf %274, %276 : vector<2x32xf32>
    %280 = arith.addf %278, %279 : vector<2x32xf32>
    %281 = math.tanh %280 : vector<2x32xf32>
    %282 = arith.mulf %277, %281 : vector<2x32xf32>
    %cst_112 = arith.constant dense<0.000000e+00> : vector<2x128xf32>
    %283 = tpu.matmul %282, %16, %cst_112 {dimension_numbers = #tpu.dot_dimension_numbers<[1], [0], [0], [1], [0, 0, 1, 1], [], []>} : vector<2x32xf32>, vector<32x128xf32>, vector<2x128xf32> -> vector<2x128xf32>
    %284 = vector.broadcast %18 : vector<1x128xf32> to vector<2x128xf32>
    %285 = arith.addf %283, %284 : vector<2x128xf32>
    %cst_113 = arith.constant dense<0.000000e+00> : vector<2x128xf32>
    %286 = tpu.matmul %282, %14, %cst_113 {dimension_numbers = #tpu.dot_dimension_numbers<[1], [0], [0], [1], [0, 0, 1, 1], [], []>} : vector<2x32xf32>, vector<32x128xf32>, vector<2x128xf32> -> vector<2x128xf32>
    %287 = arith.addf %238, %286 : vector<2x128xf32>
    %288 = arith.negf %287 : vector<2x128xf32>
    %289 = math.exp %288 : vector<2x128xf32>
    %cst_114 = arith.constant 1.000000e+00 : f32
    %290 = vector.broadcast %cst_114 : f32 to vector<2x128xf32>
    %291 = arith.addf %290, %289 : vector<2x128xf32>
    %292 = arith.divf %290, %291 : vector<2x128xf32>
    %293 = math.tanh %287 : vector<2x128xf32>
    %294 = vector.extract_strided_slice %292 {offsets = [0, 0], sizes = [2, 32], strides = [1, 1]} : vector<2x128xf32> to vector<2x32xf32>
    %295 = vector.extract_strided_slice %292 {offsets = [0, 32], sizes = [2, 32], strides = [1, 1]} : vector<2x128xf32> to vector<2x32xf32>
    %296 = vector.extract_strided_slice %293 {offsets = [0, 64], sizes = [2, 32], strides = [1, 1]} : vector<2x128xf32> to vector<2x32xf32>
    %297 = vector.extract_strided_slice %292 {offsets = [0, 96], sizes = [2, 32], strides = [1, 1]} : vector<2x128xf32> to vector<2x32xf32>
    %298 = arith.mulf %295, %280 : vector<2x32xf32>
    %299 = arith.mulf %294, %296 : vector<2x32xf32>
    %300 = arith.addf %298, %299 : vector<2x32xf32>
    %301 = math.tanh %300 : vector<2x32xf32>
    %302 = arith.mulf %297, %301 : vector<2x32xf32>
    %cst_115 = arith.constant dense<0.000000e+00> : vector<2x128xf32>
    %303 = tpu.matmul %302, %16, %cst_115 {dimension_numbers = #tpu.dot_dimension_numbers<[1], [0], [0], [1], [0, 0, 1, 1], [], []>} : vector<2x32xf32>, vector<32x128xf32>, vector<2x128xf32> -> vector<2x128xf32>
    %304 = vector.broadcast %18 : vector<1x128xf32> to vector<2x128xf32>
    %305 = arith.addf %303, %304 : vector<2x128xf32>
    %cst_116 = arith.constant dense<0.000000e+00> : vector<2x128xf32>
    %306 = tpu.matmul %302, %14, %cst_116 {dimension_numbers = #tpu.dot_dimension_numbers<[1], [0], [0], [1], [0, 0, 1, 1], [], []>} : vector<2x32xf32>, vector<32x128xf32>, vector<2x128xf32> -> vector<2x128xf32>
    %307 = arith.addf %239, %306 : vector<2x128xf32>
    %308 = arith.negf %307 : vector<2x128xf32>
    %309 = math.exp %308 : vector<2x128xf32>
    %cst_117 = arith.constant 1.000000e+00 : f32
    %310 = vector.broadcast %cst_117 : f32 to vector<2x128xf32>
    %311 = arith.addf %310, %309 : vector<2x128xf32>
    %312 = arith.divf %310, %311 : vector<2x128xf32>
    %313 = math.tanh %307 : vector<2x128xf32>
    %314 = vector.extract_strided_slice %312 {offsets = [0, 0], sizes = [2, 32], strides = [1, 1]} : vector<2x128xf32> to vector<2x32xf32>
    %315 = vector.extract_strided_slice %312 {offsets = [0, 32], sizes = [2, 32], strides = [1, 1]} : vector<2x128xf32> to vector<2x32xf32>
    %316 = vector.extract_strided_slice %313 {offsets = [0, 64], sizes = [2, 32], strides = [1, 1]} : vector<2x128xf32> to vector<2x32xf32>
    %317 = vector.extract_strided_slice %312 {offsets = [0, 96], sizes = [2, 32], strides = [1, 1]} : vector<2x128xf32> to vector<2x32xf32>
    %318 = arith.mulf %315, %300 : vector<2x32xf32>
    %319 = arith.mulf %314, %316 : vector<2x32xf32>
    %320 = arith.addf %318, %319 : vector<2x32xf32>
    %321 = math.tanh %320 : vector<2x32xf32>
    %322 = arith.mulf %317, %321 : vector<2x32xf32>
    %cst_118 = arith.constant dense<0.000000e+00> : vector<2x128xf32>
    %323 = tpu.matmul %322, %16, %cst_118 {dimension_numbers = #tpu.dot_dimension_numbers<[1], [0], [0], [1], [0, 0, 1, 1], [], []>} : vector<2x32xf32>, vector<32x128xf32>, vector<2x128xf32> -> vector<2x128xf32>
    %324 = vector.broadcast %18 : vector<1x128xf32> to vector<2x128xf32>
    %325 = arith.addf %323, %324 : vector<2x128xf32>
    %cst_119 = arith.constant dense<0.000000e+00> : vector<2x128xf32>
    %326 = tpu.matmul %322, %14, %cst_119 {dimension_numbers = #tpu.dot_dimension_numbers<[1], [0], [0], [1], [0, 0, 1, 1], [], []>} : vector<2x32xf32>, vector<32x128xf32>, vector<2x128xf32> -> vector<2x128xf32>
    %327 = arith.addf %240, %326 : vector<2x128xf32>
    %328 = arith.negf %327 : vector<2x128xf32>
    %329 = math.exp %328 : vector<2x128xf32>
    %cst_120 = arith.constant 1.000000e+00 : f32
    %330 = vector.broadcast %cst_120 : f32 to vector<2x128xf32>
    %331 = arith.addf %330, %329 : vector<2x128xf32>
    %332 = arith.divf %330, %331 : vector<2x128xf32>
    %333 = math.tanh %327 : vector<2x128xf32>
    %334 = vector.extract_strided_slice %332 {offsets = [0, 0], sizes = [2, 32], strides = [1, 1]} : vector<2x128xf32> to vector<2x32xf32>
    %335 = vector.extract_strided_slice %332 {offsets = [0, 32], sizes = [2, 32], strides = [1, 1]} : vector<2x128xf32> to vector<2x32xf32>
    %336 = vector.extract_strided_slice %333 {offsets = [0, 64], sizes = [2, 32], strides = [1, 1]} : vector<2x128xf32> to vector<2x32xf32>
    %337 = vector.extract_strided_slice %332 {offsets = [0, 96], sizes = [2, 32], strides = [1, 1]} : vector<2x128xf32> to vector<2x32xf32>
    %338 = arith.mulf %335, %320 : vector<2x32xf32>
    %339 = arith.mulf %334, %336 : vector<2x32xf32>
    %340 = arith.addf %338, %339 : vector<2x32xf32>
    %341 = math.tanh %340 : vector<2x32xf32>
    %342 = arith.mulf %337, %341 : vector<2x32xf32>
    %cst_121 = arith.constant dense<0.000000e+00> : vector<2x128xf32>
    %343 = tpu.matmul %342, %16, %cst_121 {dimension_numbers = #tpu.dot_dimension_numbers<[1], [0], [0], [1], [0, 0, 1, 1], [], []>} : vector<2x32xf32>, vector<32x128xf32>, vector<2x128xf32> -> vector<2x128xf32>
    %344 = vector.broadcast %18 : vector<1x128xf32> to vector<2x128xf32>
    %345 = arith.addf %343, %344 : vector<2x128xf32>
    %cst_122 = arith.constant dense<0.000000e+00> : vector<2x128xf32>
    %346 = tpu.matmul %342, %14, %cst_122 {dimension_numbers = #tpu.dot_dimension_numbers<[1], [0], [0], [1], [0, 0, 1, 1], [], []>} : vector<2x32xf32>, vector<32x128xf32>, vector<2x128xf32> -> vector<2x128xf32>
    %347 = arith.addf %241, %346 : vector<2x128xf32>
    %348 = arith.negf %347 : vector<2x128xf32>
    %349 = math.exp %348 : vector<2x128xf32>
    %cst_123 = arith.constant 1.000000e+00 : f32
    %350 = vector.broadcast %cst_123 : f32 to vector<2x128xf32>
    %351 = arith.addf %350, %349 : vector<2x128xf32>
    %352 = arith.divf %350, %351 : vector<2x128xf32>
    %353 = math.tanh %347 : vector<2x128xf32>
    %354 = vector.extract_strided_slice %352 {offsets = [0, 0], sizes = [2, 32], strides = [1, 1]} : vector<2x128xf32> to vector<2x32xf32>
    %355 = vector.extract_strided_slice %352 {offsets = [0, 32], sizes = [2, 32], strides = [1, 1]} : vector<2x128xf32> to vector<2x32xf32>
    %356 = vector.extract_strided_slice %353 {offsets = [0, 64], sizes = [2, 32], strides = [1, 1]} : vector<2x128xf32> to vector<2x32xf32>
    %357 = vector.extract_strided_slice %352 {offsets = [0, 96], sizes = [2, 32], strides = [1, 1]} : vector<2x128xf32> to vector<2x32xf32>
    %358 = arith.mulf %355, %340 : vector<2x32xf32>
    %359 = arith.mulf %354, %356 : vector<2x32xf32>
    %360 = arith.addf %358, %359 : vector<2x32xf32>
    %361 = math.tanh %360 : vector<2x32xf32>
    %362 = arith.mulf %357, %361 : vector<2x32xf32>
    %cst_124 = arith.constant dense<0.000000e+00> : vector<2x128xf32>
    %363 = tpu.matmul %362, %16, %cst_124 {dimension_numbers = #tpu.dot_dimension_numbers<[1], [0], [0], [1], [0, 0, 1, 1], [], []>} : vector<2x32xf32>, vector<32x128xf32>, vector<2x128xf32> -> vector<2x128xf32>
    %364 = vector.broadcast %18 : vector<1x128xf32> to vector<2x128xf32>
    %365 = arith.addf %363, %364 : vector<2x128xf32>
    %cst_125 = arith.constant dense<0.000000e+00> : vector<2x128xf32>
    %366 = tpu.matmul %362, %14, %cst_125 {dimension_numbers = #tpu.dot_dimension_numbers<[1], [0], [0], [1], [0, 0, 1, 1], [], []>} : vector<2x32xf32>, vector<32x128xf32>, vector<2x128xf32> -> vector<2x128xf32>
    %367 = arith.addf %242, %366 : vector<2x128xf32>
    %368 = arith.negf %367 : vector<2x128xf32>
    %369 = math.exp %368 : vector<2x128xf32>
    %cst_126 = arith.constant 1.000000e+00 : f32
    %370 = vector.broadcast %cst_126 : f32 to vector<2x128xf32>
    %371 = arith.addf %370, %369 : vector<2x128xf32>
    %372 = arith.divf %370, %371 : vector<2x128xf32>
    %373 = math.tanh %367 : vector<2x128xf32>
    %374 = vector.extract_strided_slice %372 {offsets = [0, 0], sizes = [2, 32], strides = [1, 1]} : vector<2x128xf32> to vector<2x32xf32>
    %375 = vector.extract_strided_slice %372 {offsets = [0, 32], sizes = [2, 32], strides = [1, 1]} : vector<2x128xf32> to vector<2x32xf32>
    %376 = vector.extract_strided_slice %373 {offsets = [0, 64], sizes = [2, 32], strides = [1, 1]} : vector<2x128xf32> to vector<2x32xf32>
    %377 = vector.extract_strided_slice %372 {offsets = [0, 96], sizes = [2, 32], strides = [1, 1]} : vector<2x128xf32> to vector<2x32xf32>
    %378 = arith.mulf %375, %360 : vector<2x32xf32>
    %379 = arith.mulf %374, %376 : vector<2x32xf32>
    %380 = arith.addf %378, %379 : vector<2x32xf32>
    %381 = math.tanh %380 : vector<2x32xf32>
    %382 = arith.mulf %377, %381 : vector<2x32xf32>
    %cst_127 = arith.constant dense<0.000000e+00> : vector<2x128xf32>
    %383 = tpu.matmul %382, %16, %cst_127 {dimension_numbers = #tpu.dot_dimension_numbers<[1], [0], [0], [1], [0, 0, 1, 1], [], []>} : vector<2x32xf32>, vector<32x128xf32>, vector<2x128xf32> -> vector<2x128xf32>
    %384 = vector.broadcast %18 : vector<1x128xf32> to vector<2x128xf32>
    %385 = arith.addf %383, %384 : vector<2x128xf32>
    %cst_128 = arith.constant dense<0.000000e+00> : vector<2x128xf32>
    %386 = tpu.matmul %382, %14, %cst_128 {dimension_numbers = #tpu.dot_dimension_numbers<[1], [0], [0], [1], [0, 0, 1, 1], [], []>} : vector<2x32xf32>, vector<32x128xf32>, vector<2x128xf32> -> vector<2x128xf32>
    %387 = arith.addf %243, %386 : vector<2x128xf32>
    %388 = arith.negf %387 : vector<2x128xf32>
    %389 = math.exp %388 : vector<2x128xf32>
    %cst_129 = arith.constant 1.000000e+00 : f32
    %390 = vector.broadcast %cst_129 : f32 to vector<2x128xf32>
    %391 = arith.addf %390, %389 : vector<2x128xf32>
    %392 = arith.divf %390, %391 : vector<2x128xf32>
    %393 = math.tanh %387 : vector<2x128xf32>
    %394 = vector.extract_strided_slice %392 {offsets = [0, 0], sizes = [2, 32], strides = [1, 1]} : vector<2x128xf32> to vector<2x32xf32>
    %395 = vector.extract_strided_slice %392 {offsets = [0, 32], sizes = [2, 32], strides = [1, 1]} : vector<2x128xf32> to vector<2x32xf32>
    %396 = vector.extract_strided_slice %393 {offsets = [0, 64], sizes = [2, 32], strides = [1, 1]} : vector<2x128xf32> to vector<2x32xf32>
    %397 = vector.extract_strided_slice %392 {offsets = [0, 96], sizes = [2, 32], strides = [1, 1]} : vector<2x128xf32> to vector<2x32xf32>
    %398 = arith.mulf %395, %380 : vector<2x32xf32>
    %399 = arith.mulf %394, %396 : vector<2x32xf32>
    %400 = arith.addf %398, %399 : vector<2x32xf32>
    %401 = math.tanh %400 : vector<2x32xf32>
    %402 = arith.mulf %397, %401 : vector<2x32xf32>
    %cst_130 = arith.constant dense<0.000000e+00> : vector<2x128xf32>
    %403 = tpu.matmul %402, %16, %cst_130 {dimension_numbers = #tpu.dot_dimension_numbers<[1], [0], [0], [1], [0, 0, 1, 1], [], []>} : vector<2x32xf32>, vector<32x128xf32>, vector<2x128xf32> -> vector<2x128xf32>
    %404 = vector.broadcast %18 : vector<1x128xf32> to vector<2x128xf32>
    %405 = arith.addf %403, %404 : vector<2x128xf32>
    %cst_131 = arith.constant 0.000000e+00 : f32
    %406 = vector.broadcast %cst_131 : f32 to vector<2x32xf32>
    %cst_132 = arith.constant 0.000000e+00 : f32
    %407 = vector.broadcast %cst_132 : f32 to vector<2x32xf32>
    %cst_133 = arith.constant dense<0.000000e+00> : vector<2x128xf32>
    %408 = tpu.matmul %406, %17, %cst_133 {dimension_numbers = #tpu.dot_dimension_numbers<[1], [0], [0], [1], [0, 0, 1, 1], [], []>} : vector<2x32xf32>, vector<32x128xf32>, vector<2x128xf32> -> vector<2x128xf32>
    %409 = arith.addf %265, %408 : vector<2x128xf32>
    %410 = arith.negf %409 : vector<2x128xf32>
    %411 = math.exp %410 : vector<2x128xf32>
    %cst_134 = arith.constant 1.000000e+00 : f32
    %412 = vector.broadcast %cst_134 : f32 to vector<2x128xf32>
    %413 = arith.addf %412, %411 : vector<2x128xf32>
    %414 = arith.divf %412, %413 : vector<2x128xf32>
    %415 = math.tanh %409 : vector<2x128xf32>
    %416 = vector.extract_strided_slice %414 {offsets = [0, 0], sizes = [2, 32], strides = [1, 1]} : vector<2x128xf32> to vector<2x32xf32>
    %417 = vector.extract_strided_slice %414 {offsets = [0, 32], sizes = [2, 32], strides = [1, 1]} : vector<2x128xf32> to vector<2x32xf32>
    %418 = vector.extract_strided_slice %415 {offsets = [0, 64], sizes = [2, 32], strides = [1, 1]} : vector<2x128xf32> to vector<2x32xf32>
    %419 = vector.extract_strided_slice %414 {offsets = [0, 96], sizes = [2, 32], strides = [1, 1]} : vector<2x128xf32> to vector<2x32xf32>
    %420 = arith.mulf %417, %407 : vector<2x32xf32>
    %421 = arith.mulf %416, %418 : vector<2x32xf32>
    %422 = arith.addf %420, %421 : vector<2x32xf32>
    %423 = math.tanh %422 : vector<2x32xf32>
    %424 = arith.mulf %419, %423 : vector<2x32xf32>
    %cst_135 = arith.constant dense<0.000000e+00> : vector<2x128xf32>
    %425 = tpu.matmul %424, %17, %cst_135 {dimension_numbers = #tpu.dot_dimension_numbers<[1], [0], [0], [1], [0, 0, 1, 1], [], []>} : vector<2x32xf32>, vector<32x128xf32>, vector<2x128xf32> -> vector<2x128xf32>
    %426 = arith.addf %285, %425 : vector<2x128xf32>
    %427 = arith.negf %426 : vector<2x128xf32>
    %428 = math.exp %427 : vector<2x128xf32>
    %cst_136 = arith.constant 1.000000e+00 : f32
    %429 = vector.broadcast %cst_136 : f32 to vector<2x128xf32>
    %430 = arith.addf %429, %428 : vector<2x128xf32>
    %431 = arith.divf %429, %430 : vector<2x128xf32>
    %432 = math.tanh %426 : vector<2x128xf32>
    %433 = vector.extract_strided_slice %431 {offsets = [0, 0], sizes = [2, 32], strides = [1, 1]} : vector<2x128xf32> to vector<2x32xf32>
    %434 = vector.extract_strided_slice %431 {offsets = [0, 32], sizes = [2, 32], strides = [1, 1]} : vector<2x128xf32> to vector<2x32xf32>
    %435 = vector.extract_strided_slice %432 {offsets = [0, 64], sizes = [2, 32], strides = [1, 1]} : vector<2x128xf32> to vector<2x32xf32>
    %436 = vector.extract_strided_slice %431 {offsets = [0, 96], sizes = [2, 32], strides = [1, 1]} : vector<2x128xf32> to vector<2x32xf32>
    %437 = arith.mulf %434, %422 : vector<2x32xf32>
    %438 = arith.mulf %433, %435 : vector<2x32xf32>
    %439 = arith.addf %437, %438 : vector<2x32xf32>
    %440 = math.tanh %439 : vector<2x32xf32>
    %441 = arith.mulf %436, %440 : vector<2x32xf32>
    %cst_137 = arith.constant dense<0.000000e+00> : vector<2x128xf32>
    %442 = tpu.matmul %441, %17, %cst_137 {dimension_numbers = #tpu.dot_dimension_numbers<[1], [0], [0], [1], [0, 0, 1, 1], [], []>} : vector<2x32xf32>, vector<32x128xf32>, vector<2x128xf32> -> vector<2x128xf32>
    %443 = arith.addf %305, %442 : vector<2x128xf32>
    %444 = arith.negf %443 : vector<2x128xf32>
    %445 = math.exp %444 : vector<2x128xf32>
    %cst_138 = arith.constant 1.000000e+00 : f32
    %446 = vector.broadcast %cst_138 : f32 to vector<2x128xf32>
    %447 = arith.addf %446, %445 : vector<2x128xf32>
    %448 = arith.divf %446, %447 : vector<2x128xf32>
    %449 = math.tanh %443 : vector<2x128xf32>
    %450 = vector.extract_strided_slice %448 {offsets = [0, 0], sizes = [2, 32], strides = [1, 1]} : vector<2x128xf32> to vector<2x32xf32>
    %451 = vector.extract_strided_slice %448 {offsets = [0, 32], sizes = [2, 32], strides = [1, 1]} : vector<2x128xf32> to vector<2x32xf32>
    %452 = vector.extract_strided_slice %449 {offsets = [0, 64], sizes = [2, 32], strides = [1, 1]} : vector<2x128xf32> to vector<2x32xf32>
    %453 = vector.extract_strided_slice %448 {offsets = [0, 96], sizes = [2, 32], strides = [1, 1]} : vector<2x128xf32> to vector<2x32xf32>
    %454 = arith.mulf %451, %439 : vector<2x32xf32>
    %455 = arith.mulf %450, %452 : vector<2x32xf32>
    %456 = arith.addf %454, %455 : vector<2x32xf32>
    %457 = math.tanh %456 : vector<2x32xf32>
    %458 = arith.mulf %453, %457 : vector<2x32xf32>
    %cst_139 = arith.constant dense<0.000000e+00> : vector<2x128xf32>
    %459 = tpu.matmul %458, %17, %cst_139 {dimension_numbers = #tpu.dot_dimension_numbers<[1], [0], [0], [1], [0, 0, 1, 1], [], []>} : vector<2x32xf32>, vector<32x128xf32>, vector<2x128xf32> -> vector<2x128xf32>
    %460 = arith.addf %325, %459 : vector<2x128xf32>
    %461 = arith.negf %460 : vector<2x128xf32>
    %462 = math.exp %461 : vector<2x128xf32>
    %cst_140 = arith.constant 1.000000e+00 : f32
    %463 = vector.broadcast %cst_140 : f32 to vector<2x128xf32>
    %464 = arith.addf %463, %462 : vector<2x128xf32>
    %465 = arith.divf %463, %464 : vector<2x128xf32>
    %466 = math.tanh %460 : vector<2x128xf32>
    %467 = vector.extract_strided_slice %465 {offsets = [0, 0], sizes = [2, 32], strides = [1, 1]} : vector<2x128xf32> to vector<2x32xf32>
    %468 = vector.extract_strided_slice %465 {offsets = [0, 32], sizes = [2, 32], strides = [1, 1]} : vector<2x128xf32> to vector<2x32xf32>
    %469 = vector.extract_strided_slice %466 {offsets = [0, 64], sizes = [2, 32], strides = [1, 1]} : vector<2x128xf32> to vector<2x32xf32>
    %470 = vector.extract_strided_slice %465 {offsets = [0, 96], sizes = [2, 32], strides = [1, 1]} : vector<2x128xf32> to vector<2x32xf32>
    %471 = arith.mulf %468, %456 : vector<2x32xf32>
    %472 = arith.mulf %467, %469 : vector<2x32xf32>
    %473 = arith.addf %471, %472 : vector<2x32xf32>
    %474 = math.tanh %473 : vector<2x32xf32>
    %475 = arith.mulf %470, %474 : vector<2x32xf32>
    %cst_141 = arith.constant dense<0.000000e+00> : vector<2x128xf32>
    %476 = tpu.matmul %475, %17, %cst_141 {dimension_numbers = #tpu.dot_dimension_numbers<[1], [0], [0], [1], [0, 0, 1, 1], [], []>} : vector<2x32xf32>, vector<32x128xf32>, vector<2x128xf32> -> vector<2x128xf32>
    %477 = arith.addf %345, %476 : vector<2x128xf32>
    %478 = arith.negf %477 : vector<2x128xf32>
    %479 = math.exp %478 : vector<2x128xf32>
    %cst_142 = arith.constant 1.000000e+00 : f32
    %480 = vector.broadcast %cst_142 : f32 to vector<2x128xf32>
    %481 = arith.addf %480, %479 : vector<2x128xf32>
    %482 = arith.divf %480, %481 : vector<2x128xf32>
    %483 = math.tanh %477 : vector<2x128xf32>
    %484 = vector.extract_strided_slice %482 {offsets = [0, 0], sizes = [2, 32], strides = [1, 1]} : vector<2x128xf32> to vector<2x32xf32>
    %485 = vector.extract_strided_slice %482 {offsets = [0, 32], sizes = [2, 32], strides = [1, 1]} : vector<2x128xf32> to vector<2x32xf32>
    %486 = vector.extract_strided_slice %483 {offsets = [0, 64], sizes = [2, 32], strides = [1, 1]} : vector<2x128xf32> to vector<2x32xf32>
    %487 = vector.extract_strided_slice %482 {offsets = [0, 96], sizes = [2, 32], strides = [1, 1]} : vector<2x128xf32> to vector<2x32xf32>
    %488 = arith.mulf %485, %473 : vector<2x32xf32>
    %489 = arith.mulf %484, %486 : vector<2x32xf32>
    %490 = arith.addf %488, %489 : vector<2x32xf32>
    %491 = math.tanh %490 : vector<2x32xf32>
    %492 = arith.mulf %487, %491 : vector<2x32xf32>
    %cst_143 = arith.constant dense<0.000000e+00> : vector<2x128xf32>
    %493 = tpu.matmul %492, %17, %cst_143 {dimension_numbers = #tpu.dot_dimension_numbers<[1], [0], [0], [1], [0, 0, 1, 1], [], []>} : vector<2x32xf32>, vector<32x128xf32>, vector<2x128xf32> -> vector<2x128xf32>
    %494 = arith.addf %365, %493 : vector<2x128xf32>
    %495 = arith.negf %494 : vector<2x128xf32>
    %496 = math.exp %495 : vector<2x128xf32>
    %cst_144 = arith.constant 1.000000e+00 : f32
    %497 = vector.broadcast %cst_144 : f32 to vector<2x128xf32>
    %498 = arith.addf %497, %496 : vector<2x128xf32>
    %499 = arith.divf %497, %498 : vector<2x128xf32>
    %500 = math.tanh %494 : vector<2x128xf32>
    %501 = vector.extract_strided_slice %499 {offsets = [0, 0], sizes = [2, 32], strides = [1, 1]} : vector<2x128xf32> to vector<2x32xf32>
    %502 = vector.extract_strided_slice %499 {offsets = [0, 32], sizes = [2, 32], strides = [1, 1]} : vector<2x128xf32> to vector<2x32xf32>
    %503 = vector.extract_strided_slice %500 {offsets = [0, 64], sizes = [2, 32], strides = [1, 1]} : vector<2x128xf32> to vector<2x32xf32>
    %504 = vector.extract_strided_slice %499 {offsets = [0, 96], sizes = [2, 32], strides = [1, 1]} : vector<2x128xf32> to vector<2x32xf32>
    %505 = arith.mulf %502, %490 : vector<2x32xf32>
    %506 = arith.mulf %501, %503 : vector<2x32xf32>
    %507 = arith.addf %505, %506 : vector<2x32xf32>
    %508 = math.tanh %507 : vector<2x32xf32>
    %509 = arith.mulf %504, %508 : vector<2x32xf32>
    %cst_145 = arith.constant dense<0.000000e+00> : vector<2x128xf32>
    %510 = tpu.matmul %509, %17, %cst_145 {dimension_numbers = #tpu.dot_dimension_numbers<[1], [0], [0], [1], [0, 0, 1, 1], [], []>} : vector<2x32xf32>, vector<32x128xf32>, vector<2x128xf32> -> vector<2x128xf32>
    %511 = arith.addf %385, %510 : vector<2x128xf32>
    %512 = arith.negf %511 : vector<2x128xf32>
    %513 = math.exp %512 : vector<2x128xf32>
    %cst_146 = arith.constant 1.000000e+00 : f32
    %514 = vector.broadcast %cst_146 : f32 to vector<2x128xf32>
    %515 = arith.addf %514, %513 : vector<2x128xf32>
    %516 = arith.divf %514, %515 : vector<2x128xf32>
    %517 = math.tanh %511 : vector<2x128xf32>
    %518 = vector.extract_strided_slice %516 {offsets = [0, 0], sizes = [2, 32], strides = [1, 1]} : vector<2x128xf32> to vector<2x32xf32>
    %519 = vector.extract_strided_slice %516 {offsets = [0, 32], sizes = [2, 32], strides = [1, 1]} : vector<2x128xf32> to vector<2x32xf32>
    %520 = vector.extract_strided_slice %517 {offsets = [0, 64], sizes = [2, 32], strides = [1, 1]} : vector<2x128xf32> to vector<2x32xf32>
    %521 = vector.extract_strided_slice %516 {offsets = [0, 96], sizes = [2, 32], strides = [1, 1]} : vector<2x128xf32> to vector<2x32xf32>
    %522 = arith.mulf %519, %507 : vector<2x32xf32>
    %523 = arith.mulf %518, %520 : vector<2x32xf32>
    %524 = arith.addf %522, %523 : vector<2x32xf32>
    %525 = math.tanh %524 : vector<2x32xf32>
    %526 = arith.mulf %521, %525 : vector<2x32xf32>
    %cst_147 = arith.constant dense<0.000000e+00> : vector<2x128xf32>
    %527 = tpu.matmul %526, %17, %cst_147 {dimension_numbers = #tpu.dot_dimension_numbers<[1], [0], [0], [1], [0, 0, 1, 1], [], []>} : vector<2x32xf32>, vector<32x128xf32>, vector<2x128xf32> -> vector<2x128xf32>
    %528 = arith.addf %405, %527 : vector<2x128xf32>
    %529 = arith.negf %528 : vector<2x128xf32>
    %530 = math.exp %529 : vector<2x128xf32>
    %cst_148 = arith.constant 1.000000e+00 : f32
    %531 = vector.broadcast %cst_148 : f32 to vector<2x128xf32>
    %532 = arith.addf %531, %530 : vector<2x128xf32>
    %533 = arith.divf %531, %532 : vector<2x128xf32>
    %534 = math.tanh %528 : vector<2x128xf32>
    %535 = vector.extract_strided_slice %533 {offsets = [0, 0], sizes = [2, 32], strides = [1, 1]} : vector<2x128xf32> to vector<2x32xf32>
    %536 = vector.extract_strided_slice %533 {offsets = [0, 32], sizes = [2, 32], strides = [1, 1]} : vector<2x128xf32> to vector<2x32xf32>
    %537 = vector.extract_strided_slice %534 {offsets = [0, 64], sizes = [2, 32], strides = [1, 1]} : vector<2x128xf32> to vector<2x32xf32>
    %538 = vector.extract_strided_slice %533 {offsets = [0, 96], sizes = [2, 32], strides = [1, 1]} : vector<2x128xf32> to vector<2x32xf32>
    %539 = arith.mulf %536, %524 : vector<2x32xf32>
    %540 = arith.mulf %535, %537 : vector<2x32xf32>
    %541 = arith.addf %539, %540 : vector<2x32xf32>
    %542 = math.tanh %541 : vector<2x32xf32>
    %543 = arith.mulf %538, %542 : vector<2x32xf32>
    %cst_149 = arith.constant dense<0.000000e+00> : vector<2x3xf32>
    %544 = tpu.matmul %402, %19, %cst_149 {dimension_numbers = #tpu.dot_dimension_numbers<[1], [0], [0], [1], [0, 0, 1, 1], [], []>} : vector<2x32xf32>, vector<32x3xf32>, vector<2x3xf32> -> vector<2x3xf32>
    %545 = vector.broadcast %21 : vector<1x3xf32> to vector<2x3xf32>
    %546 = arith.addf %545, %544 : vector<2x3xf32>
    %cst_150 = arith.constant dense<0.000000e+00> : vector<2x3xf32>
    %547 = tpu.matmul %543, %20, %cst_150 {dimension_numbers = #tpu.dot_dimension_numbers<[1], [0], [0], [1], [0, 0, 1, 1], [], []>} : vector<2x32xf32>, vector<32x3xf32>, vector<2x3xf32> -> vector<2x3xf32>
    %548 = arith.addf %546, %547 : vector<2x3xf32>
    %549 = vector.extract_strided_slice %548 {offsets = [0, 2], sizes = [2, 1], strides = [1, 1]} : vector<2x3xf32> to vector<2x1xf32>
    %cst_151 = arith.constant 0.000000e+00 : f32
    %550 = vector.broadcast %cst_151 : f32 to vector<2x1xf32>
    %551 = arith.maximumf %549, %550 : vector<2x1xf32>
    %c0_152 = arith.constant 0 : index
    %c0_153 = arith.constant 0 : index
    %552 = vector.load %arg23[%c0_152, %c0_153] : memref<2x1xf32, #tpu.memory_space<vmem>>, vector<2x1xf32>
    tpu.vector_store %arg23[%c0_152, %c0_153], %551 {strides = array<i32>} : memref<2x1xf32, #tpu.memory_space<vmem>>, vector<2x1xf32>,
    return
  }
  func.func @transform_0(%arg0: i32) -> (i32, i32, i32) {
    %c0_i32 = arith.constant 0 : i32
    %c0_i32_0 = arith.constant 0 : i32
    %c0_i32_1 = arith.constant 0 : i32
    %c0_i32_2 = arith.constant 0 : i32
    return %c0_i32, %c0_i32_0, %c0_i32_1 : i32, i32, i32
  }
  func.func @transform_1(%arg0: i32) -> (i32, i32) {
    %c0_i32 = arith.constant 0 : i32
    %c0_i32_0 = arith.constant 0 : i32
    %c0_i32_1 = arith.constant 0 : i32
    return %c0_i32, %c0_i32_0 : i32, i32
  }
  func.func @transform_2(%arg0: i32) -> (i32, i32) {
    %c0_i32 = arith.constant 0 : i32
    %c0_i32_0 = arith.constant 0 : i32
    %c0_i32_1 = arith.constant 0 : i32
    return %c0_i32, %c0_i32_0 : i32, i32
  }
  func.func @transform_3(%arg0: i32) -> (i32, i32) {
    %c0_i32 = arith.constant 0 : i32
    %c0_i32_0 = arith.constant 0 : i32
    %c0_i32_1 = arith.constant 0 : i32
    return %c0_i32, %c0_i32_0 : i32, i32
  }
  func.func @transform_4(%arg0: i32) -> (i32, i32) {
    %c0_i32 = arith.constant 0 : i32
    %c0_i32_0 = arith.constant 0 : i32
    %c0_i32_1 = arith.constant 0 : i32
    return %c0_i32, %c0_i32_0 : i32, i32
  }
  func.func @transform_5(%arg0: i32) -> (i32, i32) {
    %c0_i32 = arith.constant 0 : i32
    %c0_i32_0 = arith.constant 0 : i32
    %c0_i32_1 = arith.constant 0 : i32
    return %c0_i32, %c0_i32_0 : i32, i32
  }
  func.func @transform_6(%arg0: i32) -> (i32, i32) {
    %c0_i32 = arith.constant 0 : i32
    %c0_i32_0 = arith.constant 0 : i32
    %c0_i32_1 = arith.constant 0 : i32
    return %c0_i32, %c0_i32_0 : i32, i32
  }
  func.func @transform_7(%arg0: i32) -> (i32, i32) {
    %c0_i32 = arith.constant 0 : i32
    %c0_i32_0 = arith.constant 0 : i32
    %c0_i32_1 = arith.constant 0 : i32
    return %c0_i32, %c0_i32_0 : i32, i32
  }
  func.func @transform_8(%arg0: i32) -> (i32, i32) {
    %c0_i32 = arith.constant 0 : i32
    %c0_i32_0 = arith.constant 0 : i32
    %c0_i32_1 = arith.constant 0 : i32
    return %c0_i32, %c0_i32_0 : i32, i32
  }
  func.func @transform_9(%arg0: i32) -> (i32, i32) {
    %c0_i32 = arith.constant 0 : i32
    %c0_i32_0 = arith.constant 0 : i32
    %c0_i32_1 = arith.constant 0 : i32
    return %c0_i32, %c0_i32_0 : i32, i32
  }
  func.func @transform_10(%arg0: i32) -> (i32, i32) {
    %c0_i32 = arith.constant 0 : i32
    %c0_i32_0 = arith.constant 0 : i32
    %c0_i32_1 = arith.constant 0 : i32
    return %c0_i32, %c0_i32_0 : i32, i32
  }
  func.func @transform_11(%arg0: i32) -> (i32, i32) {
    %c0_i32 = arith.constant 0 : i32
    %c0_i32_0 = arith.constant 0 : i32
    %c0_i32_1 = arith.constant 0 : i32
    return %c0_i32, %c0_i32_0 : i32, i32
  }
  func.func @transform_12(%arg0: i32) -> (i32, i32) {
    %c0_i32 = arith.constant 0 : i32
    %c0_i32_0 = arith.constant 0 : i32
    %c0_i32_1 = arith.constant 0 : i32
    return %c0_i32, %c0_i32_0 : i32, i32
  }
  func.func @transform_13(%arg0: i32) -> (i32, i32) {
    %c0_i32 = arith.constant 0 : i32
    %c0_i32_0 = arith.constant 0 : i32
    %c0_i32_1 = arith.constant 0 : i32
    return %c0_i32, %c0_i32_0 : i32, i32
  }
  func.func @transform_14(%arg0: i32) -> (i32, i32) {
    %c0_i32 = arith.constant 0 : i32
    %c0_i32_0 = arith.constant 0 : i32
    %c0_i32_1 = arith.constant 0 : i32
    return %c0_i32, %c0_i32_0 : i32, i32
  }
  func.func @transform_15(%arg0: i32) -> (i32, i32) {
    %c0_i32 = arith.constant 0 : i32
    %c0_i32_0 = arith.constant 0 : i32
    %c0_i32_1 = arith.constant 0 : i32
    return %c0_i32, %c0_i32_0 : i32, i32
  }
  func.func @transform_16(%arg0: i32) -> (i32, i32) {
    %c0_i32 = arith.constant 0 : i32
    %c0_i32_0 = arith.constant 0 : i32
    %c0_i32_1 = arith.constant 0 : i32
    return %c0_i32, %c0_i32_0 : i32, i32
  }
  func.func @transform_17(%arg0: i32) -> (i32, i32) {
    %c0_i32 = arith.constant 0 : i32
    %c0_i32_0 = arith.constant 0 : i32
    %c0_i32_1 = arith.constant 0 : i32
    return %c0_i32, %c0_i32_0 : i32, i32
  }
  func.func @transform_18(%arg0: i32) -> (i32, i32) {
    %c0_i32 = arith.constant 0 : i32
    %c0_i32_0 = arith.constant 0 : i32
    %c0_i32_1 = arith.constant 0 : i32
    return %c0_i32, %c0_i32_0 : i32, i32
  }
  func.func @transform_19(%arg0: i32) -> (i32, i32) {
    %c0_i32 = arith.constant 0 : i32
    %c0_i32_0 = arith.constant 0 : i32
    %c0_i32_1 = arith.constant 0 : i32
    return %c0_i32, %c0_i32_0 : i32, i32
  }
  func.func @transform_20(%arg0: i32) -> (i32, i32) {
    %c0_i32 = arith.constant 0 : i32
    %c0_i32_0 = arith.constant 0 : i32
    %c0_i32_1 = arith.constant 0 : i32
    return %c0_i32, %c0_i32_0 : i32, i32
  }
  func.func @transform_21(%arg0: i32) -> (i32, i32) {
    %c0_i32 = arith.constant 0 : i32
    %c0_i32_0 = arith.constant 0 : i32
    %c0_i32_1 = arith.constant 0 : i32
    return %c0_i32, %c0_i32_0 : i32, i32
  }
  func.func @transform_22(%arg0: i32) -> (i32, i32) {
    %c0_i32 = arith.constant 0 : i32
    %c0_i32_0 = arith.constant 0 : i32
    %c0_i32_1 = arith.constant 0 : i32
    return %c0_i32, %c0_i32_0 : i32, i32
  }
}

</mosaic_0001>

<bundles_post_ra>
// kernel: diff1_forward.1
= control target key start
LH: loop header
LB: loop body
LE: loop exit
PB: predicated region body
PF: predicated region fallthrough
CT: control target
= control target key end

     0   :  { %s6554_s30 = smov 127   ;;  %v6557_v1 = vmov 0.0|0.0   ;;  %vm6558_vm0 = vmmov 0   ;;  %v6559_v2 = vmov 0.0   ;;  %v111_v5 = vlaneseq  ;;  %s6561_s23 = smov 116   ;;  %s7678_s0 = inlined_call_operand.vmem [shape: f32[2,8,46], index: 0, kind: input, shape index: {}]   ;;  %s7679_s2 = inlined_call_operand.vmem [shape: f32[8,1], index: 2, kind: input, shape index: {}]   ;;  %s7680_s1 = inlined_call_operand.vmem [shape: f32[8,32], index: 1, kind: input, shape index: {}]   ;;  %s7681_s4 = inlined_call_operand.vmem [shape: f32[8,1], index: 4, kind: input, shape index: {}]   ;;  %s7682_s6 = inlined_call_operand.vmem [shape: f32[8,1], index: 6, kind: input, shape index: {}]   ;;  %s7683_s3 = inlined_call_operand.vmem [shape: f32[8,32], index: 3, kind: input, shape index: {}]   ;;  %s7684_s8 = inlined_call_operand.vmem [shape: f32[8,1], index: 8, kind: input, shape index: {}]   ;;  %s7685_s5 = inlined_call_operand.vmem [shape: f32[8,24], index: 5, kind: input, shape index: {}]   ;;  %s7686_s7 = inlined_call_operand.vmem [shape: f32[8,128], index: 7, kind: input, shape index: {}]   ;;  %s7687_s10 = inlined_call_operand.vmem [shape: f32[7,2], index: 10, kind: input, shape index: {}]   ;;  %s7688_s9 = inlined_call_operand.vmem [shape: f32[14,2], index: 9, kind: input, shape index: {}]   ;;  %s7689_s11 = inlined_call_operand.vmem [shape: f32[15,2], index: 11, kind: input, shape index: {}]   ;;  %s7690_s12 = inlined_call_operand.vmem [shape: f32[1,2], index: 12, kind: input, shape index: {}]   ;;  %s7691_s13 = inlined_call_operand.vmem [shape: f32[2,128], index: 13, kind: input, shape index: {}]   ;;  %s7692_s14 = inlined_call_operand.vmem [shape: f32[32,128], index: 14, kind: input, shape index: {}]   ;;  %s7693_s15 = inlined_call_operand.vmem [shape: f32[1,128], index: 15, kind: input, shape index: {}]   ;;  %s7694_s16 = inlined_call_operand.vmem [shape: f32[32,128], index: 16, kind: input, shape index: {}]   ;;  %s7695_s19 = inlined_call_operand.vmem [shape: f32[32,3], index: 19, kind: input, shape index: {}]   ;;  %s7696_s17 = inlined_call_operand.vmem [shape: f32[32,128], index: 17, kind: input, shape index: {}]   ;;  %s7697_s18 = inlined_call_operand.vmem [shape: f32[1,128], index: 18, kind: input, shape index: {}]   ;;  %s7698_s20 = inlined_call_operand.vmem [shape: f32[32,3], index: 20, kind: input, shape index: {}]   ;;  %s7699_s21 = inlined_call_operand.vmem [shape: f32[1,3], index: 21, kind: input, shape index: {}]   ;;  %s7700_s22 = inlined_call_operand.vmem [shape: f32[2,1], index: 22, kind: output, shape index: {}]  }
   0x1   :  { %7715 = sst [smem:[#allocation2_spill]] %s7678_s0  ;;  %s6556_s0 = smov 126   ;;  %6013 = vmatprep.subr.bf16.mxu0 %v6557_v1  ;;  %6019 = vmatprep.subr.bf16.mxu1 %v6557_v1  ;;  %v6560_v7 = vmov 0   ;;  %v6562_v17 = vmov 1.0|1.0   ;;  %vm7711_vm4 = vcmask 261120  }
   0x2   :  { %7716 = sst [smem:[#allocation3_spill]] %s7679_s2  ;;  %s7722_s29 = sld [smem:[#allocation2_spill]]  ;;  %5416 = vmatprep.mubr.msk.f32.mxu0 %vm6558_vm0, %v6559_v2  ;;  %5425 = vmatprep.mubr.msk.f32.mxu1 %vm6558_vm0, %v6559_v2  ;;  %v6720_v8 = vshrl.u32 %v111_v5, 7  ;;  %v6722_v9 = vand.u32 127, %v111_v5  ;;  %vm7713_vm6 = vcmask 1042432   ;;  %vm7706_vm7 = vcmask 154624  }
   0x3   :  { %7717 = sst [smem:[#allocation4_spill]] %s7680_s1  ;;  %6404 = vset.pattern.permute.xlu1 %v6560_v7  ;;  %6410 = vset.pattern.permute.xlu0 %v6560_v7  ;;  %s7723_s24 = sld [smem:[#allocation3_spill]]  ;;  %vm413_vm13 = vcmask 1043456   ;;  %v6574_v48 = vmov 1.0   ;;  %v6926_v5 = vld [vmem:[%s7685_s5] sm:$0xff] }
   0x4   :  { %7718 = sst [smem:[#allocation5_spill]] %s7681_s4  ;;  %v6732_v13 = vadd.s32 8, %v6720_v8  ;;  %v117_v14 = vadd.s32 9, %v6720_v8  ;;  %s7726_s26 = sld [smem:[#allocation4_spill]]  ;;  %v6765_v27 = vadd.s32 16, %v6720_v8  ;;  %v6815_v39 = vmul.u32 2, %v6722_v9 }
   0x5   :  { %7719 = sst [smem:[#allocation6_spill]] %s7682_s6  ;;  %s6555_s6 = smov 125   ;;  %v126_v41 = vadd.s32 24, %v6720_v8  ;;  %v5041_v16 = vld [vmem:[%s7690_s12] ss:$0 sm:$0xff] }
   0x6   :  { %7720 = sst [smem:[#allocation7_spill]] %s7683_s3  ;;  %v118_v15 = vadd.s32 9, %v6732_v13  ;;  %vm120_vm1 = vcmp.eq.s32.totalorder %v6722_v9, %v117_v14  ;;  %v119_v28 = vadd.s32 9, %v6765_v27  ;;  %s6563_s1 = smov 122   ;;  %vm7709_vm8 = vcmp.eq.s32.totalorder %v6720_v8, %v6815_v39 }
   0x7   :  { %7721 = sst [smem:[#allocation8_spill]] %s7684_s8  ;;  %s7727_s28 = sld [smem:[#allocation5_spill]]  ;;  %vm129_vm9 = vcmp.eq.s32.totalorder %v6732_v13, %v6815_v39  ;;  %vm131_vm10 = vcmp.eq.s32.totalorder %v126_v41, %v6815_v39  ;;  %vm130_vm12 = vcmp.eq.s32.totalorder %v6765_v27, %v6815_v39  ;;  %v6869_v52 = vadd.s32 1, %v6815_v39 }
   0x8   :  { %v6696_v0 = vld [vmem:[%s7722_s29] sm:$0xff]  ;;  %vm121_vm2 = vcmp.eq.s32.totalorder %v6722_v9, %v118_v15  ;;  %vm122_vm5 = vcmp.eq.s32.totalorder %v6722_v9, %v119_v28  ;;  %s6564_s2 = smov 119   ;;  %s6565_s3 = smov 113   ;;  %vm6836_vm11 = vmpackc.low %vm129_vm9, %vm7709_vm8  ;;  %v135_v47 = vsel %vm131_vm10, 1.0, %v6559_v2  ;;  %v6937_v9 = vsel %vm129_vm9, 1.0, %v6559_v2 }
   0x9   :  { %146 = vrot.lane.b32.xlu0 %v6696_v0, %s6554_s30  ;;  %150 = vrot.lane.b32.xlu1 %v6696_v0, %s6555_s6  ;;  %v74_v11 = vld [vmem:[%s7723_s24] sm:$0xff]  ;;  %vm6739_vm3 = vmpackc.low %vm121_vm2, %vm120_vm1  ;;  %v6770_v29 = vsel %vm122_vm5, 1.0, %v6559_v2  ;;  %s7728_s25 = sld [smem:[#allocation6_spill]]  ;;  %s6567_s27 = smov 123   ;;  %v6848_v49 = vpack.c.bf16 %v135_v47, %v6574_v48  ;;  %vm7710_vm15 = vcmp.eq.s32.totalorder %v6720_v8, %v6869_v52  ;;  %vm138_vm1 = vcmp.eq.s32.totalorder %v6732_v13, %v6869_v52 }
   0xa   :  { %6021 = vmatpush3.bf16.msk.msra.mxu1 %vm6739_vm3, %v6562_v17  ;;  %v6757_v26 = vld [vmem:[%s7726_s26] sm:$0xff]  ;;  %s6566_s26 = smov 124   ;;  %s7702_s4 = smov 121   ;;  %vm6857_vm14 = vmpackc.low %vm413_vm13, %vm130_vm12  ;;  %vm140_vm2 = vcmp.eq.s32.totalorder %v126_v41, %v6869_v52  ;;  %vm7708_vm5 = vcmask 228352  }
   0xb   :  { %5423 = vmatprep.subr.mxu1 %v6559_v2  ;;  %s6570_s24 = smov 118   ;;  %s7704_s8 = smov 117   ;;  %vm6885_vm10 = vmpackc.low %vm138_vm1, %vm7710_vm15  ;;  %v144_v58 = vsel %vm140_vm2, 1.0, %v6559_v2 }
   0xc   :  { %v6898_v60 = vpack.c.bf16 %v144_v58, %v6574_v48 }
   0xd   :  { %148 = vrot.lane.b32.xlu0 %v6696_v0, %s6556_s0  ;;  %v76_v36 = vld [vmem:[%s7727_s28] sm:$0xff]  ;;  %s6569_s28 = smov 120  }
   0xe   :  { %5424 = vmatpush3.msk.msra.mxu1 %vm7713_vm6, %v6770_v29 }
   0xf   :  { %6049 = vmatprep.subr.bf16.mxu1 %v6557_v1  ;;  %v78_v37 = vld [vmem:[%s7728_s25] sm:$0xff]  ;;  %s7705_s25 = smov 115  }
  0x7b   :  { %v6710_v3 = vpop.permute.xlu0 %146  ;;  %v6716_v6 = vpop.permute.xlu1 %150 }
  0x7c   :  { %v6714_v4 = vpack.i.bf16 %v6710_v3, %v6696_v0 }
  0x7e   :  { %6395 = vrot.lane.b32.xlu1 %v6714_v4, %s6561_s23 }
  0x7f   :  { %v6724_v10 = vpop.permute.xlu0 %148 }
  0x80   :  { %v6399_v12 = vpack.i.bf16 %v6716_v6, %v6724_v10 }
  0x82   :  { %6400 = vrot.lane.b32.xlu0 %v6399_v12, %s6561_s23  ;;  %154 = vperm.xlu1 %6404, %v74_v11   ;;  %v6943_v11 = vsel %vm138_vm1, 1.0, %v6559_v2  ;;  %v6946_v12 = vpack.c.bf16 %v6937_v9, %v6574_v48  ;;  %vm7712_vm1 = vcmask 113664  }
  0x83   :  { %v6949_v14 = vpack.c.bf16 %v6943_v11, %v6574_v48 }
  0xf0   :  { %v6747_v18 = vpop.permute.xlu1 %6395 }
  0xf1   :  { %v6398_v19 = vunpack.i.h.bf16 %v6747_v18  ;;  %v6397_v20 = vunpack.i.l.bf16 %v6747_v18  ;;  %v7025_v18 = vld [vmem:[%s7722_s29 + $0x8] sm:$0xff] }
  0xf3   :  { %v6014_v21 = vpack.c.bf16 %v6398_v19, %v6397_v20 }
  0xf4   :  { %v6401_v22 = vpop.permute.xlu0 %6400 }
  0xf5   :  { %v6403_v23 = vunpack.i.h.bf16 %v6401_v22  ;;  %v6402_v24 = vunpack.i.l.bf16 %v6401_v22  ;;  %6015 = vmatpush3.bf16.msra.mxu0 %v6014_v21 }
  0xf6   :  { %6016 = vmatprep.subr.bf16.mxu0 %v6557_v1 }
  0xf7   :  { %v6017_v25 = vpack.c.bf16 %v6403_v23, %v6402_v24 }
  0xf9   :  { %6018 = vmatpush3.bf16.msra.mxu0 %v6017_v25 }
  0xfa   :  { %6022 = vmatprep.subr.bf16.mxu0 %v6557_v1 }
  0xfc   :  { %5417 = vmatmul.mubr.msk.f32.vlgmr.msra.gmra.mrb[0].mxu0 %vm7711_vm4, %v6757_v26 }
  0xfd   :  { %5436 = vmatprep.mubr.msk.f32.mxu0 %vm6558_vm0, %v6559_v2 }
 0x101   :  { %v6775_v30 = vpop.permute.xlu1 %154 }
 0x1cf   :  { %v239_v31 = vpop.f32.mrb[0].mxu0 }
 0x1d0   :  { %v240_v32 = vadd.f32 %v239_v31, %v6775_v30  ;;  %v5418_v33 = vpop.f32.mrb[1].mxu0 }
 0x1d2   :  { %5426 = vmatmul.mubr.msk.f32.vlgmr.msra.gmra.mrb[0].mxu1 %vm7706_vm7, %v240_v32  ;;  %vm139_vm7 = vcmp.eq.s32.totalorder %v6765_v27, %v6869_v52 }
 0x1d3   :  { %5481 = vmatprep.mubr.msk.f32.mxu1 %vm6558_vm0, %v6559_v2  ;;  %vm6907_vm2 = vmpackc.low %vm413_vm13, %vm139_vm7  ;;  %vm7707_vm13 = vcmask 195584  }
 0x2a5   :  { %v317_v34 = vpop.f32.mrb[0].mxu1 }
 0x2a6   :  { %325 = vrot.lane.b32.xlu1 %v317_v34, %s6563_s1  ;;  %322 = vrot.lane.b32.xlu0 %v317_v34, %s6555_s6  ;;  %v5427_v35 = vpop.f32.mrb[1].mxu1 }
 0x2a7   :  { %v6054_v35 = vpack.c.bf16 %v6710_v3, %v6696_v0 }
 0x2aa   :  { %333 = vperm.xlu1 %6404, %v76_v36   ;;  %328 = vrot.lane.b32.xlu0 %v317_v34, %s6564_s2 }
 0x2ae   :  { %570 = vrot.lane.b32.xlu1 %v6724_v10, %s6565_s3  ;;  %6406 = vrot.lane.b32.xlu0 %v6714_v4, %s6565_s3 }
 0x2b2   :  { %563 = vperm.xlu0 %6410, %v78_v37   ;;  %804 = vrot.lane.b32.xlu1 %v6696_v0, %s6566_s26  ;;  %v6057_v37 = vpack.c.bf16 %v6716_v6, %v6724_v10 }
 0x2b6   :  { %807 = vrot.lane.b32.xlu1 %v6696_v0, %s6567_s27  ;;  %810 = vrot.lane.b32.xlu0 %v6696_v0, %s6563_s1 }
 0x2ba   :  { %813 = vrot.lane.b32.xlu1 %v6696_v0, %s7702_s4  ;;  %816 = vrot.lane.b32.xlu0 %v6696_v0, %s6569_s28  ;;  %s7703_s4 = smov 114  }
 0x2be   :  { %819 = vrot.lane.b32.xlu1 %v6696_v0, %s6564_s2  ;;  %822 = vrot.lane.b32.xlu0 %v6696_v0, %s6570_s24 }
 0x2c2   :  { %825 = vrot.lane.b32.xlu1 %v6696_v0, %s7704_s8  ;;  %828 = vrot.lane.b32.xlu0 %v6696_v0, %s7705_s25  ;;  %s7729_s25 = sld [smem:[#allocation7_spill]] }
 0x2c6   :  { %831 = vrot.lane.b32.xlu1 %v6696_v0, %s7703_s4 }
 0x2c8   :  { %v6827_v45 = vld [vmem:[%s7729_s25] sm:$0xff]  ;;  %s7734_s25 = sld [smem:[#allocation8_spill]] }
 0x2ca   :  { %1299 = vrot.lane.b32.xlu1 %v7025_v18, %s6554_s30 }
 0x2ce   :  { %v80_v51 = vld [vmem:[%s7734_s25] sm:$0xff]  ;;  %1303 = vrot.lane.b32.xlu1 %v7025_v18, %s6555_s6 }
 0x2cf   :  { %836 = vperm.xlu0 %6410, %v80_v51  }
 0x2d3   :  { %1301 = vrot.lane.b32.xlu0 %v7025_v18, %s6556_s0 }
 0x318   :  { %v323_v38 = vpop.permute.xlu0 %322  ;;  %v326_v42 = vpop.permute.xlu1 %325 }
 0x319   :  { %v6023_v40 = vpack.c.bf16 %v323_v38, %v317_v34 }
 0x31b   :  { %6024 = vmatpush3.bf16.msra.mxu0 %v6023_v40 }
 0x31c   :  { %v329_v43 = vpop.permute.xlu0 %328  ;;  %6025 = vmatprep.subr.bf16.mxu0 %v6557_v1 }
 0x31d   :  { %v6026_v44 = vpack.c.bf16 %v329_v43, %v326_v42 }
 0x31f   :  { %6027 = vmatpush3.bf16.msra.mxu0 %v6026_v44 }
 0x320   :  { %6028 = vmatprep.subr.bf16.mxu0 %v6557_v1  ;;  %v6892_v59 = vpop.permute.xlu0 %6406 }
 0x321   :  { %v6409_v62 = vunpack.i.h.bf16 %v6892_v59  ;;  %v6408_v63 = vunpack.i.l.bf16 %v6892_v59 }
 0x322   :  { %5437 = vmatmul.mubr.msk.f32.vlgmr.msra.gmra.mrb[2].mxu0 %vm7711_vm4, %v6827_v45 }
 0x323   :  { %6030 = vmatpush3.bf16.msk.msra.mxu0 %vm6836_vm11, %v6562_v17  ;;  %5447 = vmatprep.mubr.msk.f32.mxu0 %vm6558_vm0, %v6559_v2  ;;  %v6043_v4 = vpack.c.bf16 %v6409_v62, %v6408_v63 }
 0x324   :  { %6031 = vmatprep.subr.bf16.mxu0 %v6557_v1 }
 0x327   :  { %6034 = vmatpush3.bf16.msk.msra.mxu0 %vm6857_vm14, %v6848_v49 }
 0x328   :  { %6035 = vmatprep.subr.bf16.mxu0 %v6557_v1 }
 0x329   :  { %v6876_v53 = vpop.permute.xlu1 %333 }
 0x32d   :  { %v571_v7 = vpop.permute.xlu1 %570 }
 0x331   :  { %v805_v23 = vpop.permute.xlu1 %804  ;;  %v6981_v28 = vpop.permute.xlu0 %563 }
 0x335   :  { %v808_v32 = vpop.permute.xlu1 %807  ;;  %v811_v36 = vpop.permute.xlu0 %810 }
 0x336   :  { %v6060_v3 = vpack.c.bf16 %v808_v32, %v805_v23 }
 0x339   :  { %v814_v0 = vpop.permute.xlu1 %813  ;;  %v817_v38 = vpop.permute.xlu0 %816 }
 0x33a   :  { %v6063_v40 = vpack.c.bf16 %v814_v0, %v811_v36  ;;  %v82_v36 = vld [vmem:[%s7688_s9 + $0x8] sm:$0x3f] }
 0x33d   :  { %v820_v41 = vpop.permute.xlu1 %819  ;;  %v823_v43 = vpop.permute.xlu0 %822 }
 0x33e   :  { %v6066_v42 = vpack.c.bf16 %v820_v41, %v817_v38  ;;  %v85_v38 = vld [vmem:[%s7689_s11 + $0x8] sm:$0x7f] }
 0x341   :  { %v826_v6 = vpop.permute.xlu1 %825  ;;  %v829_v44 = vpop.permute.xlu0 %828 }
 0x342   :  { %v6069_v10 = vpack.c.bf16 %v826_v6, %v823_v43  ;;  %v6072_v47 = vpack.c.bf16 %v829_v44, %v6397_v20 }
 0x345   :  { %v832_v48 = vpop.permute.xlu1 %831 }
 0x346   :  { %v6075_v51 = vpack.c.bf16 %v6408_v63, %v832_v48 }
 0x349   :  { %v7059_v58 = vpop.permute.xlu1 %1299 }
 0x34a   :  { %v7063_v27 = vpack.i.bf16 %v7059_v58, %v7025_v18 }
 0x34c   :  { %6412 = vrot.lane.b32.xlu0 %v7063_v27, %s6561_s23 }
 0x34d   :  { %v7069_v62 = vpop.permute.xlu1 %1303 }
 0x3f5   :  { %v405_v54 = vpop.f32.mrb[2].mxu0 }
 0x3f6   :  { %v406_v55 = vadd.f32 %v405_v54, %v6876_v53  ;;  %v5438_v56 = vpop.f32.mrb[3].mxu0  ;;  %v7012_v54 = vld [vmem:[%s7686_s7] sm:$0xff] }
 0x3f7   :  { %v7057_v56 = vpop.permute.xlu0 %836 }
 0x3f8   :  { %5448 = vmatmul.mubr.msk.f32.vlgmr.msra.gmra.mrb[4].mxu0 %vm7708_vm5, %v406_v55 }
 0x3f9   :  { %6037 = vmatpush3.bf16.msk.msra.mxu0 %vm6885_vm10, %v6562_v17  ;;  %5458 = vmatprep.mubr.msk.f32.mxu0 %vm6558_vm0, %v6559_v2 }
 0x3fa   :  { %6038 = vmatprep.subr.bf16.mxu0 %v6557_v1 }
 0x3fb   :  { %v7065_v59 = vpop.permute.xlu0 %1301 }
 0x3fc   :  { %v6416_v63 = vpack.i.bf16 %v7069_v62, %v7065_v59 }
 0x3fd   :  { %6041 = vmatpush3.bf16.msk.msra.mxu0 %vm6907_vm2, %v6898_v60 }
 0x3fe   :  { %6042 = vmatprep.subr.bf16.mxu0 %v6557_v1  ;;  %6417 = vrot.lane.b32.xlu1 %v6416_v63, %s6561_s23 }
 0x3ff   :  { %v7139_v41 = vpop.permute.xlu0 %6412 }
 0x400   :  { %5459 = vmatmul.mubr.msk.f32.vlgmr.msra.gmra.mrb[6].mxu0 %vm7708_vm5, %v406_v55 }
 0x401   :  { %6044 = vmatpush3.bf16.msra.mxu0 %v6043_v4  ;;  %5467 = vmatprep.mubr.msk.f32.mxu0 %vm6558_vm0, %v6559_v2 }
 0x402   :  { %5465 = vmatprep.subr.mxu0 %v6559_v2 }
 0x405   :  { %5466 = vmatpush3.msra.mxu0 %v571_v7 }
 0x406   :  { %5468 = vmatmul.mubr.msk.f32.vlgmr.msra.gmra.mrb[8].mxu0 %vm7707_vm13, %v6926_v5  ;;  %6045 = vmatprep.subr.bf16.mxu0 %v6557_v1  ;;  %vm653_vm13 = vcmask 1045504  }
 0x407   :  { %5474 = vmatprep.mubr.msk.f32.mxu0 %vm6558_vm0, %v6559_v2  ;;  %vm6955_vm5 = vmpackc.low %vm653_vm13, %vm7709_vm8  ;;  %vm913_vm8 = vcmask 1046528  }
 0x408   :  { %6048 = vmatpush3.bf16.msk.msra.mxu0 %vm6955_vm5, %v6946_v12  ;;  %vm6966_vm9 = vmpackc.low %vm653_vm13, %vm7710_vm15 }
 0x409   :  { %6052 = vmatpush3.bf16.msk.msra.mxu1 %vm6966_vm9, %v6949_v14  ;;  %6053 = vmatprep.subr.bf16.mxu0 %v6557_v1  ;;  %vm7037_vm15 = vmpackc.low %vm913_vm8, %vm130_vm12  ;;  %vm7714_vm12 = vcmask 56320  }
 0x40a   :  { %6084 = vmatprep.subr.bf16.mxu1 %v6557_v1  ;;  %vm7048_vm4 = vmpackc.low %vm913_vm8, %vm139_vm7  ;;  %vm909_vm7 = vcmask 252928  }
 0x470   :  { %v6418_v43 = vpop.permute.xlu1 %6417 }
 0x471   :  { %v6420_v6 = vunpack.i.h.bf16 %v6418_v43 }
 0x4cb   :  { %v6975_v19 = vpop.f32.mrb[4].mxu0 }
 0x4cc   :  { %v5449_v21 = vpop.f32.mrb[5].mxu0 }
 0x4d3   :  { %v6977_v22 = vpop.f32.mrb[6].mxu0 }
 0x4d4   :  { %v560_v24 = vmax.f32 %v6975_v19, %v6977_v22  ;;  %v5460_v25 = vpop.f32.mrb[7].mxu0 }
 0x4d9   :  { %v645_v31 = vpop.f32.mrb[8].mxu0 }
 0x4da   :  { %v646_v33 = vadd.f32 %v645_v31, %v6981_v28  ;;  %v5469_v34 = vpop.f32.mrb[9].mxu0 }
 0x4db   :  { %v7078_v34 = vld [vmem:[%s7687_s10] sm:$0x7f] }
 0x4dc   :  { %5475 = vmatmul.mubr.msk.f32.vlgmr.msra.gmra.mrb[10].mxu0 %vm7712_vm1, %v646_v33  ;;  %5482 = vmatmul.mubr.msk.f32.vlgmr.msra.gmra.mrb[2].mxu1 %vm7712_vm1, %v646_v33  ;;  %vm6575_vm1 = vmmov 1  }
 0x4dd   :  { %6055 = vmatpush3.bf16.msra.mxu0 %v6054_v35  ;;  %5516 = vmatprep.mubr.msk.f32.mxu0 %vm6558_vm0, %v6559_v2  ;;  %v81_v35 = vld [vmem:[%s7688_s9] sm:$0xff]  ;;  %vm7096_vm6 = vmpackc.low %vm653_vm13, %vm6575_vm1  ;;  %vm7751_vm13 = vcmask 1042432   ;;  %s6576_s9 = smov 64  }
 0x4de   :  { %6056 = vmatprep.subr.bf16.mxu0 %v6557_v1  ;;  %6086 = vmatpush3.bf16.msk.msra.mxu1 %vm6885_vm10, %v6562_v17 }
 0x4df   :  { %6087 = vmatprep.subr.bf16.mxu1 %v6557_v1  ;;  %5538 = vmatprep.mubr.msk.f32.mxu1 %vm6558_vm0, %v6559_v2 }
 0x4e1   :  { %6058 = vmatpush3.bf16.msra.mxu0 %v6057_v37  ;;  %v7092_v37 = vpack.c.bf16 %v82_v36, %v81_v35 }
 0x4e2   :  { %6059 = vmatprep.subr.bf16.mxu0 %v6557_v1  ;;  %6090 = vmatpush3.bf16.msk.msra.mxu1 %vm7048_vm4, %v6898_v60 }
 0x4e3   :  { %5541 = vmatprep.subr.mxu1 %v6559_v2 }
 0x4e5   :  { %6061 = vmatpush3.bf16.msra.mxu0 %v6060_v3  ;;  %v84_v3 = vld [vmem:[%s7689_s11] sm:$0xff]  ;;  %s7755_s11 = smov 121  }
 0x4e6   :  { %6062 = vmatprep.subr.bf16.mxu0 %v6557_v1 }
 0x4e9   :  { %6064 = vmatpush3.bf16.msra.mxu0 %v6063_v40  ;;  %v7118_v40 = vpack.c.bf16 %v85_v38, %v84_v3 }
 0x4ea   :  { %6065 = vmatprep.subr.bf16.mxu0 %v6557_v1 }
 0x4ed   :  { %6067 = vmatpush3.bf16.msra.mxu0 %v6066_v42  ;;  %v6414_v42 = vunpack.i.l.bf16 %v7139_v41 }
 0x4ee   :  { %6068 = vmatprep.subr.bf16.mxu0 %v6557_v1 }
 0x4f1   :  { %6070 = vmatpush3.bf16.msra.mxu0 %v6069_v10  ;;  %v6419_v10 = vunpack.i.l.bf16 %v6418_v43 }
 0x4f2   :  { %6071 = vmatprep.subr.bf16.mxu0 %v6557_v1 }
 0x4f5   :  { %6073 = vmatpush3.bf16.msra.mxu0 %v6072_v47 }
 0x4f6   :  { %6074 = vmatprep.subr.bf16.mxu0 %v6557_v1 }
 0x4f9   :  { %6076 = vmatpush3.bf16.msra.mxu0 %v6075_v51  ;;  %v6103_v51 = vpack.c.bf16 %v6420_v6, %v6419_v10 }
 0x4fa   :  { %6077 = vmatprep.subr.bf16.mxu0 %v6557_v1 }
 0x4fc   :  { %5517 = vmatmul.mubr.f32.vlgmr.msra.gmra.mrb[12].mxu0 %v7012_v54 }
 0x4fd   :  { %6079 = vmatpush3.bf16.msk.msra.mxu0 %vm6836_vm11, %v6562_v17  ;;  %5527 = vmatprep.mubr.msk.f32.mxu0 %vm6558_vm0, %v6559_v2 }
 0x4fe   :  { %6080 = vmatprep.subr.bf16.mxu0 %v6557_v1 }
 0x501   :  { %6083 = vmatpush3.bf16.msk.msra.mxu0 %vm7037_vm15, %v6848_v49 }
 0x502   :  { %6105 = vmatprep.subr.bf16.mxu0 %v6557_v1 }
 0x5af   :  { %v723_v4 = vpop.f32.mrb[10].mxu0  ;;  %v796_v7 = vpop.f32.mrb[2].mxu1 }
 0x5b0   :  { %v800_v21 = vmax.f32 %v723_v4, %v796_v7  ;;  %v5476_v23 = vpop.f32.mrb[11].mxu0  ;;  %v5483_v25 = vpop.f32.mrb[3].mxu1 }
 0x5cf   :  { %v905_v31 = vpop.f32.mrb[12].mxu0 }
 0x5d0   :  { %v906_v32 = vadd.f32 %v905_v31, %v7057_v56  ;;  %v5518_v33 = vpop.f32.mrb[13].mxu0 }
 0x5d2   :  { %5528 = vmatmul.mubr.msk.f32.vlgmr.msra.gmra.mrb[14].mxu0 %vm909_vm7, %v906_v32  ;;  %5539 = vmatmul.mubr.msk.f32.vlgmr.msra.gmra.mrb[4].mxu1 %vm909_vm7, %v906_v32 }
 0x5d3   :  { %5542 = vmatpush3.msk.msra.mxu1 %vm913_vm8, %v7078_v34  ;;  %5543 = vmatprep.mubr.msk.f32.mxu1 %vm6558_vm0, %v6559_v2 }
 0x5d4   :  { %6091 = vmatprep.subr.bf16.mxu1 %v6557_v1  ;;  %6107 = vmatpush3.bf16.msk.msra.mxu0 %vm6739_vm3, %v6562_v17  ;;  %vm7122_vm3 = vmpackc.low %vm913_vm8, %vm6575_vm1  ;;  %vm1212_vm1 = vcmask 121856  }
 0x5d5   :  { %5575 = vmatprep.subr.mxu0 %v6559_v2  ;;  %5577 = vmatprep.mubr.msk.f32.mxu0 %vm6558_vm0, %v6559_v2 }
 0x5d6   :  { %5544 = vmatmul.mubr.msk.f32.vlgmr.msra.gmra.mrb[6].mxu1 %vm7714_vm12, %v800_v21  ;;  %vm7752_vm12 = vcmask 113664  }
 0x5d7   :  { %6094 = vmatpush3.bf16.msk.msra.mxu1 %vm7096_vm6, %v7092_v37  ;;  %5550 = vmatprep.mubr.msk.f32.mxu1 %vm6558_vm0, %v6559_v2 }
 0x5d8   :  { %6095 = vmatprep.subr.bf16.mxu1 %v6557_v1  ;;  %5576 = vmatpush3.msk.msra.mxu0 %vm7751_vm13, %v6770_v29  ;;  %v6415_v29 = vunpack.i.h.bf16 %v7139_v41  ;;  %vm7754_vm13 = vcmask 154624  }
 0x5d9   :  { %6114 = vmatprep.subr.bf16.mxu0 %v6557_v1 }
 0x5da   :  { %5551 = vmatmul.mubr.msk.f32.vlgmr.msra.gmra.mrb[8].mxu1 %vm7752_vm12, %v560_v24  ;;  %v6100_v19 = vpack.c.bf16 %v6415_v29, %v6414_v42  ;;  %vm7753_vm12 = vcmask 261120  }
 0x5db   :  { %6098 = vmatpush3.bf16.msk.msra.mxu1 %vm7122_vm3, %v7118_v40  ;;  %5557 = vmatprep.mubr.msk.f32.mxu1 %vm6558_vm0, %v6559_v2 }
 0x5dc   :  { %6099 = vmatprep.subr.bf16.mxu1 %v6557_v1 }
 0x6a5   :  { %v982_v22 = vpop.f32.mrb[14].mxu0  ;;  %v1054_v24 = vpop.f32.mrb[4].mxu1 }
 0x6a6   :  { %v1058_v44 = vmax.f32 %v982_v22, %v1054_v24  ;;  %v5529_v47 = vpop.f32.mrb[15].mxu0  ;;  %v5540_v48 = vpop.f32.mrb[5].mxu1 }
 0x6a8   :  { %5558 = vmatmul.mubr.msk.f32.vlgmr.msra.gmra.mrb[10].mxu1 %vm1212_vm1, %v1058_v44 }
 0x6a9   :  { %6101 = vmatpush3.bf16.msra.mxu1 %v6100_v19  ;;  %v1132_v63 = vpop.f32.mrb[6].mxu1  ;;  %5568 = vmatprep.mubr.msk.f32.mxu1 %vm6558_vm0, %v6559_v2 }
 0x6aa   :  { %v5545_v4 = vpop.f32.mrb[7].mxu1  ;;  %6102 = vmatprep.subr.bf16.mxu1 %v6557_v1 }
 0x6ad   :  { %6104 = vmatpush3.bf16.msra.mxu1 %v6103_v51  ;;  %v1208_v7 = vpop.f32.mrb[8].mxu1 }
 0x6ae   :  { %v1209_v21 = vadd.f32 %v1208_v7, %v1132_v63  ;;  %v5552_v23 = vpop.f32.mrb[9].mxu1  ;;  %6108 = vmatprep.subr.bf16.mxu1 %v6557_v1  ;;  %v6140_v63 = vpack.c.bf16 %v7059_v58, %v7025_v18 }
 0x6b0   :  { %5569 = vmatmul.mubr.msk.f32.vlgmr.msra.gmra.mrb[12].mxu1 %vm7753_vm12, %v6757_v26 }
 0x6b1   :  { %5588 = vmatprep.mubr.msk.f32.mxu1 %vm6558_vm0, %v6559_v2 }
 0x77b   :  { %v1285_v25 = vpop.f32.mrb[10].mxu1 }
 0x77c   :  { %v7154_v31 = vadd.f32 %v1285_v25, %v1209_v21  ;;  %v5559_v32 = vpop.f32.mrb[11].mxu1 }
 0x783   :  { %v1383_v33 = vpop.f32.mrb[12].mxu1 }
 0x784   :  { %v1384_v35 = vadd.f32 %v1383_v33, %v6775_v30  ;;  %v5570_v36 = vpop.f32.mrb[13].mxu1 }
 0x786   :  { %5578 = vmatmul.mubr.msk.f32.vlgmr.msra.gmra.mrb[16].mxu0 %vm7754_vm13, %v1384_v35 }
 0x787   :  { %6116 = vmatpush3.bf16.msk.msra.mxu0 %vm6836_vm11, %v6562_v17  ;;  %5599 = vmatprep.mubr.msk.f32.mxu0 %vm6558_vm0, %v6559_v2 }
 0x788   :  { %6117 = vmatprep.subr.bf16.mxu0 %v6557_v1 }
 0x78b   :  { %6120 = vmatpush3.bf16.msk.msra.mxu0 %vm6857_vm14, %v6848_v49  ;;  %vm7759_vm14 = vmmov %vm7753_vm12  ;;  %vm7760_vm12 = vcmask 228352  }
 0x78c   :  { %6128 = vmatprep.subr.bf16.mxu0 %v6557_v1  ;;  %vm7761_vm13 = vmmov %vm7760_vm12 }
 0x859   :  { %v1456_v26 = vpop.f32.mrb[16].mxu0 }
 0x85a   :  { %1464 = vrot.lane.b32.xlu1 %v1456_v26, %s6563_s1  ;;  %1461 = vrot.lane.b32.xlu0 %v1456_v26, %s6555_s6  ;;  %v5579_v30 = vpop.f32.mrb[17].mxu0  ;;  %s7756_s6 = smov 115  }
 0x85e   :  { %6422 = vrot.lane.b32.xlu1 %v7063_v27, %s6565_s3  ;;  %1467 = vrot.lane.b32.xlu0 %v1456_v26, %s6564_s2 }
 0x862   :  { %1910 = vrot.lane.b32.xlu1 %v7025_v18, %s6566_s26  ;;  %1688 = vrot.lane.b32.xlu0 %v7065_v59, %s6565_s3  ;;  %s7757_s3 = smov 117  }
 0x866   :  { %1916 = vrot.lane.b32.xlu1 %v7025_v18, %s6563_s1  ;;  %1913 = vrot.lane.b32.xlu0 %v7025_v18, %s6567_s27  ;;  %s7758_s1 = smov 114  }
 0x86a   :  { %1922 = vrot.lane.b32.xlu1 %v7025_v18, %s6569_s28  ;;  %1919 = vrot.lane.b32.xlu0 %v7025_v18, %s7755_s11 }
 0x86e   :  { %1928 = vrot.lane.b32.xlu1 %v7025_v18, %s6570_s24  ;;  %1925 = vrot.lane.b32.xlu0 %v7025_v18, %s6564_s2 }
 0x872   :  { %1934 = vrot.lane.b32.xlu1 %v7025_v18, %s7756_s6  ;;  %1931 = vrot.lane.b32.xlu0 %v7025_v18, %s7757_s3 }
 0x876   :  { %1937 = vrot.lane.b32.xlu0 %v7025_v18, %s7758_s1 }
 0x8cc   :  { %v1462_v50 = vpop.permute.xlu0 %1461  ;;  %v1465_v3 = vpop.permute.xlu1 %1464 }
 0x8cd   :  { %v6109_v27 = vpack.c.bf16 %v1462_v50, %v1456_v26 }
 0x8cf   :  { %6110 = vmatpush3.bf16.msra.mxu1 %v6109_v27 }
 0x8d0   :  { %v1468_v38 = vpop.permute.xlu0 %1467  ;;  %6111 = vmatprep.subr.bf16.mxu1 %v6557_v1  ;;  %v7209_v43 = vpop.permute.xlu1 %6422 }
 0x8d1   :  { %v6112_v29 = vpack.c.bf16 %v1468_v38, %v1465_v3  ;;  %v6425_v19 = vunpack.i.h.bf16 %v7209_v43 }
 0x8d3   :  { %6113 = vmatpush3.bf16.msra.mxu1 %v6112_v29 }
 0x8d4   :  { %6121 = vmatprep.subr.bf16.mxu1 %v6557_v1  ;;  %v1911_v47 = vpop.permute.xlu1 %1910 }
 0x8d6   :  { %5589 = vmatmul.mubr.msk.f32.vlgmr.msra.gmra.mrb[14].mxu1 %vm7759_vm14, %v6827_v45  ;;  %v6424_v45 = vunpack.i.l.bf16 %v7209_v43 }
 0x8d7   :  { %6123 = vmatpush3.bf16.msk.msra.mxu1 %vm6885_vm10, %v6562_v17  ;;  %5610 = vmatprep.mubr.msk.f32.mxu1 %vm6558_vm0, %v6559_v2 }
 0x8d8   :  { %6124 = vmatprep.subr.bf16.mxu1 %v6557_v1  ;;  %v6129_v10 = vpack.c.bf16 %v6425_v19, %v6424_v45  ;;  %v1917_v4 = vpop.permute.xlu1 %1916  ;;  %v1296_v19 = vadd.f32 %v5041_v16, %v7154_v31 }
 0x8db   :  { %6127 = vmatpush3.bf16.msk.msra.mxu1 %vm6907_vm2, %v6898_v60  ;;  %vm7762_vm2 = vcmask 195584  }
 0x8dc   :  { %6135 = vmatprep.subr.bf16.mxu1 %v6557_v1  ;;  %v1923_v46 = vpop.permute.xlu1 %1922 }
 0x8e0   :  { %v1929_v21 = vpop.permute.xlu1 %1928 }
 0x8e4   :  { %v1935_v20 = vpop.permute.xlu1 %1934 }
 0x9a9   :  { %v1536_v22 = vpop.f32.mrb[14].mxu1 }
 0x9aa   :  { %v1537_v24 = vadd.f32 %v1536_v22, %v6876_v53  ;;  %v5590_v6 = vpop.f32.mrb[15].mxu1  ;;  %v1689_v53 = vpop.permute.xlu0 %1688 }
 0x9ac   :  { %5600 = vmatmul.mubr.msk.f32.vlgmr.msra.gmra.mrb[18].mxu0 %vm7760_vm12, %v1537_v24  ;;  %5611 = vmatmul.mubr.msk.f32.vlgmr.msra.gmra.mrb[16].mxu1 %vm7761_vm13, %v1537_v24  ;;  %v1297_v24 = vmax.f32 %v1296_v19, 0.0 }
 0x9ad   :  { %6130 = vmatpush3.bf16.msra.mxu0 %v6129_v10  ;;  %5619 = vmatprep.mubr.msk.f32.mxu0 %vm6558_vm0, %v6559_v2  ;;  %v90_v10 = vld [vmem:[%s7692_s14 + $0x10] sm:$0xff] }
 0x9ae   :  { %5617 = vmatprep.subr.mxu0 %v6559_v2  ;;  %6138 = vmatpush3.bf16.msk.msra.mxu1 %vm6966_vm9, %v6949_v14  ;;  %v1914_v51 = vpop.permute.xlu0 %1913 }
 0x9af   :  { %5633 = vmatprep.mubr.msk.f32.mxu1 %vm6558_vm0, %v6559_v2  ;;  %6163 = vmatprep.subr.bf16.mxu1 %v6557_v1  ;;  %v6146_v58 = vpack.c.bf16 %v1914_v51, %v1911_v47 }
 0x9b1   :  { %5618 = vmatpush3.msra.mxu0 %v1689_v53  ;;  %v91_v53 = vld [vmem:[%s7692_s14 + $0x18] sm:$0xff] }
 0x9b2   :  { %5620 = vmatmul.mubr.msk.f32.vlgmr.msra.gmra.mrb[20].mxu0 %vm7762_vm2, %v6926_v5  ;;  %6131 = vmatprep.subr.bf16.mxu0 %v6557_v1  ;;  %v1920_v18 = vpop.permute.xlu0 %1919 }
 0x9b3   :  { %6134 = vmatpush3.bf16.msk.msra.mxu0 %vm6955_vm5, %v6946_v12  ;;  %5626 = vmatprep.mubr.msk.f32.mxu0 %vm6558_vm0, %v6559_v2  ;;  %vm7763_vm5 = vcmask 113664   ;;  %v6149_v7 = vpack.c.bf16 %v1920_v18, %v1917_v4 }
 0x9b4   :  { %6139 = vmatprep.subr.bf16.mxu0 %v6557_v1  ;;  %vm7764_vm9 = vmmov %vm7763_vm5 }
 0xa7f   :  { %v7236_v61 = vpop.f32.mrb[18].mxu0  ;;  %v7238_v14 = vpop.f32.mrb[16].mxu1 }
 0xa80   :  { %v1683_v13 = vmax.f32 %v7236_v61, %v7238_v14  ;;  %v5601_v44 = vpop.f32.mrb[19].mxu0  ;;  %v5612_v5 = vpop.f32.mrb[17].mxu1  ;;  %v7348_v61 = vpack.c.bf16 %v91_v53, %v90_v10  ;;  %v5085_v14 = vld [vmem:[%s7693_s15] ss:$0 sm:$0xff]  ;;  %s6577_s15 = smov 32  }
 0xa85   :  { %v1759_v48 = vpop.f32.mrb[20].mxu0 }
 0xa86   :  { %v1760_v15 = vadd.f32 %v1759_v48, %v6981_v28  ;;  %v5621_v12 = vpop.f32.mrb[21].mxu0  ;;  %v6143_v28 = vpack.c.bf16 %v7069_v62, %v7065_v59  ;;  %v1926_v59 = vpop.permute.xlu0 %1925 }
 0xa87   :  { %v6152_v62 = vpack.c.bf16 %v1926_v59, %v1923_v46 }
 0xa88   :  { %5627 = vmatmul.mubr.msk.f32.vlgmr.msra.gmra.mrb[22].mxu0 %vm7763_vm5, %v1760_v15  ;;  %5634 = vmatmul.mubr.msk.f32.vlgmr.msra.gmra.mrb[18].mxu1 %vm7764_vm9, %v1760_v15 }
 0xa89   :  { %6141 = vmatpush3.bf16.msra.mxu0 %v6140_v63  ;;  %5668 = vmatprep.mubr.msk.f32.mxu0 %vm6558_vm0, %v6559_v2 }
 0xa8a   :  { %6142 = vmatprep.subr.bf16.mxu0 %v6557_v1  ;;  %6165 = vmatpush3.bf16.msk.msra.mxu1 %vm6836_vm11, %v6562_v17  ;;  %v1932_v23 = vpop.permute.xlu0 %1931  ;;  %vm7765_vm11 = vcmask 56320  }
 0xa8b   :  { %6166 = vmatprep.subr.bf16.mxu1 %v6557_v1  ;;  %5679 = vmatprep.mubr.msk.f32.mxu1 %vm6558_vm0, %v6559_v2  ;;  %v6155_v25 = vpack.c.bf16 %v1932_v23, %v1929_v21  ;;  %v93_v21 = vld [vmem:[%s7694_s16] sm:$0xff]  ;;  %v94_v23 = vld [vmem:[%s7694_s16 + $0x8] sm:$0xff] }
 0xa8d   :  { %6144 = vmatpush3.bf16.msra.mxu0 %v6143_v28 }
 0xa8e   :  { %6145 = vmatprep.subr.bf16.mxu0 %v6557_v1  ;;  %6169 = vmatpush3.bf16.msk.msra.mxu1 %vm7037_vm15, %v6848_v49  ;;  %v6158_v49 = vpack.c.bf16 %v1935_v20, %v6414_v42  ;;  %v1938_v32 = vpop.permute.xlu0 %1937  ;;  %vm7768_vm15 = vcmp.eq.s32.totalorder %v6720_v8, %v6815_v39  ;;  %v88_v39 = vld [vmem:[%s7692_s14] sm:$0xff]  ;;  %v7381_v20 = vpack.c.bf16 %v94_v23, %v93_v21 }
 0xa8f   :  { %6170 = vmatprep.subr.bf16.mxu1 %v6557_v1  ;;  %v6161_v33 = vpack.c.bf16 %v6424_v45, %v1938_v32 }
 0xa91   :  { %6147 = vmatpush3.bf16.msra.mxu0 %v6146_v58 }
 0xa92   :  { %6148 = vmatprep.subr.bf16.mxu0 %v6557_v1 }
 0xa95   :  { %6150 = vmatpush3.bf16.msra.mxu0 %v6149_v7 }
 0xa96   :  { %6151 = vmatprep.subr.bf16.mxu0 %v6557_v1 }
 0xa99   :  { %6153 = vmatpush3.bf16.msra.mxu0 %v6152_v62 }
 0xa9a   :  { %6154 = vmatprep.subr.bf16.mxu0 %v6557_v1 }
 0xa9d   :  { %6156 = vmatpush3.bf16.msra.mxu0 %v6155_v25  ;;  %v95_v25 = vld [vmem:[%s7694_s16 + $0x10] sm:$0xff] }
 0xa9e   :  { %6157 = vmatprep.subr.bf16.mxu0 %v6557_v1 }
 0xaa1   :  { %6159 = vmatpush3.bf16.msra.mxu0 %v6158_v49  ;;  %v96_v49 = vld [vmem:[%s7694_s16 + $0x18] sm:$0xff] }
 0xaa2   :  { %6160 = vmatprep.subr.bf16.mxu0 %v6557_v1  ;;  %v7387_v32 = vpack.c.bf16 %v96_v49, %v95_v25 }
 0xaa5   :  { %6162 = vmatpush3.bf16.msra.mxu0 %v6161_v33 }
 0xaa8   :  { %5669 = vmatmul.mubr.f32.vlgmr.msra.gmra.mrb[24].mxu0 %v7012_v54 }
 0xb5b   :  { %v1832_v35 = vpop.f32.mrb[22].mxu0  ;;  %v1902_v36 = vpop.f32.mrb[18].mxu1 }
 0xb5c   :  { %v1906_v26 = vmax.f32 %v1832_v35, %v1902_v36  ;;  %v5628_v30 = vpop.f32.mrb[23].mxu0  ;;  %v5635_v50 = vpop.f32.mrb[19].mxu1 }
 0xb7b   :  { %v2006_v27 = vpop.f32.mrb[24].mxu0 }
 0xb7c   :  { %v2007_v3 = vadd.f32 %v2006_v27, %v7057_v56  ;;  %v5670_v41 = vpop.f32.mrb[25].mxu0 }
 0xb7e   :  { %5680 = vmatmul.mubr.msk.f32.vlgmr.msra.gmra.mrb[20].mxu1 %vm909_vm7, %v2007_v3 }
 0xb7f   :  { %6172 = vmatpush3.bf16.msk.msra.mxu1 %vm6885_vm10, %v6562_v17  ;;  %5690 = vmatprep.mubr.msk.f32.mxu1 %vm6558_vm0, %v6559_v2  ;;  %vm2550_vm10 = vcmask 1041408  }
 0xb80   :  { %6173 = vmatprep.subr.bf16.mxu1 %v6557_v1 }
 0xb83   :  { %6176 = vmatpush3.bf16.msk.msra.mxu1 %vm7048_vm4, %v6898_v60  ;;  %vm7766_vm4 = vmmov %vm7763_vm5 }
 0xb84   :  { %5693 = vmatprep.subr.mxu1 %v6559_v2 }
 0xb86   :  { %5691 = vmatmul.mubr.msk.f32.vlgmr.msra.gmra.mrb[22].mxu1 %vm909_vm7, %v2007_v3  ;;  %vm2543_vm7 = vcmask 15360  }
 0xb87   :  { %5694 = vmatpush3.msk.msra.mxu1 %vm913_vm8, %v7078_v34  ;;  %5695 = vmatprep.mubr.msk.f32.mxu1 %vm6558_vm0, %v6559_v2  ;;  %vm2376_vm8 = vcmask 64512  }
 0xb88   :  { %6177 = vmatprep.subr.bf16.mxu1 %v6557_v1 }
 0xb8a   :  { %5696 = vmatmul.mubr.msk.f32.vlgmr.msra.gmra.mrb[24].mxu1 %vm7765_vm11, %v1906_v26 }
 0xb8b   :  { %6180 = vmatpush3.bf16.msk.msra.mxu1 %vm7096_vm6, %v7092_v37  ;;  %5702 = vmatprep.mubr.msk.f32.mxu1 %vm6558_vm0, %v6559_v2  ;;  %vm7767_vm6 = vcmp.eq.s32.totalorder %v6720_v8, %v6869_v52  ;;  %v132_v52 = vsel %vm7768_vm15, 1.0, %v6559_v2  ;;  %v87_v8 = vld [vmem:[%s7691_s13] sm:$0x3] }
 0xb8c   :  { %6181 = vmatprep.subr.bf16.mxu1 %v6557_v1  ;;  %5722 = vmatprep.subr.msk.mxu0 %vm2550_vm10, %v87_v8 }
 0xb8d   :  { %5723 = vmatpush3.msk.msra.mxu0 %vm2550_vm10, %v87_v8 }
 0xb8e   :  { %5703 = vmatmul.mubr.msk.f32.vlgmr.msra.gmra.mrb[26].mxu1 %vm7766_vm4, %v1683_v13  ;;  %6185 = vmatprep.subr.bf16.mxu0 %v6557_v1 }
 0xb8f   :  { %6184 = vmatpush3.bf16.msk.msra.mxu1 %vm7122_vm3, %v7118_v40  ;;  %5709 = vmatprep.mubr.msk.f32.mxu1 %vm6558_vm0, %v6559_v2  ;;  %v141_v40 = vsel %vm7767_vm6, 1.0, %v6559_v2  ;;  %vm7769_vm3 = vmmov %vm7759_vm14 }
 0xc51   :  { %v2079_v17 = vpop.f32.mrb[20].mxu1 }
 0xc52   :  { %v5681_v57 = vpop.f32.mrb[21].mxu1 }
 0xc59   :  { %v2149_v60 = vpop.f32.mrb[22].mxu1 }
 0xc5a   :  { %v2153_v54 = vmax.f32 %v2079_v17, %v2149_v60  ;;  %v5692_v55 = vpop.f32.mrb[23].mxu1 }
 0xc5c   :  { %5710 = vmatmul.mubr.msk.f32.vlgmr.msra.gmra.mrb[28].mxu1 %vm1212_vm1, %v2153_v54  ;;  %vm7770_vm1 = vmmov %vm7769_vm3 }
 0xc5d   :  { %v2223_v56 = vpop.f32.mrb[24].mxu1  ;;  %5714 = vmatprep.mubr.msk.f32.mxu1 %vm2376_vm8, %v141_v40  ;;  %vm7771_vm14 = vmmov %vm7770_vm1 }
 0xc5e   :  { %v5697_v34 = vpop.f32.mrb[25].mxu1  ;;  %vm7772_vm12 = vmmov %vm7770_vm1 }
 0xc5f   :  { %vm7773_vm13 = vmmov %vm7770_vm1 }
 0xc60   :  { %vm7774_vm2 = vmmov %vm7770_vm1 }
 0xc61   :  { %v2296_v37 = vpop.f32.mrb[26].mxu1  ;;  %vm7775_vm5 = vmmov %vm7770_vm1 }
 0xc62   :  { %v2297_v0 = vadd.f32 %v2296_v37, %v2223_v56  ;;  %v5704_v42 = vpop.f32.mrb[27].mxu1  ;;  %vm7776_vm9 = vmmov %vm7770_vm1 }
 0xc63   :  { %vm7777_vm11 = vmmov %vm7770_vm1 }
 0xc64   :  { %vm7778_vm4 = vmmov %vm7770_vm1 }
 0xc65   :  { %vm7779_vm6 = vmmov %vm7770_vm1 }
 0xc66   :  { %vm7781_vm15 = vmmov %vm7770_vm1 }
 0xc67   :  { %vm7782_vm10 = vmmov %vm7770_vm1 }
 0xd2f   :  { %v2369_v38 = vpop.f32.mrb[28].mxu1 }
 0xd30   :  { %v2373_v29 = vadd.f32 %v2369_v38, %v2297_v0  ;;  %v5711_v43 = vpop.f32.mrb[29].mxu1 }
 0xd32   :  { %v2374_v45 = vadd.f32 %v5041_v16, %v2373_v29 }
 0xd34   :  { %v2375_v22 = vmax.f32 %v2374_v45, 0.0 }
 0xd36   :  { %5712 = vmatprep.subr.mxu1 %v2375_v22 }
 0xd37   :  { %5713 = vmatpush3.msra.mxu1 %v2375_v22 }
 0xd38   :  { %5715 = vmatmul.mubr.msk.f32.vlgmr.msra.gmra.mrb[30].mxu1 %vm2376_vm8, %v6943_v11  ;;  %5717 = vmatprep.subr.mxu1 %v1297_v24 }
 0xd39   :  { %5718 = vmatpush3.msra.mxu1 %v1297_v24  ;;  %5719 = vmatprep.mubr.msk.f32.mxu1 %vm2376_vm8, %v132_v52 }
 0xd3a   :  { %6191 = vmatprep.subr.bf16.mxu1 %v6557_v1 }
 0xd40   :  { %5720 = vmatmul.mubr.msk.f32.vlgmr.msra.gmra.mrb[30].mxu1 %vm2376_vm8, %v6937_v9  ;;  %v89_v9 = vld [vmem:[%s7692_s14 + $0x8] sm:$0xff]  ;;  %vm7780_vm8 = vmmov %vm7770_vm1 }
 0xd41   :  { %5746 = vmatprep.mubr.msk.f32.mxu1 %vm6558_vm0, %v6559_v2  ;;  %v7339_v31 = vpack.c.bf16 %v89_v9, %v88_v39  ;;  %6193 = vmatpush3.bf16.msra.mxu1 %v7381_v20 }
 0xd42   :  { %6194 = vmatprep.subr.bf16.mxu1 %v6557_v1 }
 0xd45   :  { %6196 = vmatpush3.bf16.msra.mxu1 %v7387_v32 }
 0xd46   :  { %6203 = vmatprep.subr.bf16.mxu1 %v6557_v1 }
 0xe13   :  { %v5721_v11 = vpop.f32.mrb[30].mxu1 }
 0xe14   :  { %v2528_v6 = vpop.f32.mrb[31].mxu1 }
 0xe15   :  { %5724 = vmatprep.mubr.msk.f32.mxu0 %vm2543_vm7, %v2528_v6 }
 0xe16   :  { %5725 = vmatmul.mubr.msk.f32.vlgmr.msra.gmra.mrb[26].mxu0 %vm2543_vm7, %v5721_v11  ;;  %vm7783_vm7 = vmmov %vm7770_vm1 }
 0xe17   :  { %6187 = vmatpush3.bf16.msra.mxu0 %v7339_v31  ;;  %5735 = vmatprep.mubr.msk.f32.mxu0 %vm6558_vm0, %v6559_v2 }
 0xe18   :  { %6188 = vmatprep.subr.bf16.mxu0 %v6557_v1 }
 0xe1b   :  { %6190 = vmatpush3.bf16.msra.mxu0 %v7348_v61 }
 0xe1c   :  { %6197 = vmatprep.subr.bf16.mxu0 %v6557_v1 }
 0xe1e   :  { %5736 = vmatmul.mubr.f32.vlgmr.msra.gmra.mrb[28].mxu0 %v6559_v2 }
 0xe1f   :  { %6199 = vmatpush3.bf16.msra.mxu0 %v7339_v31  ;;  %5757 = vmatprep.mubr.msk.f32.mxu0 %vm6558_vm0, %v6559_v2 }
 0xe20   :  { %6200 = vmatprep.subr.bf16.mxu0 %v6557_v1 }
 0xe23   :  { %6202 = vmatpush3.bf16.msra.mxu0 %v7348_v61 }
 0xe24   :  { %6209 = vmatprep.subr.bf16.mxu0 %v6557_v1 }
 0xee9   :  { %v5726_v13 = vpop.f32.mrb[26].mxu0 }
 0xeea   :  { %v7365_v44 = vadd.f32 %v5726_v13, %v5085_v14  ;;  %v2620_v5 = vpop.f32.mrb[27].mxu0 }
 0xeeb   :  { %v7367_v47 = vadd.f32 %v5085_v14, %v2620_v5 }
 0xef1   :  { %v2698_v48 = vpop.f32.mrb[28].mxu0 }
 0xef2   :  { %v2702_v51 = vadd.f32 %v2698_v48, %v7367_v47  ;;  %v5737_v15 = vpop.f32.mrb[29].mxu0 }
 0xef4   :  { %6426 = vtanh.f32 %v2702_v51  ;;  %v5089_v63 = vmul.f32 -1.442695, %v2702_v51 }
 0xef6   :  { %6428 = vpow2.f32 %v5089_v63 }
 0xefe   :  { %v6427_v12 = vpop.eup %6426 }
 0xeff   :  { %2712 = vrot.lane.b32.xlu1 %v6427_v12, %s6576_s9 }
 0xf00   :  { %v6429_v4 = vpop.eup %6428 }
 0xf01   :  { %v2706_v28 = vadd.f32 1.0, %v6429_v4 }
 0xf03   :  { %6430 = vrcp.f32 %v2706_v28 }
 0xf0d   :  { %v6431_v18 = vpop.eup %6430 }
 0xf0e   :  { %v2710_v7 = vmul.f32 0.0, %v6431_v18 }
 0xf71   :  { %v2713_v58 = vpop.permute.xlu1 %2712 }
 0xf72   :  { %v2715_v46 = vmul.f32 %v6431_v18, %v2713_v58 }
 0xf74   :  { %2717 = vrot.lane.b32.xlu0 %v2715_v46, %s6577_s15 }
 0xfe6   :  { %v2718_v59 = vpop.permute.xlu0 %2717 }
 0xfe7   :  { %v2720_v62 = vadd.f32 %v2718_v59, %v2710_v7 }
 0xfe9   :  { %6432 = vtanh.f32 %v2720_v62  ;;  %v2890_v34 = vrot.slane %v2720_v62, 6 }
 0xff3   :  { %v6433_v33 = vpop.eup %6432 }
 0xff4   :  { %2723 = vrot.lane.b32.xlu1 %v6433_v33, %s6576_s9 }
0x1066   :  { %v2724_v35 = vpop.permute.xlu1 %2723 }
0x1067   :  { %v2726_v36 = vmul.f32 %v6431_v18, %v2724_v35 }
0x1069   :  { %2734 = vrot.lane.b32.xlu0 %v2726_v36, %s6577_s15 }
0x10db   :  { %v2735_v26 = vpop.permute.xlu0 %2734 }
0x10dc   :  { %5747 = vmatmul.mubr.msk.f32.vlgmr.msra.gmra.mrb[32].mxu1 %vm7769_vm3, %v2735_v26  ;;  %5758 = vmatmul.mubr.msk.f32.vlgmr.msra.gmra.mrb[30].mxu0 %vm7770_vm1, %v2735_v26  ;;  %vm7784_vm3 = vmmov %vm7770_vm1 }
0x10dd   :  { %6205 = vmatpush3.bf16.msra.mxu1 %v7381_v20  ;;  %6211 = vmatpush3.bf16.msra.mxu0 %v7339_v31 }
0x10de   :  { %6206 = vmatprep.subr.bf16.mxu1 %v6557_v1  ;;  %6212 = vmatprep.subr.bf16.mxu0 %v6557_v1 }
0x10df   :  { %5779 = vmatprep.mubr.msk.f32.mxu0 %vm6558_vm0, %v6559_v2  ;;  %5768 = vmatprep.mubr.msk.f32.mxu1 %vm6558_vm0, %v6559_v2 }
0x10e1   :  { %6208 = vmatpush3.bf16.msra.mxu1 %v7387_v32  ;;  %6214 = vmatpush3.bf16.msra.mxu0 %v7348_v61 }
0x10e2   :  { %6215 = vmatprep.subr.bf16.mxu1 %v6557_v1  ;;  %6221 = vmatprep.subr.bf16.mxu0 %v6557_v1 }
0x11af   :  { %v2874_v30 = vpop.f32.mrb[30].mxu0 }
0x11b0   :  { %v2879_v50 = vrot.slane %v2874_v30, 6  ;;  %v5759_v27 = vpop.f32.mrb[31].mxu0 }
0x11b2   :  { %v2881_v3 = vadd.f32 %v2879_v50, %v7367_v47 }
0x11b4   :  { %6434 = vtanh.f32 %v2881_v3  ;;  %v5093_v17 = vmul.f32 -1.442695, %v2881_v3 }
0x11b6   :  { %6436 = vpow2.f32 %v5093_v17 }
0x11be   :  { %v6435_v41 = vpop.eup %6434 }
0x11bf   :  { %2894 = vrot.lane.b32.xlu1 %v6435_v41, %s6576_s9 }
0x11c0   :  { %v6437_v57 = vpop.eup %6436 }
0x11c1   :  { %v2885_v60 = vadd.f32 1.0, %v6437_v57 }
0x11c3   :  { %6438 = vrcp.f32 %v2885_v60 }
0x11cd   :  { %v6439_v54 = vpop.eup %6438 }
0x11ce   :  { %v2892_v37 = vmul.f32 %v6439_v54, %v2890_v34 }
0x1231   :  { %v2895_v55 = vpop.permute.xlu1 %2894 }
0x1232   :  { %v2897_v56 = vmul.f32 %v6439_v54, %v2895_v55 }
0x1234   :  { %2899 = vrot.lane.b32.xlu0 %v2897_v56, %s6577_s15 }
0x12a6   :  { %v2900_v0 = vpop.permute.xlu0 %2899 }
0x12a7   :  { %v2902_v42 = vadd.f32 %v2900_v0, %v2892_v37 }
0x12a9   :  { %6440 = vtanh.f32 %v2902_v42  ;;  %v3067_v53 = vrot.slane %v2902_v42, 6 }
0x12b3   :  { %v6441_v40 = vpop.eup %6440 }
0x12b4   :  { %2905 = vrot.lane.b32.xlu1 %v6441_v40, %s6576_s9 }
0x1326   :  { %v2906_v16 = vpop.permute.xlu1 %2905 }
0x1327   :  { %v2908_v38 = vmul.f32 %v6439_v54, %v2906_v16 }
0x1329   :  { %v2910_v29 = vrot.slane %v2908_v38, 2 }
0x132b   :  { %2911 = vrot.lane.b32.xlu0 %v2910_v29, %s6577_s15 }
0x139d   :  { %v2912_v43 = vpop.permute.xlu0 %2911 }
0x139e   :  { %5769 = vmatmul.mubr.msk.f32.vlgmr.msra.gmra.mrb[34].mxu1 %vm7771_vm14, %v2912_v43  ;;  %5780 = vmatmul.mubr.msk.f32.vlgmr.msra.gmra.mrb[32].mxu0 %vm7772_vm12, %v2912_v43  ;;  %vm7785_vm14 = vmmov %vm7770_vm1 }
0x139f   :  { %6217 = vmatpush3.bf16.msra.mxu1 %v7381_v20  ;;  %6223 = vmatpush3.bf16.msra.mxu0 %v7339_v31  ;;  %vm7786_vm12 = vmmov %vm7770_vm1 }
0x13a0   :  { %6218 = vmatprep.subr.bf16.mxu1 %v6557_v1  ;;  %6224 = vmatprep.subr.bf16.mxu0 %v6557_v1 }
0x13a1   :  { %5801 = vmatprep.mubr.msk.f32.mxu0 %vm6558_vm0, %v6559_v2  ;;  %5790 = vmatprep.mubr.msk.f32.mxu1 %vm6558_vm0, %v6559_v2 }
0x13a3   :  { %6220 = vmatpush3.bf16.msra.mxu1 %v7387_v32  ;;  %6226 = vmatpush3.bf16.msra.mxu0 %v7348_v61 }
0x13a4   :  { %6227 = vmatprep.subr.bf16.mxu1 %v6557_v1  ;;  %6233 = vmatprep.subr.bf16.mxu0 %v6557_v1 }
0x1471   :  { %v3051_v19 = vpop.f32.mrb[32].mxu0 }
0x1472   :  { %v3056_v45 = vrot.slane %v3051_v19, 4  ;;  %v5781_v22 = vpop.f32.mrb[33].mxu0 }
0x1474   :  { %v3058_v24 = vadd.f32 %v3056_v45, %v7367_v47 }
0x1476   :  { %6442 = vtanh.f32 %v3058_v24  ;;  %v5096_v8 = vmul.f32 -1.442695, %v3058_v24 }
0x1478   :  { %6444 = vpow2.f32 %v5096_v8 }
0x1480   :  { %v6443_v52 = vpop.eup %6442 }
0x1481   :  { %3071 = vrot.lane.b32.xlu1 %v6443_v52, %s6576_s9 }
0x1482   :  { %v6445_v39 = vpop.eup %6444 }
0x1483   :  { %v3062_v9 = vadd.f32 1.0, %v6445_v39 }
0x1485   :  { %6446 = vrcp.f32 %v3062_v9 }
0x148f   :  { %v6447_v11 = vpop.eup %6446 }
0x1490   :  { %v3069_v14 = vmul.f32 %v6447_v11, %v3067_v53 }
0x14f3   :  { %v3072_v6 = vpop.permute.xlu1 %3071 }
0x14f4   :  { %v3074_v10 = vmul.f32 %v6447_v11, %v3072_v6 }
0x14f6   :  { %3076 = vrot.lane.b32.xlu0 %v3074_v10, %s6577_s15 }
0x1568   :  { %v3077_v13 = vpop.permute.xlu0 %3076 }
0x1569   :  { %v3079_v5 = vadd.f32 %v3077_v13, %v3069_v14 }
0x156b   :  { %6448 = vtanh.f32 %v3079_v5  ;;  %v3244_v49 = vrot.slane %v3079_v5, 6 }
0x1575   :  { %v6449_v48 = vpop.eup %6448 }
0x1576   :  { %3082 = vrot.lane.b32.xlu1 %v6449_v48, %s6576_s9 }
0x15e8   :  { %v3083_v51 = vpop.permute.xlu1 %3082 }
0x15e9   :  { %v3085_v15 = vmul.f32 %v6447_v11, %v3083_v51 }
0x15eb   :  { %v3087_v12 = vrot.slane %v3085_v15, 4 }
0x15ed   :  { %3088 = vrot.lane.b32.xlu0 %v3087_v12, %s6577_s15 }
0x165f   :  { %v3089_v63 = vpop.permute.xlu0 %3088 }
0x1660   :  { %5791 = vmatmul.mubr.msk.f32.vlgmr.msra.gmra.mrb[36].mxu1 %vm7773_vm13, %v3089_v63  ;;  %5802 = vmatmul.mubr.msk.f32.vlgmr.msra.gmra.mrb[34].mxu0 %vm7774_vm2, %v3089_v63  ;;  %vm7787_vm13 = vmmov %vm7770_vm1 }
0x1661   :  { %6229 = vmatpush3.bf16.msra.mxu1 %v7381_v20  ;;  %6235 = vmatpush3.bf16.msra.mxu0 %v7339_v31  ;;  %vm7788_vm2 = vmmov %vm7770_vm1 }
0x1662   :  { %6230 = vmatprep.subr.bf16.mxu1 %v6557_v1  ;;  %6236 = vmatprep.subr.bf16.mxu0 %v6557_v1 }
0x1663   :  { %5823 = vmatprep.mubr.msk.f32.mxu0 %vm6558_vm0, %v6559_v2  ;;  %5812 = vmatprep.mubr.msk.f32.mxu1 %vm6558_vm0, %v6559_v2 }
0x1665   :  { %6232 = vmatpush3.bf16.msra.mxu1 %v7387_v32  ;;  %6238 = vmatpush3.bf16.msra.mxu0 %v7348_v61 }
0x1666   :  { %6239 = vmatprep.subr.bf16.mxu1 %v6557_v1  ;;  %6245 = vmatprep.subr.bf16.mxu0 %v6557_v1 }
0x1733   :  { %v3228_v4 = vpop.f32.mrb[34].mxu0 }
0x1734   :  { %v3233_v28 = vrot.slane %v3228_v4, 2  ;;  %v5803_v18 = vpop.f32.mrb[35].mxu0 }
0x1736   :  { %v3235_v58 = vadd.f32 %v3233_v28, %v7367_v47 }
0x1738   :  { %6450 = vtanh.f32 %v3235_v58  ;;  %v5099_v7 = vmul.f32 -1.442695, %v3235_v58 }
0x173a   :  { %6452 = vpow2.f32 %v5099_v7 }
0x1742   :  { %v6451_v46 = vpop.eup %6450 }
0x1743   :  { %3248 = vrot.lane.b32.xlu1 %v6451_v46, %s6576_s9 }
0x1744   :  { %v6453_v59 = vpop.eup %6452 }
0x1745   :  { %v3239_v62 = vadd.f32 1.0, %v6453_v59 }
0x1747   :  { %6454 = vrcp.f32 %v3239_v62 }
0x1751   :  { %v6455_v21 = vpop.eup %6454 }
0x1752   :  { %v3246_v33 = vmul.f32 %v6455_v21, %v3244_v49 }
0x17b5   :  { %v3249_v23 = vpop.permute.xlu1 %3248 }
0x17b6   :  { %v3251_v25 = vmul.f32 %v6455_v21, %v3249_v23 }
0x17b8   :  { %3253 = vrot.lane.b32.xlu0 %v3251_v25, %s6577_s15 }
0x182a   :  { %v3254_v35 = vpop.permute.xlu0 %3253 }
0x182b   :  { %v3256_v36 = vadd.f32 %v3254_v35, %v3246_v33 }
0x182d   :  { %6456 = vtanh.f32 %v3256_v36  ;;  %v3418_v0 = vrot.slane %v3256_v36, 6 }
0x1837   :  { %v6457_v47 = vpop.eup %6456 }
0x1838   :  { %3259 = vrot.lane.b32.xlu1 %v6457_v47, %s6576_s9 }
0x18aa   :  { %v3260_v26 = vpop.permute.xlu1 %3259 }
0x18ab   :  { %v3262_v30 = vmul.f32 %v6455_v21, %v3260_v26 }
0x18ad   :  { %v3264_v50 = vrot.slane %v3262_v30, 6 }
0x18af   :  { %3265 = vrot.lane.b32.xlu0 %v3264_v50, %s6577_s15 }
0x1921   :  { %v3266_v27 = vpop.permute.xlu0 %3265 }
0x1922   :  { %5813 = vmatmul.mubr.msk.f32.vlgmr.msra.gmra.mrb[38].mxu1 %vm7775_vm5, %v3266_v27  ;;  %5824 = vmatmul.mubr.msk.f32.vlgmr.msra.gmra.mrb[36].mxu0 %vm7776_vm9, %v3266_v27  ;;  %vm7789_vm5 = vmmov %vm7770_vm1 }
0x1923   :  { %6241 = vmatpush3.bf16.msra.mxu1 %v7381_v20  ;;  %6247 = vmatpush3.bf16.msra.mxu0 %v7339_v31 }
0x1924   :  { %6242 = vmatprep.subr.bf16.mxu1 %v6557_v1  ;;  %6248 = vmatprep.subr.bf16.mxu0 %v6557_v1 }
0x1925   :  { %5845 = vmatprep.mubr.msk.f32.mxu0 %vm6558_vm0, %v6559_v2  ;;  %5834 = vmatprep.mubr.msk.f32.mxu1 %vm6558_vm0, %v6559_v2 }
0x1927   :  { %6244 = vmatpush3.bf16.msra.mxu1 %v7387_v32  ;;  %6250 = vmatpush3.bf16.msra.mxu0 %v7348_v61 }
0x1928   :  { %6251 = vmatprep.subr.bf16.mxu1 %v6557_v1  ;;  %6257 = vmatprep.subr.bf16.mxu0 %v6557_v1 }
0x19f5   :  { %v3405_v3 = vpop.f32.mrb[36].mxu0 }
0x19f6   :  { %v3409_v41 = vadd.f32 %v3405_v3, %v7365_v44  ;;  %v5825_v17 = vpop.f32.mrb[37].mxu0 }
0x19f8   :  { %6458 = vtanh.f32 %v3409_v41  ;;  %v5102_v60 = vmul.f32 -1.442695, %v3409_v41 }
0x19fa   :  { %6460 = vpow2.f32 %v5102_v60 }
0x1a02   :  { %v6459_v57 = vpop.eup %6458 }
0x1a03   :  { %3422 = vrot.lane.b32.xlu1 %v6459_v57, %s6576_s9 }
0x1a04   :  { %v6461_v54 = vpop.eup %6460 }
0x1a05   :  { %v3413_v55 = vadd.f32 1.0, %v6461_v54 }
0x1a07   :  { %6462 = vrcp.f32 %v3413_v55 }
0x1a11   :  { %v6463_v56 = vpop.eup %6462 }
0x1a12   :  { %v3420_v42 = vmul.f32 %v6463_v56, %v3418_v0 }
0x1a75   :  { %v3423_v34 = vpop.permute.xlu1 %3422 }
0x1a76   :  { %v3425_v37 = vmul.f32 %v6463_v56, %v3423_v34 }
0x1a78   :  { %3427 = vrot.lane.b32.xlu0 %v3425_v37, %s6577_s15 }
0x1aea   :  { %v3428_v40 = vpop.permute.xlu0 %3427 }
0x1aeb   :  { %v3430_v16 = vadd.f32 %v3428_v40, %v3420_v42  ;;  %v103_v40 = vld [vmem:[%s7695_s19 + $0x8] sm:$0xff] }
0x1aed   :  { %6464 = vtanh.f32 %v3430_v16  ;;  %v3594_v14 = vrot.slane %v3430_v16, 6  ;;  %v104_v16 = vld [vmem:[%s7695_s19 + $0x10] sm:$0xff] }
0x1af7   :  { %v6465_v38 = vpop.eup %6464 }
0x1af8   :  { %3433 = vrot.lane.b32.xlu1 %v6465_v38, %s6576_s9 }
0x1b6a   :  { %v3434_v29 = vpop.permute.xlu1 %3433 }
0x1b6b   :  { %v3436_v43 = vmul.f32 %v6463_v56, %v3434_v29  ;;  %v105_v29 = vld [vmem:[%s7695_s19 + $0x18] sm:$0xff] }
0x1b6d   :  { %3438 = vrot.lane.b32.xlu0 %v3436_v43, %s6577_s15  ;;  %v6333_v43 = vpack.c.bf16 %v105_v29, %v104_v16 }
0x1bdf   :  { %v3439_v19 = vpop.permute.xlu0 %3438 }
0x1be0   :  { %5835 = vmatmul.mubr.msk.f32.vlgmr.msra.gmra.mrb[40].mxu1 %vm7777_vm11, %v3439_v19  ;;  %5846 = vmatmul.mubr.msk.f32.vlgmr.msra.gmra.mrb[38].mxu0 %vm7778_vm4, %v3439_v19  ;;  %vm4996_vm11 = vcmask 1024  }
0x1be1   :  { %6253 = vmatpush3.bf16.msra.mxu1 %v7381_v20  ;;  %6259 = vmatpush3.bf16.msra.mxu0 %v7339_v31 }
0x1be2   :  { %6254 = vmatprep.subr.bf16.mxu1 %v6557_v1  ;;  %6260 = vmatprep.subr.bf16.mxu0 %v6557_v1 }
0x1be3   :  { %5867 = vmatprep.mubr.msk.f32.mxu0 %vm6558_vm0, %v6559_v2  ;;  %5856 = vmatprep.mubr.msk.f32.mxu1 %vm6558_vm0, %v6559_v2 }
0x1be5   :  { %6256 = vmatpush3.bf16.msra.mxu1 %v7387_v32  ;;  %6262 = vmatpush3.bf16.msra.mxu0 %v7348_v61 }
0x1be6   :  { %6263 = vmatprep.subr.bf16.mxu1 %v6557_v1  ;;  %6269 = vmatprep.subr.bf16.mxu0 %v6557_v1 }
0x1cb3   :  { %v3578_v45 = vpop.f32.mrb[38].mxu0 }
0x1cb4   :  { %v3583_v22 = vrot.slane %v3578_v45, 6  ;;  %v5847_v24 = vpop.f32.mrb[39].mxu0 }
0x1cb6   :  { %v3585_v52 = vadd.f32 %v3583_v22, %v7365_v44 }
0x1cb8   :  { %6466 = vtanh.f32 %v3585_v52  ;;  %v5105_v39 = vmul.f32 -1.442695, %v3585_v52  ;;  %v97_v52 = vld [vmem:[%s7696_s17] sm:$0xff] }
0x1cba   :  { %6468 = vpow2.f32 %v5105_v39 }
0x1cc2   :  { %v6467_v8 = vpop.eup %6466 }
0x1cc3   :  { %3598 = vrot.lane.b32.xlu1 %v6467_v8, %s6576_s9  ;;  %v98_v8 = vld [vmem:[%s7696_s17 + $0x8] sm:$0xff] }
0x1cc4   :  { %v6469_v9 = vpop.eup %6468  ;;  %v7543_v39 = vpack.c.bf16 %v98_v8, %v97_v52 }
0x1cc5   :  { %v3589_v11 = vadd.f32 1.0, %v6469_v9  ;;  %v99_v9 = vld [vmem:[%s7696_s17 + $0x10] sm:$0xff] }
0x1cc7   :  { %6470 = vrcp.f32 %v3589_v11  ;;  %v100_v11 = vld [vmem:[%s7696_s17 + $0x18] sm:$0xff] }
0x1cd1   :  { %v6471_v6 = vpop.eup %6470 }
0x1cd2   :  { %v3596_v13 = vmul.f32 %v6471_v6, %v3594_v14 }
0x1d35   :  { %v3599_v10 = vpop.permute.xlu1 %3598 }
0x1d36   :  { %v3601_v53 = vmul.f32 %v6471_v6, %v3599_v10  ;;  %v7554_v10 = vpack.c.bf16 %v100_v11, %v99_v9 }
0x1d38   :  { %3603 = vrot.lane.b32.xlu0 %v3601_v53, %s6577_s15  ;;  %v7573_v53 = vld [vmem:[%s7697_s18] ss:$0 sm:$0xff] }
0x1daa   :  { %v3604_v5 = vpop.permute.xlu0 %3603 }
0x1dab   :  { %v3606_v48 = vadd.f32 %v3604_v5, %v3596_v13 }
0x1dad   :  { %6472 = vtanh.f32 %v3606_v48  ;;  %v3771_v25 = vrot.slane %v3606_v48, 6 }
0x1db7   :  { %v6473_v51 = vpop.eup %6472 }
0x1db8   :  { %3609 = vrot.lane.b32.xlu1 %v6473_v51, %s6576_s9 }
0x1e2a   :  { %v3610_v15 = vpop.permute.xlu1 %3609 }
0x1e2b   :  { %v3612_v12 = vmul.f32 %v6471_v6, %v3610_v15 }
0x1e2d   :  { %v3614_v63 = vrot.slane %v3612_v12, 2 }
0x1e2f   :  { %3615 = vrot.lane.b32.xlu0 %v3614_v63, %s6577_s15 }
0x1ea1   :  { %v3616_v4 = vpop.permute.xlu0 %3615 }
0x1ea2   :  { %5857 = vmatmul.mubr.msk.f32.vlgmr.msra.gmra.mrb[42].mxu1 %vm7779_vm6, %v3616_v4  ;;  %5868 = vmatmul.mubr.msk.f32.vlgmr.msra.gmra.mrb[40].mxu0 %vm7780_vm8, %v3616_v4 }
0x1ea3   :  { %6265 = vmatpush3.bf16.msra.mxu1 %v7381_v20  ;;  %6271 = vmatpush3.bf16.msra.mxu0 %v7339_v31 }
0x1ea4   :  { %6266 = vmatprep.subr.bf16.mxu1 %v6557_v1  ;;  %6272 = vmatprep.subr.bf16.mxu0 %v6557_v1 }
0x1ea5   :  { %5889 = vmatprep.mubr.msk.f32.mxu0 %vm6558_vm0, %v6559_v2  ;;  %5878 = vmatprep.mubr.msk.f32.mxu1 %vm6558_vm0, %v6559_v2 }
0x1ea7   :  { %6268 = vmatpush3.bf16.msra.mxu1 %v7387_v32  ;;  %6274 = vmatpush3.bf16.msra.mxu0 %v7348_v61 }
0x1ea8   :  { %6275 = vmatprep.subr.bf16.mxu1 %v6557_v1  ;;  %6329 = vmatprep.subr.bf16.mxu0 %v6557_v1 }
0x1f75   :  { %v3755_v28 = vpop.f32.mrb[40].mxu0 }
0x1f76   :  { %v3760_v31 = vrot.slane %v3755_v28, 4  ;;  %v5869_v18 = vpop.f32.mrb[41].mxu0 }
0x1f78   :  { %v3762_v58 = vadd.f32 %v3760_v31, %v7365_v44 }
0x1f7a   :  { %6474 = vtanh.f32 %v3762_v58  ;;  %v5108_v7 = vmul.f32 -1.442695, %v3762_v58 }
0x1f7c   :  { %6476 = vpow2.f32 %v5108_v7 }
0x1f84   :  { %v6475_v46 = vpop.eup %6474 }
0x1f85   :  { %3775 = vrot.lane.b32.xlu1 %v6475_v46, %s6576_s9 }
0x1f86   :  { %v6477_v59 = vpop.eup %6476 }
0x1f87   :  { %v3766_v62 = vadd.f32 1.0, %v6477_v59 }
0x1f89   :  { %6478 = vrcp.f32 %v3766_v62 }
0x1f93   :  { %v6479_v21 = vpop.eup %6478 }
0x1f94   :  { %v3773_v49 = vmul.f32 %v6479_v21, %v3771_v25 }
0x1ff7   :  { %v3776_v61 = vpop.permute.xlu1 %3775 }
0x1ff8   :  { %v3778_v23 = vmul.f32 %v6479_v21, %v3776_v61 }
0x1ffa   :  { %3780 = vrot.lane.b32.xlu0 %v3778_v23, %s6577_s15 }
0x206c   :  { %v3781_v33 = vpop.permute.xlu0 %3780 }
0x206d   :  { %v3783_v35 = vadd.f32 %v3781_v33, %v3773_v49 }
0x206f   :  { %6480 = vtanh.f32 %v3783_v35 }
0x2079   :  { %v6481_v36 = vpop.eup %6480 }
0x207a   :  { %3786 = vrot.lane.b32.xlu1 %v6481_v36, %s6576_s9 }
0x20ec   :  { %v3787_v47 = vpop.permute.xlu1 %3786 }
0x20ed   :  { %v3789_v26 = vmul.f32 %v6479_v21, %v3787_v47 }
0x20ef   :  { %v3791_v30 = vrot.slane %v3789_v26, 4 }
0x20f1   :  { %3792 = vrot.lane.b32.xlu0 %v3791_v30, %s6577_s15 }
0x2163   :  { %v3793_v50 = vpop.permute.xlu0 %3792 }
0x2164   :  { %5879 = vmatmul.mubr.msk.f32.vlgmr.msra.gmra.mrb[44].mxu1 %vm7781_vm15, %v3793_v50  ;;  %5890 = vmatmul.mubr.msk.f32.vlgmr.msra.gmra.mrb[42].mxu0 %vm7782_vm10, %v3793_v50 }
0x2165   :  { %6277 = vmatpush3.bf16.msra.mxu1 %v7381_v20  ;;  %5999 = vmatprep.mubr.msk.f32.mxu0 %vm6558_vm0, %v6559_v2 }
0x2166   :  { %6278 = vmatprep.subr.bf16.mxu1 %v6557_v1  ;;  %5900 = vmatprep.mubr.msk.f32.mxu1 %vm6558_vm0, %v6559_v2 }
0x2169   :  { %6280 = vmatpush3.bf16.msra.mxu1 %v7387_v32  ;;  %v3948_v32 = vrot.slane %v3783_v35, 6 }
0x216a   :  { %6281 = vmatprep.subr.bf16.mxu1 %v6557_v1 }
0x2237   :  { %v3932_v27 = vpop.f32.mrb[42].mxu0 }
0x2238   :  { %v3937_v3 = vrot.slane %v3932_v27, 2  ;;  %v5891_v41 = vpop.f32.mrb[43].mxu0 }
0x223a   :  { %v3939_v17 = vadd.f32 %v3937_v3, %v7365_v44  ;;  %v102_v44 = vld [vmem:[%s7695_s19] sm:$0xff] }
0x223b   :  { %v6330_v38 = vpack.c.bf16 %v103_v40, %v102_v44 }
0x223c   :  { %6482 = vtanh.f32 %v3939_v17  ;;  %v5111_v20 = vmul.f32 -1.442695, %v3939_v17 }
0x223d   :  { %6331 = vmatpush3.bf16.msra.mxu0 %v6330_v38 }
0x223e   :  { %6484 = vpow2.f32 %v5111_v20  ;;  %6332 = vmatprep.subr.bf16.mxu0 %v6557_v1 }
0x2241   :  { %6334 = vmatpush3.bf16.msra.mxu0 %v6333_v43 }
0x2242   :  { %6335 = vmatprep.subr.bf16.mxu0 %v6557_v1 }
0x2246   :  { %v6483_v57 = vpop.eup %6482 }
0x2247   :  { %3952 = vrot.lane.b32.xlu1 %v6483_v57, %s6576_s9 }
0x2248   :  { %v6485_v60 = vpop.eup %6484 }
0x2249   :  { %v3943_v54 = vadd.f32 1.0, %v6485_v60 }
0x224b   :  { %6486 = vrcp.f32 %v3943_v54 }
0x2255   :  { %v6487_v55 = vpop.eup %6486 }
0x2256   :  { %v3950_v37 = vmul.f32 %v6487_v55, %v3948_v32 }
0x22b9   :  { %v3953_v56 = vpop.permute.xlu1 %3952 }
0x22ba   :  { %v3955_v34 = vmul.f32 %v6487_v55, %v3953_v56 }
0x22bc   :  { %3957 = vrot.lane.b32.xlu0 %v3955_v34, %s6577_s15 }
0x232e   :  { %v3958_v0 = vpop.permute.xlu0 %3957 }
0x232f   :  { %v3960_v42 = vadd.f32 %v3958_v0, %v3950_v37 }
0x2331   :  { %6488 = vtanh.f32 %v3960_v42 }
0x233b   :  { %v6489_v19 = vpop.eup %6488 }
0x233c   :  { %3963 = vrot.lane.b32.xlu1 %v6489_v19, %s6576_s9 }
0x23ae   :  { %v3964_v45 = vpop.permute.xlu1 %3963 }
0x23af   :  { %v3966_v22 = vmul.f32 %v6487_v55, %v3964_v45 }
0x23b1   :  { %v3968_v24 = vrot.slane %v3966_v22, 6 }
0x23b3   :  { %3969 = vrot.lane.b32.xlu0 %v3968_v24, %s6577_s15 }
0x2425   :  { %v3970_v6 = vpop.permute.xlu0 %3969 }
0x2426   :  { %5901 = vmatmul.mubr.msk.f32.vlgmr.msra.gmra.mrb[46].mxu1 %vm7783_vm7, %v3970_v6  ;;  %6000 = vmatmul.mubr.msk.f32.vlgmr.msra.gmra.mrb[44].mxu0 %vm7784_vm3, %v3970_v6 }
0x2427   :  { %6283 = vmatpush3.bf16.msra.mxu1 %v7543_v39  ;;  %5911 = vmatprep.mubr.msk.f32.mxu1 %vm6558_vm0, %v6559_v2 }
0x2428   :  { %6284 = vmatprep.subr.bf16.mxu1 %v6557_v1  ;;  %6010 = vmatprep.mubr.msk.f32.mxu0 %vm6558_vm0, %v6559_v2 }
0x242b   :  { %6286 = vmatpush3.bf16.msra.mxu1 %v7554_v10 }
0x242c   :  { %6287 = vmatprep.subr.bf16.mxu1 %v6557_v1 }
0x242e   :  { %5912 = vmatmul.mubr.f32.vlgmr.msra.gmra.mrb[32].mxu1 %v6559_v2 }
0x242f   :  { %6289 = vmatpush3.bf16.msra.mxu1 %v7543_v39  ;;  %5922 = vmatprep.mubr.msk.f32.mxu1 %vm6558_vm0, %v6559_v2 }
0x2430   :  { %6290 = vmatprep.subr.bf16.mxu1 %v6557_v1 }
0x2433   :  { %6292 = vmatpush3.bf16.msra.mxu1 %v7554_v10 }
0x2434   :  { %6293 = vmatprep.subr.bf16.mxu1 %v6557_v1 }
0x2501   :  { %v4109_v14 = vpop.f32.mrb[32].mxu1 }
0x2502   :  { %v6341_v13 = vadd.f32 %v7573_v53, %v4109_v14  ;;  %v5913_v5 = vpop.f32.mrb[33].mxu1 }
0x2504   :  { %6490 = vtanh.f32 %v6341_v13  ;;  %v5113_v51 = vmul.f32 -1.442695, %v6341_v13 }
0x2506   :  { %6492 = vpow2.f32 %v5113_v51 }
0x250e   :  { %v6491_v48 = vpop.eup %6490 }
0x250f   :  { %4123 = vrot.lane.b32.xlu1 %v6491_v48, %s6576_s9 }
0x2510   :  { %v6493_v15 = vpop.eup %6492 }
0x2511   :  { %v4117_v12 = vadd.f32 1.0, %v6493_v15 }
0x2513   :  { %6494 = vrcp.f32 %v4117_v12 }
0x251d   :  { %v6495_v63 = vpop.eup %6494 }
0x251e   :  { %v4121_v31 = vmul.f32 0.0, %v6495_v63 }
0x2581   :  { %v4124_v4 = vpop.permute.xlu1 %4123 }
0x2582   :  { %v4126_v28 = vmul.f32 %v6495_v63, %v4124_v4 }
0x2584   :  { %4128 = vrot.lane.b32.xlu0 %v4126_v28, %s6577_s15 }
0x25f6   :  { %v4129_v18 = vpop.permute.xlu0 %4128 }
0x25f7   :  { %v4131_v58 = vadd.f32 %v4129_v18, %v4121_v31 }
0x25f9   :  { %6496 = vtanh.f32 %v4131_v58 }
0x2603   :  { %v6497_v46 = vpop.eup %6496 }
0x2604   :  { %4134 = vrot.lane.b32.xlu1 %v6497_v46, %s6576_s9 }
0x2676   :  { %v4135_v7 = vpop.permute.xlu1 %4134 }
0x2677   :  { %v4137_v59 = vmul.f32 %v6495_v63, %v4135_v7 }
0x2679   :  { %4139 = vrot.lane.b32.xlu0 %v4137_v59, %s6577_s15 }
0x26eb   :  { %v4140_v62 = vpop.permute.xlu0 %4139 }
0x26ec   :  { %5923 = vmatmul.mubr.msk.f32.vlgmr.msra.gmra.mrb[34].mxu1 %vm7770_vm1, %v4140_v62 }
0x26ed   :  { %6295 = vmatpush3.bf16.msra.mxu1 %v7543_v39  ;;  %5933 = vmatprep.mubr.msk.f32.mxu1 %vm6558_vm0, %v6559_v2 }
0x26ee   :  { %6296 = vmatprep.subr.bf16.mxu1 %v6557_v1 }
0x26f1   :  { %6298 = vmatpush3.bf16.msra.mxu1 %v7554_v10 }
0x26f2   :  { %6299 = vmatprep.subr.bf16.mxu1 %v6557_v1 }
0x27bf   :  { %v4209_v21 = vpop.f32.mrb[34].mxu1 }
0x27c0   :  { %v6342_v61 = vadd.f32 %v7573_v53, %v4209_v21  ;;  %v5924_v23 = vpop.f32.mrb[35].mxu1 }
0x27c2   :  { %6498 = vtanh.f32 %v6342_v61  ;;  %v5115_v49 = vmul.f32 -1.442695, %v6342_v61 }
0x27c4   :  { %6500 = vpow2.f32 %v5115_v49 }
0x27cc   :  { %v6499_v25 = vpop.eup %6498 }
0x27cd   :  { %4223 = vrot.lane.b32.xlu1 %v6499_v25, %s6576_s9 }
0x27ce   :  { %v6501_v33 = vpop.eup %6500 }
0x27cf   :  { %v4217_v35 = vadd.f32 1.0, %v6501_v33 }
0x27d1   :  { %6502 = vrcp.f32 %v4217_v35 }
0x27db   :  { %v6503_v36 = vpop.eup %6502 }
0x27dc   :  { %v4221_v30 = vmul.f32 %v6503_v36, %v4131_v58 }
0x283f   :  { %v4224_v47 = vpop.permute.xlu1 %4223 }
0x2840   :  { %v4226_v26 = vmul.f32 %v6503_v36, %v4224_v47 }
0x2842   :  { %4228 = vrot.lane.b32.xlu0 %v4226_v26, %s6577_s15 }
0x28b4   :  { %v4229_v50 = vpop.permute.xlu0 %4228 }
0x28b5   :  { %v4231_v27 = vadd.f32 %v4229_v50, %v4221_v30 }
0x28b7   :  { %6504 = vtanh.f32 %v4231_v27 }
0x28c1   :  { %v6505_v3 = vpop.eup %6504 }
0x28c2   :  { %4234 = vrot.lane.b32.xlu1 %v6505_v3, %s6576_s9 }
0x2934   :  { %v4235_v41 = vpop.permute.xlu1 %4234 }
0x2935   :  { %v4237_v17 = vmul.f32 %v6503_v36, %v4235_v41 }
0x2937   :  { %4239 = vrot.lane.b32.xlu0 %v4237_v17, %s6577_s15 }
0x29a9   :  { %v4240_v57 = vpop.permute.xlu0 %4239 }
0x29aa   :  { %5934 = vmatmul.mubr.msk.f32.vlgmr.msra.gmra.mrb[36].mxu1 %vm7785_vm14, %v4240_v57 }
0x29ab   :  { %6301 = vmatpush3.bf16.msra.mxu1 %v7543_v39  ;;  %5944 = vmatprep.mubr.msk.f32.mxu1 %vm6558_vm0, %v6559_v2 }
0x29ac   :  { %6302 = vmatprep.subr.bf16.mxu1 %v6557_v1 }
0x29af   :  { %6304 = vmatpush3.bf16.msra.mxu1 %v7554_v10 }
0x29b0   :  { %6305 = vmatprep.subr.bf16.mxu1 %v6557_v1 }
0x2a7d   :  { %v4309_v20 = vpop.f32.mrb[36].mxu1 }
0x2a7e   :  { %v6343_v60 = vadd.f32 %v7573_v53, %v4309_v20  ;;  %v5935_v54 = vpop.f32.mrb[37].mxu1 }
0x2a80   :  { %6506 = vtanh.f32 %v6343_v60  ;;  %v5117_v56 = vmul.f32 -1.442695, %v6343_v60 }
0x2a82   :  { %6508 = vpow2.f32 %v5117_v56 }
0x2a8a   :  { %v6507_v55 = vpop.eup %6506 }
0x2a8b   :  { %4323 = vrot.lane.b32.xlu1 %v6507_v55, %s6576_s9 }
0x2a8c   :  { %v6509_v34 = vpop.eup %6508 }
0x2a8d   :  { %v4317_v32 = vadd.f32 1.0, %v6509_v34 }
0x2a8f   :  { %6510 = vrcp.f32 %v4317_v32 }
0x2a99   :  { %v6511_v37 = vpop.eup %6510 }
0x2a9a   :  { %v4321_v44 = vmul.f32 %v6511_v37, %v4231_v27 }
0x2afd   :  { %v4324_v0 = vpop.permute.xlu1 %4323 }
0x2afe   :  { %v4326_v42 = vmul.f32 %v6511_v37, %v4324_v0 }
0x2b00   :  { %4328 = vrot.lane.b32.xlu0 %v4326_v42, %s6577_s15 }
0x2b72   :  { %v4329_v40 = vpop.permute.xlu0 %4328 }
0x2b73   :  { %v4331_v16 = vadd.f32 %v4329_v40, %v4321_v44 }
0x2b75   :  { %6512 = vtanh.f32 %v4331_v16 }
0x2b7f   :  { %v6513_v38 = vpop.eup %6512 }
0x2b80   :  { %4334 = vrot.lane.b32.xlu1 %v6513_v38, %s6576_s9 }
0x2bf2   :  { %v4335_v29 = vpop.permute.xlu1 %4334 }
0x2bf3   :  { %v4337_v43 = vmul.f32 %v6511_v37, %v4335_v29 }
0x2bf5   :  { %4339 = vrot.lane.b32.xlu0 %v4337_v43, %s6577_s15 }
0x2c67   :  { %v4340_v19 = vpop.permute.xlu0 %4339 }
0x2c68   :  { %5945 = vmatmul.mubr.msk.f32.vlgmr.msra.gmra.mrb[38].mxu1 %vm7786_vm12, %v4340_v19 }
0x2c69   :  { %6307 = vmatpush3.bf16.msra.mxu1 %v7543_v39  ;;  %5955 = vmatprep.mubr.msk.f32.mxu1 %vm6558_vm0, %v6559_v2 }
0x2c6a   :  { %6308 = vmatprep.subr.bf16.mxu1 %v6557_v1 }
0x2c6d   :  { %6310 = vmatpush3.bf16.msra.mxu1 %v7554_v10 }
0x2c6e   :  { %6311 = vmatprep.subr.bf16.mxu1 %v6557_v1 }
0x2d3b   :  { %v4409_v45 = vpop.f32.mrb[38].mxu1 }
0x2d3c   :  { %v6344_v22 = vadd.f32 %v7573_v53, %v4409_v45  ;;  %v5946_v24 = vpop.f32.mrb[39].mxu1 }
0x2d3e   :  { %6514 = vtanh.f32 %v6344_v22  ;;  %v5119_v8 = vmul.f32 -1.442695, %v6344_v22 }
0x2d40   :  { %6516 = vpow2.f32 %v5119_v8 }
0x2d48   :  { %v6515_v52 = vpop.eup %6514 }
0x2d49   :  { %4423 = vrot.lane.b32.xlu1 %v6515_v52, %s6576_s9 }
0x2d4a   :  { %v6517_v9 = vpop.eup %6516 }
0x2d4b   :  { %v4417_v11 = vadd.f32 1.0, %v6517_v9 }
0x2d4d   :  { %6518 = vrcp.f32 %v4417_v11 }
0x2d57   :  { %v6519_v6 = vpop.eup %6518 }
0x2d58   :  { %v4421_v5 = vmul.f32 %v6519_v6, %v4331_v16 }
0x2dbb   :  { %v4424_v14 = vpop.permute.xlu1 %4423 }
0x2dbc   :  { %v4426_v13 = vmul.f32 %v6519_v6, %v4424_v14 }
0x2dbe   :  { %4428 = vrot.lane.b32.xlu0 %v4426_v13, %s6577_s15 }
0x2e30   :  { %v4429_v48 = vpop.permute.xlu0 %4428 }
0x2e31   :  { %v4431_v51 = vadd.f32 %v4429_v48, %v4421_v5 }
0x2e33   :  { %6520 = vtanh.f32 %v4431_v51 }
0x2e3d   :  { %v6521_v15 = vpop.eup %6520 }
0x2e3e   :  { %4434 = vrot.lane.b32.xlu1 %v6521_v15, %s6576_s9 }
0x2eb0   :  { %v4435_v12 = vpop.permute.xlu1 %4434 }
0x2eb1   :  { %v4437_v63 = vmul.f32 %v6519_v6, %v4435_v12 }
0x2eb3   :  { %4439 = vrot.lane.b32.xlu0 %v4437_v63, %s6577_s15 }
0x2f25   :  { %v4440_v4 = vpop.permute.xlu0 %4439 }
0x2f26   :  { %5956 = vmatmul.mubr.msk.f32.vlgmr.msra.gmra.mrb[40].mxu1 %vm7787_vm13, %v4440_v4 }
0x2f27   :  { %6313 = vmatpush3.bf16.msra.mxu1 %v7543_v39  ;;  %5966 = vmatprep.mubr.msk.f32.mxu1 %vm6558_vm0, %v6559_v2 }
0x2f28   :  { %6314 = vmatprep.subr.bf16.mxu1 %v6557_v1 }
0x2f2b   :  { %6316 = vmatpush3.bf16.msra.mxu1 %v7554_v10 }
0x2f2c   :  { %6317 = vmatprep.subr.bf16.mxu1 %v6557_v1 }
0x2ff9   :  { %v4509_v28 = vpop.f32.mrb[40].mxu1 }
0x2ffa   :  { %v6345_v31 = vadd.f32 %v7573_v53, %v4509_v28  ;;  %v5957_v18 = vpop.f32.mrb[41].mxu1 }
0x2ffb   :  { %v107_v18 = vld [vmem:[%s7698_s20 + $0x8] sm:$0xff] }
0x2ffc   :  { %6522 = vtanh.f32 %v6345_v31  ;;  %v5121_v46 = vmul.f32 -1.442695, %v6345_v31 }
0x2ffe   :  { %6524 = vpow2.f32 %v5121_v46 }
0x3006   :  { %v6523_v58 = vpop.eup %6522 }
0x3007   :  { %4523 = vrot.lane.b32.xlu1 %v6523_v58, %s6576_s9  ;;  %v108_v58 = vld [vmem:[%s7698_s20 + $0x10] sm:$0xff] }
0x3008   :  { %v6525_v7 = vpop.eup %6524 }
0x3009   :  { %v4517_v59 = vadd.f32 1.0, %v6525_v7  ;;  %v109_v7 = vld [vmem:[%s7698_s20 + $0x18] sm:$0xff] }
0x300b   :  { %6526 = vrcp.f32 %v4517_v59  ;;  %v6339_v59 = vpack.c.bf16 %v109_v7, %v108_v58 }
0x3015   :  { %v6527_v62 = vpop.eup %6526 }
0x3016   :  { %v4521_v23 = vmul.f32 %v6527_v62, %v4431_v51 }
0x3079   :  { %v4524_v21 = vpop.permute.xlu1 %4523 }
0x307a   :  { %v4526_v61 = vmul.f32 %v6527_v62, %v4524_v21 }
0x307c   :  { %4528 = vrot.lane.b32.xlu0 %v4526_v61, %s6577_s15 }
0x30ee   :  { %v4529_v25 = vpop.permute.xlu0 %4528 }
0x30ef   :  { %v4531_v49 = vadd.f32 %v4529_v25, %v4521_v23  ;;  %v5129_v25 = vld [vmem:[%s7699_s21] ss:$0 sm:$0xff] }
0x30f1   :  { %6528 = vtanh.f32 %v4531_v49 }
0x30fb   :  { %v6529_v33 = vpop.eup %6528 }
0x30fc   :  { %4534 = vrot.lane.b32.xlu1 %v6529_v33, %s6576_s9 }
0x316e   :  { %v4535_v35 = vpop.permute.xlu1 %4534 }
0x316f   :  { %v4537_v36 = vmul.f32 %v6527_v62, %v4535_v35 }
0x3171   :  { %4539 = vrot.lane.b32.xlu0 %v4537_v36, %s6577_s15 }
0x31e3   :  { %v4540_v47 = vpop.permute.xlu0 %4539 }
0x31e4   :  { %5967 = vmatmul.mubr.msk.f32.vlgmr.msra.gmra.mrb[42].mxu1 %vm7788_vm2, %v4540_v47 }
0x31e5   :  { %6319 = vmatpush3.bf16.msra.mxu1 %v7543_v39  ;;  %5977 = vmatprep.mubr.msk.f32.mxu1 %vm6558_vm0, %v6559_v2 }
0x31e6   :  { %6320 = vmatprep.subr.bf16.mxu1 %v6557_v1 }
0x31e9   :  { %6322 = vmatpush3.bf16.msra.mxu1 %v7554_v10 }
0x31ea   :  { %6323 = vmatprep.subr.bf16.mxu1 %v6557_v1 }
0x32b7   :  { %v4609_v26 = vpop.f32.mrb[42].mxu1 }
0x32b8   :  { %v6346_v30 = vadd.f32 %v7573_v53, %v4609_v26  ;;  %v5968_v50 = vpop.f32.mrb[43].mxu1 }
0x32ba   :  { %6530 = vtanh.f32 %v6346_v30  ;;  %v5123_v3 = vmul.f32 -1.442695, %v6346_v30 }
0x32bc   :  { %6532 = vpow2.f32 %v5123_v3 }
0x32c4   :  { %v6531_v27 = vpop.eup %6530 }
0x32c5   :  { %4623 = vrot.lane.b32.xlu1 %v6531_v27, %s6576_s9 }
0x32c6   :  { %v6533_v41 = vpop.eup %6532 }
0x32c7   :  { %v4617_v17 = vadd.f32 1.0, %v6533_v41 }
0x32c9   :  { %6534 = vrcp.f32 %v4617_v17 }
0x32d3   :  { %v6535_v57 = vpop.eup %6534 }
0x32d4   :  { %v4621_v54 = vmul.f32 %v6535_v57, %v4531_v49 }
0x3337   :  { %v4624_v20 = vpop.permute.xlu1 %4623 }
0x3338   :  { %v4626_v60 = vmul.f32 %v6535_v57, %v4624_v20 }
0x333a   :  { %4628 = vrot.lane.b32.xlu0 %v4626_v60, %s6577_s15 }
0x33ac   :  { %v4629_v55 = vpop.permute.xlu0 %4628 }
0x33ad   :  { %v4631_v56 = vadd.f32 %v4629_v55, %v4621_v54 }
0x33af   :  { %6536 = vtanh.f32 %v4631_v56 }
0x33b9   :  { %v6537_v34 = vpop.eup %6536 }
0x33ba   :  { %4634 = vrot.lane.b32.xlu1 %v6537_v34, %s6576_s9 }
0x342c   :  { %v4635_v32 = vpop.permute.xlu1 %4634 }
0x342d   :  { %v4637_v37 = vmul.f32 %v6535_v57, %v4635_v32 }
0x342f   :  { %4639 = vrot.lane.b32.xlu0 %v4637_v37, %s6577_s15 }
0x34a1   :  { %v4640_v0 = vpop.permute.xlu0 %4639 }
0x34a2   :  { %5978 = vmatmul.mubr.msk.f32.vlgmr.msra.gmra.mrb[44].mxu1 %vm7789_vm5, %v4640_v0 }
0x34a3   :  { %6325 = vmatpush3.bf16.msra.mxu1 %v7543_v39  ;;  %5988 = vmatprep.mubr.msk.f32.mxu1 %vm6558_vm0, %v6559_v2  ;;  %vm7790_vm0 = vmmov %vm7770_vm1 }
0x34a4   :  { %6326 = vmatprep.subr.bf16.mxu1 %v6557_v1  ;;  %vm7791_vm9 = vmmov %vm7790_vm0 }
0x34a7   :  { %6328 = vmatpush3.bf16.msra.mxu1 %v7554_v10 }
0x3575   :  { %v4709_v42 = vpop.f32.mrb[44].mxu1 }
0x3576   :  { %v6347_v44 = vadd.f32 %v7573_v53, %v4709_v42  ;;  %v5979_v40 = vpop.f32.mrb[45].mxu1 }
0x3578   :  { %6538 = vtanh.f32 %v6347_v44  ;;  %v5125_v38 = vmul.f32 -1.442695, %v6347_v44 }
0x357a   :  { %6540 = vpow2.f32 %v5125_v38 }
0x3582   :  { %v6539_v16 = vpop.eup %6538 }
0x3583   :  { %4723 = vrot.lane.b32.xlu1 %v6539_v16, %s6576_s9 }
0x3584   :  { %v6541_v29 = vpop.eup %6540 }
0x3585   :  { %v4717_v43 = vadd.f32 1.0, %v6541_v29 }
0x3587   :  { %6542 = vrcp.f32 %v4717_v43 }
0x3591   :  { %v6543_v39 = vpop.eup %6542 }
0x3592   :  { %v4721_v45 = vmul.f32 %v6543_v39, %v4631_v56 }
0x35f5   :  { %v4724_v19 = vpop.permute.xlu1 %4723 }
0x35f6   :  { %v4726_v2 = vmul.f32 %v6543_v39, %v4724_v19 }
0x35f8   :  { %4728 = vrot.lane.b32.xlu0 %v4726_v2, %s6577_s15 }
0x366a   :  { %v4729_v10 = vpop.permute.xlu0 %4728 }
0x366b   :  { %v4731_v22 = vadd.f32 %v4729_v10, %v4721_v45 }
0x366d   :  { %6544 = vtanh.f32 %v4731_v22 }
0x3677   :  { %v6545_v24 = vpop.eup %6544 }
0x3678   :  { %4734 = vrot.lane.b32.xlu1 %v6545_v24, %s6576_s9 }
0x36ea   :  { %v4735_v52 = vpop.permute.xlu1 %4734 }
0x36eb   :  { %v4737_v8 = vmul.f32 %v6543_v39, %v4735_v52 }
0x36ed   :  { %4739 = vrot.lane.b32.xlu0 %v4737_v8, %s6577_s15 }
0x375f   :  { %v4740_v9 = vpop.permute.xlu0 %4739 }
0x3760   :  { %5989 = vmatmul.mubr.msk.f32.vlgmr.msra.gmra.mrb[46].mxu1 %vm7790_vm0, %v4740_v9 }
0x3833   :  { %v4809_v11 = vpop.f32.mrb[46].mxu1 }
0x3834   :  { %v6348_v6 = vadd.f32 %v7573_v53, %v4809_v11  ;;  %v5990_v14 = vpop.f32.mrb[47].mxu1  ;;  %v106_v53 = vld [vmem:[%s7698_s20] sm:$0xff] }
0x3835   :  { %v6336_v46 = vpack.c.bf16 %v107_v18, %v106_v53 }
0x3836   :  { %6546 = vtanh.f32 %v6348_v6  ;;  %v5127_v5 = vmul.f32 -1.442695, %v6348_v6 }
0x3837   :  { %6337 = vmatpush3.bf16.msra.mxu0 %v6336_v46 }
0x3838   :  { %6548 = vpow2.f32 %v5127_v5  ;;  %6338 = vmatprep.subr.bf16.mxu0 %v6557_v1 }
0x383b   :  { %6340 = vmatpush3.bf16.msra.mxu0 %v6339_v59 }
0x3840   :  { %v6547_v13 = vpop.eup %6546 }
0x3841   :  { %4823 = vrot.lane.b32.xlu1 %v6547_v13, %s6576_s9 }
0x3842   :  { %v6549_v48 = vpop.eup %6548 }
0x3843   :  { %v4817_v51 = vadd.f32 1.0, %v6549_v48 }
0x3845   :  { %6550 = vrcp.f32 %v4817_v51 }
0x384f   :  { %v6551_v15 = vpop.eup %6550 }
0x3850   :  { %v4821_v4 = vmul.f32 %v6551_v15, %v4731_v22 }
0x38b3   :  { %v4824_v12 = vpop.permute.xlu1 %4823 }
0x38b4   :  { %v4826_v63 = vmul.f32 %v6551_v15, %v4824_v12 }
0x38b6   :  { %4828 = vrot.lane.b32.xlu0 %v4826_v63, %s6577_s15 }
0x3928   :  { %v4829_v28 = vpop.permute.xlu0 %4828 }
0x3929   :  { %v4831_v31 = vadd.f32 %v4829_v28, %v4821_v4 }
0x392b   :  { %6552 = vtanh.f32 %v4831_v31 }
0x3935   :  { %v6553_v62 = vpop.eup %6552 }
0x3936   :  { %4834 = vrot.lane.b32.xlu1 %v6553_v62, %s6576_s9 }
0x39a8   :  { %v4835_v21 = vpop.permute.xlu1 %4834 }
0x39a9   :  { %v4837_v61 = vmul.f32 %v6551_v15, %v4835_v21 }
0x39ab   :  { %4916 = vrot.lane.b32.xlu0 %v4837_v61, %s6577_s15 }
0x3a1d   :  { %v4917_v23 = vpop.permute.xlu0 %4916 }
0x3a1e   :  { %6011 = vmatmul.mubr.msk.f32.vlgmr.msra.gmra.mrb[44].mxu0 %vm7791_vm9, %v4917_v23 }
0x3af1   :  { %v4986_v49 = vpop.f32.mrb[44].mxu0 }
0x3af2   :  { %v6349_v33 = vadd.f32 %v5129_v25, %v4986_v49  ;;  %v6012_v35 = vpop.f32.mrb[45].mxu0 }
0x3af4   :  { %v4991_v36 = vmax.f32 %v6349_v33, 0.0 }
0x3af6   :  { %4993 = vrot.lane.b32.xlu1 %v4991_v36, %s6556_s0 }
0x3b68   :  { %v4994_v1 = vpop.permute.xlu1 %4993 }
0x3b69   :  { %4997 = vst.msk [vmem:[%s7700_s22] sm:$0x3] %vm4996_vm11, %v4994_v1 }

</bundles_post_ra>
